<compile_context>
chip_gen: v7x
topology: tpu7x:2x2x1
jax: 0.10.0
libtpu: 0.0.40
codegen_flags: <defaults>
</compile_context>

<pallas_src>
import math
from functools import partial

import jax
import jax.numpy as jnp
from jax.experimental import pallas as pl
from jax.experimental.pallas import tpu as pltpu


# ----------------------------------------------------------------------------
# small helpers used inside kernels
# ----------------------------------------------------------------------------
def _mm(a, b, mxu_dtype):
    # MXU matmul with f32 accumulation; operands optionally cast to bf16.
    return jnp.dot(a.astype(mxu_dtype), b.astype(mxu_dtype),
                   preferred_element_type=jnp.float32)


def _layernorm(z, gamma, beta, eps=1e-5):  # PyTorch layer_norm_eps = 1e-5
    mu = jnp.mean(z, axis=-1, keepdims=True)
    var = jnp.mean((z - mu) ** 2, axis=-1, keepdims=True)
    return (z - mu) * jax.lax.rsqrt(var + eps) * gamma + beta


# ----------------------------------------------------------------------------
# Fused encoder-layer kernel.
#
# The activation is presented as a 2-D (S*B, D) array whose rows are ordered
# (s, b): each group of B consecutive rows is one self-attention slab.  A grid
# step owns gn complete slabs (gn*B rows), so attention, FFN, LayerNorms and
# the (last-layer) gate are all computed without touching HBM in between.
# ----------------------------------------------------------------------------
def _encoder_layer_kernel(*refs, batch, nhead, scale, last, mxu_dtype):
    it = iter(refs)
    x_ref = next(it)
    wqkv_ref, bqkv_ref = next(it), next(it)
    wo_ref, bo_ref = next(it), next(it)
    g1_ref, be1_ref = next(it), next(it)
    w1_ref, bb1_ref = next(it), next(it)
    w2_ref, bb2_ref = next(it), next(it)
    g2_ref, be2_ref = next(it), next(it)
    if last:
        gw1_ref, gb1_ref, gw2_ref, gb2_ref = next(it), next(it), next(it), next(it)
    o_ref = next(it)

    M, D = x_ref.shape          # M = gn * batch rows, ordered (s, b)
    B = batch
    gn = M // B
    H = nhead
    Dh = D // H

    x2 = x_ref[...]                                            # (M, D) f32

    # --- QKV projections (weights stacked (3, D, D): aligned splits) --------
    wqkv = wqkv_ref[...]                                       # (3, D, D)
    bqkv = bqkv_ref[...]                                       # (3, D)
    q = _mm(x2, wqkv[0], mxu_dtype) + bqkv[0:1, :]
    k = _mm(x2, wqkv[1], mxu_dtype) + bqkv[1:2, :]
    v = _mm(x2, wqkv[2], mxu_dtype) + bqkv[2:3, :]

    # --- batched multi-head self-attention over the B axis ------------------
    # All (s, head) slabs go through ONE einsum pair (no per-head matmul loop).
    def split_heads(t):          # (M, D) -> (H*gn, B, Dh), head-major leading
        return jnp.concatenate(
            [t[:, h * Dh:(h + 1) * Dh].reshape(gn, B, Dh) for h in range(H)],
            axis=0)

    qh, kh, vh = split_heads(q), split_heads(k), split_heads(v)
    s = jnp.einsum('nqd,nkd->nqk', qh, kh,
                   preferred_element_type=jnp.float32) * scale  # (H*gn, B, B)
    s = s - jnp.max(s, axis=-1, keepdims=True)
    p = jnp.exp(s)
    p = p * pl.reciprocal(jnp.sum(p, axis=-1, keepdims=True), approx=True)  # EUP
    ctx = jnp.einsum('nqk,nkd->nqd', p, vh,
                     preferred_element_type=jnp.float32)        # (H*gn, B, Dh)
    attn = jnp.concatenate(
        [ctx[h * gn:(h + 1) * gn].reshape(M, Dh) for h in range(H)], axis=-1)

    # --- out-proj + residual + LayerNorm1 ------------------------------------
    attn = _mm(attn, wo_ref[...], mxu_dtype) + bo_ref[...]
    h1 = _layernorm(x2 + attn, g1_ref[...], be1_ref[...])

    # --- FFN (lin1 + ReLU + lin2) + residual + LayerNorm2 --------------------
    ff = jnp.maximum(_mm(h1, w1_ref[...], mxu_dtype) + bb1_ref[...], 0.0)
    ff = _mm(ff, w2_ref[...], mxu_dtype) + bb2_ref[...]
    h2 = _layernorm(h1 + ff, g2_ref[...], be2_ref[...])

    # --- temporal-attention gate, fused into the last layer only -------------
    if last:
        hid = jnp.maximum(_mm(h2, gw1_ref[...], mxu_dtype) + gb1_ref[...], 0.0)
        logit = jnp.sum(hid * gw2_ref[...], axis=-1, keepdims=True) + gb2_ref[...]
        h2 = h2 * jax.nn.sigmoid(logit)

    o_ref[...] = h2.astype(o_ref.dtype)


def _rep_spec(shape):
    nd = len(shape)
    return pl.BlockSpec(shape, lambda i, _nd=nd: (0,) * _nd)


def _choose_gn(S, B, target_rows=512):
    """Attention slabs (s positions) per grid step.

    Keeps the block's sublane dim (gn*B) a multiple of 8, targets ~target_rows
    rows/step (bigger tiles -> closer to HBM roofline), and keeps >=2 grid
    steps when S allows so 'parallel' can shard across v7x's 2 TensorCores.
    """
    a = 8 // math.gcd(8, B)
    gn = max(a, (max(1, target_rows // max(B, 1)) // a) * a)
    half = (pl.cdiv(S, 2) // a) * a
    if half >= a:
        gn = min(gn, half)
    return S if gn >= S else gn


def encoder_layer(h2d, layer_p, gate_p, *, batch, nhead, gn, last, mxu_dtype,
                  vmem_limit_bytes):
    M, D = h2d.shape
    S = M // batch
    F = layer_p["lin1_w"].shape[1]
    rows = gn * batch
    grid = (pl.cdiv(S, gn),)

    in_specs = [pl.BlockSpec((rows, D), lambda i: (i, 0))]
    args = [h2d]

    def add_weight(arr):
        in_specs.append(_rep_spec(arr.shape))
        args.append(arr)

    add_weight(layer_p["in_proj_w"])                   # (3, D, D)
    add_weight(layer_p["in_proj_b"])                   # (3, D)
    add_weight(layer_p["out_proj_w"])                  # (D, D)
    add_weight(layer_p["out_proj_b"].reshape(1, D))
    add_weight(layer_p["ln1_g"].reshape(1, D))
    add_weight(layer_p["ln1_b"].reshape(1, D))
    add_weight(layer_p["lin1_w"])                      # (D, F)
    add_weight(layer_p["lin1_b"].reshape(1, F))
    add_weight(layer_p["lin2_w"])                      # (F, D)
    add_weight(layer_p["lin2_b"].reshape(1, D))
    add_weight(layer_p["ln2_g"].reshape(1, D))
    add_weight(layer_p["ln2_b"].reshape(1, D))
    if last:
        Hg = gate_p["attn_w1"].shape[1]
        add_weight(gate_p["attn_w1"])                  # (D, Hg)
        add_weight(gate_p["attn_b1"].reshape(1, Hg))
        add_weight(gate_p["attn_w2"].reshape(1, Hg))   # (Hg,1) -> row vector
        add_weight(gate_p["attn_b2"].reshape(1, 1))

    kernel = partial(_encoder_layer_kernel, batch=batch, nhead=nhead,
                     scale=1.0 / math.sqrt(D // nhead), last=last,
                     mxu_dtype=mxu_dtype)

    return pl.pallas_call(
        kernel,
        out_shape=jax.ShapeDtypeStruct((M, D), jnp.float32),
        grid=grid,
        in_specs=in_specs,
        out_specs=pl.BlockSpec((rows, D), lambda i: (i, 0)),
        compiler_params=pltpu.CompilerParams(
            dimension_semantics=("parallel",),
            vmem_limit_bytes=vmem_limit_bytes),
    )(*args)


# ----------------------------------------------------------------------------
# Parameter setup (Linear weights stored as (in, out) == PyTorch weight.T;
# in_proj_w[a] == in_proj_weight[a*D:(a+1)*D].T for a in {q,k,v}.)
# ----------------------------------------------------------------------------
def make_positional_encoding(max_len, d_model):
    position = jnp.arange(max_len, dtype=jnp.float32)[:, None]
    div_term = jnp.exp(
        jnp.arange(0, d_model, 2, dtype=jnp.float32) * (-math.log(10000.0) / d_model)
    )
    ang = position * div_term
    pe = jnp.zeros((max_len, d_model), jnp.float32)
    pe = pe.at[:, 0::2].set(jnp.sin(ang))
    pe = pe.at[:, 1::2].set(jnp.cos(ang))
    return pe[None]                                    # (1, max_len, d_model)


def init_params(key, d_model, nhead, num_layers, dim_ff, attn_hidden=256,
                max_len=5000, scale=0.02):
    def nxt():
        nonlocal key
        key, sub = jax.random.split(key)
        return sub

    layers = []
    for _ in range(num_layers):
        layers.append(dict(
            in_proj_w=jax.random.normal(nxt(), (3, d_model, d_model), jnp.float32) * scale,
            in_proj_b=jax.random.normal(nxt(), (3, d_model), jnp.float32) * scale,
            out_proj_w=jax.random.normal(nxt(), (d_model, d_model), jnp.float32) * scale,
            out_proj_b=jax.random.normal(nxt(), (d_model,), jnp.float32) * scale,
            lin1_w=jax.random.normal(nxt(), (d_model, dim_ff), jnp.float32) * scale,
            lin1_b=jax.random.normal(nxt(), (dim_ff,), jnp.float32) * scale,
            lin2_w=jax.random.normal(nxt(), (dim_ff, d_model), jnp.float32) * scale,
            lin2_b=jax.random.normal(nxt(), (d_model,), jnp.float32) * scale,
            ln1_g=jnp.ones((d_model,), jnp.float32),
            ln1_b=jnp.zeros((d_model,), jnp.float32),
            ln2_g=jnp.ones((d_model,), jnp.float32),
            ln2_b=jnp.zeros((d_model,), jnp.float32),
        ))
    return dict(
        layers=layers,
        attn_w1=jax.random.normal(nxt(), (d_model, attn_hidden), jnp.float32) * scale,
        attn_b1=jax.random.normal(nxt(), (attn_hidden,), jnp.float32) * scale,
        attn_w2=jax.random.normal(nxt(), (attn_hidden, 1), jnp.float32) * scale,
        attn_b2=jax.random.normal(nxt(), (1,), jnp.float32) * scale,
        pe=make_positional_encoding(max_len, d_model),
    )


# ----------------------------------------------------------------------------
# Forward pass
# ----------------------------------------------------------------------------
def temporal_transformer_forward(x, params, *, nhead, mxu_dtype=jnp.bfloat16,
                                 target_rows=512,
                                 vmem_limit_bytes=64 * 1024 * 1024):
    """x: (B, S, D) float32 -> attended features (B, S, D) float32."""
    B, S, D = x.shape
    # PositionalEncoding (added along S) is folded into the single layout
    # transpose below; XLA fuses the broadcast-add into the transpose copy, so
    # it costs no extra HBM pass.  batch_first=False => attention runs over
    # axis 0 (B) with S as the batch of attention; the (S, B, D) row ordering
    # puts the attention-row axis in the sublane dim so the fused per-layer
    # kernel needs no in-kernel relayout transposes.
    h = (x + params["pe"][:, :S, :]).transpose(1, 0, 2).reshape(S * B, D)
    gn = _choose_gn(S, B, target_rows)
    n_layers = len(params["layers"])
    for li, layer_p in enumerate(params["layers"]):
        h = encoder_layer(h, layer_p, params, batch=B, nhead=nhead, gn=gn,
                          last=(li == n_layers - 1), mxu_dtype=mxu_dtype,
                          vmem_limit_bytes=vmem_limit_bytes)
    return h.reshape(S, B, D).transpose(1, 0, 2)       # back to (B, S, D)


# ----------------------------------------------------------------------------
if __name__ == "__main__":
    # small, module-consistent shapes
    D_MODEL = 32
    NHEAD = 4
    NUM_LAYERS = 2
    DIM_FF = 64
    BATCH, SEQ = 4, 8

    key = jax.random.PRNGKey(0)
    k_x, k_p = jax.random.split(key)
    x = jax.random.normal(k_x, (BATCH, SEQ, D_MODEL), jnp.float32)
    params = init_params(k_p, D_MODEL, NHEAD, NUM_LAYERS, DIM_FF)

    # mxu_dtype=jnp.bfloat16 (default) feeds the v6e/v7x-native MXU path with
    # f32 accumulation; pass mxu_dtype=jnp.float32 to match PyTorch numerics
    # exactly.  Elementwise / softmax / LayerNorm math is always f32.
    fwd = jax.jit(partial(temporal_transformer_forward, nhead=NHEAD))
    out = jax.block_until_ready(fwd(x, params))

    assert out.shape == (BATCH, SEQ, D_MODEL), out.shape
    assert out.dtype == jnp.float32
    assert bool(jnp.all(jnp.isfinite(out)))
    print("KERNEL_OK")
</pallas_src>

<mosaic_0001>
module attributes {stable_mosaic.version = 11 : i64} {
  func.func @_encoder_layer_kernel(%arg0: i32, %arg1: memref<16x32xf32, #tpu.memory_space<vmem>>, %arg2: memref<3x32x32xf32, #tpu.memory_space<vmem>>, %arg3: memref<3x32xf32, #tpu.memory_space<vmem>>, %arg4: memref<32x32xf32, #tpu.memory_space<vmem>>, %arg5: memref<1x32xf32, #tpu.memory_space<vmem>>, %arg6: memref<1x32xf32, #tpu.memory_space<vmem>>, %arg7: memref<1x32xf32, #tpu.memory_space<vmem>>, %arg8: memref<32x64xf32, #tpu.memory_space<vmem>>, %arg9: memref<1x64xf32, #tpu.memory_space<vmem>>, %arg10: memref<64x32xf32, #tpu.memory_space<vmem>>, %arg11: memref<1x32xf32, #tpu.memory_space<vmem>>, %arg12: memref<1x32xf32, #tpu.memory_space<vmem>>, %arg13: memref<1x32xf32, #tpu.memory_space<vmem>>, %arg14: memref<32x256xf32, #tpu.memory_space<vmem>>, %arg15: memref<1x256xf32, #tpu.memory_space<vmem>>, %arg16: memref<1x256xf32, #tpu.memory_space<vmem>>, %arg17: memref<1x1xf32, #tpu.memory_space<vmem>>, %arg18: memref<16x32xf32, #tpu.memory_space<vmem>>) attributes {dimension_semantics = [#tpu.dimension_semantics<parallel>], iteration_bounds = array<i64: 2>, scalar_prefetch = 0 : i64, scratch_operands = 0 : i64, tpu.core_type = #tpu.core_type<tc>, window_params = [{transform_indices = @transform_0, window_bounds = array<i64: 16, 32>}, {pipeline_mode = #tpu.pipeline_mode<synchronous>, transform_indices = @transform_1, window_bounds = array<i64: 3, 32, 32>}, {pipeline_mode = #tpu.pipeline_mode<synchronous>, transform_indices = @transform_2, window_bounds = array<i64: 3, 32>}, {pipeline_mode = #tpu.pipeline_mode<synchronous>, transform_indices = @transform_3, window_bounds = array<i64: 32, 32>}, {pipeline_mode = #tpu.pipeline_mode<synchronous>, transform_indices = @transform_4, window_bounds = array<i64: 1, 32>}, {pipeline_mode = #tpu.pipeline_mode<synchronous>, transform_indices = @transform_5, window_bounds = array<i64: 1, 32>}, {pipeline_mode = #tpu.pipeline_mode<synchronous>, transform_indices = @transform_6, window_bounds = array<i64: 1, 32>}, {pipeline_mode = #tpu.pipeline_mode<synchronous>, transform_indices = @transform_7, window_bounds = array<i64: 32, 64>}, {pipeline_mode = #tpu.pipeline_mode<synchronous>, transform_indices = @transform_8, window_bounds = array<i64: 1, 64>}, {pipeline_mode = #tpu.pipeline_mode<synchronous>, transform_indices = @transform_9, window_bounds = array<i64: 64, 32>}, {pipeline_mode = #tpu.pipeline_mode<synchronous>, transform_indices = @transform_10, window_bounds = array<i64: 1, 32>}, {pipeline_mode = #tpu.pipeline_mode<synchronous>, transform_indices = @transform_11, window_bounds = array<i64: 1, 32>}, {pipeline_mode = #tpu.pipeline_mode<synchronous>, transform_indices = @transform_12, window_bounds = array<i64: 1, 32>}, {pipeline_mode = #tpu.pipeline_mode<synchronous>, transform_indices = @transform_13, window_bounds = array<i64: 32, 256>}, {pipeline_mode = #tpu.pipeline_mode<synchronous>, transform_indices = @transform_14, window_bounds = array<i64: 1, 256>}, {pipeline_mode = #tpu.pipeline_mode<synchronous>, transform_indices = @transform_15, window_bounds = array<i64: 1, 256>}, {pipeline_mode = #tpu.pipeline_mode<synchronous>, transform_indices = @transform_16, window_bounds = array<i64: 1, 1>}, {transform_indices = @transform_17, window_bounds = array<i64: 16, 32>}]} {
    %c0 = arith.constant 0 : index
    %c0_0 = arith.constant 0 : index
    %0 = vector.load %arg1[%c0, %c0_0] : memref<16x32xf32, #tpu.memory_space<vmem>>, vector<16x32xf32>
    %c0_1 = arith.constant 0 : index
    %c0_2 = arith.constant 0 : index
    %c0_3 = arith.constant 0 : index
    %1 = vector.load %arg2[%c0_1, %c0_2, %c0_3] : memref<3x32x32xf32, #tpu.memory_space<vmem>>, vector<3x32x32xf32>
    %c0_4 = arith.constant 0 : index
    %c0_5 = arith.constant 0 : index
    %2 = vector.load %arg3[%c0_4, %c0_5] : memref<3x32xf32, #tpu.memory_space<vmem>>, vector<3x32xf32>
    %3 = vector.extract_strided_slice %1 {offsets = [0, 0, 0], sizes = [1, 32, 32], strides = [1, 1, 1]} : vector<3x32x32xf32> to vector<1x32x32xf32>
    %4 = vector.shape_cast %3 : vector<1x32x32xf32> to vector<32x32xf32>
    %5 = arith.truncf %0 : vector<16x32xf32> to vector<16x32xbf16>
    %6 = arith.truncf %4 : vector<32x32xf32> to vector<32x32xbf16>
    %cst = arith.constant dense<0.000000e+00> : vector<16x32xf32>
    %7 = tpu.matmul %5, %6, %cst {dimension_numbers = #tpu.dot_dimension_numbers<[1], [0], [0], [1], [0, 0, 1, 1], [], []>} : vector<16x32xbf16>, vector<32x32xbf16>, vector<16x32xf32> -> vector<16x32xf32>
    %8 = vector.extract_strided_slice %2 {offsets = [0, 0], sizes = [1, 32], strides = [1, 1]} : vector<3x32xf32> to vector<1x32xf32>
    %9 = vector.broadcast %8 : vector<1x32xf32> to vector<16x32xf32>
    %10 = arith.addf %7, %9 : vector<16x32xf32>
    %11 = vector.extract_strided_slice %1 {offsets = [1, 0, 0], sizes = [1, 32, 32], strides = [1, 1, 1]} : vector<3x32x32xf32> to vector<1x32x32xf32>
    %12 = vector.shape_cast %11 : vector<1x32x32xf32> to vector<32x32xf32>
    %13 = arith.truncf %0 : vector<16x32xf32> to vector<16x32xbf16>
    %14 = arith.truncf %12 : vector<32x32xf32> to vector<32x32xbf16>
    %cst_6 = arith.constant dense<0.000000e+00> : vector<16x32xf32>
    %15 = tpu.matmul %13, %14, %cst_6 {dimension_numbers = #tpu.dot_dimension_numbers<[1], [0], [0], [1], [0, 0, 1, 1], [], []>} : vector<16x32xbf16>, vector<32x32xbf16>, vector<16x32xf32> -> vector<16x32xf32>
    %16 = vector.extract_strided_slice %2 {offsets = [1, 0], sizes = [1, 32], strides = [1, 1]} : vector<3x32xf32> to vector<1x32xf32>
    %17 = vector.broadcast %16 : vector<1x32xf32> to vector<16x32xf32>
    %18 = arith.addf %15, %17 : vector<16x32xf32>
    %19 = vector.extract_strided_slice %1 {offsets = [2, 0, 0], sizes = [1, 32, 32], strides = [1, 1, 1]} : vector<3x32x32xf32> to vector<1x32x32xf32>
    %20 = vector.shape_cast %19 : vector<1x32x32xf32> to vector<32x32xf32>
    %21 = arith.truncf %0 : vector<16x32xf32> to vector<16x32xbf16>
    %22 = arith.truncf %20 : vector<32x32xf32> to vector<32x32xbf16>
    %cst_7 = arith.constant dense<0.000000e+00> : vector<16x32xf32>
    %23 = tpu.matmul %21, %22, %cst_7 {dimension_numbers = #tpu.dot_dimension_numbers<[1], [0], [0], [1], [0, 0, 1, 1], [], []>} : vector<16x32xbf16>, vector<32x32xbf16>, vector<16x32xf32> -> vector<16x32xf32>
    %24 = vector.extract_strided_slice %2 {offsets = [2, 0], sizes = [1, 32], strides = [1, 1]} : vector<3x32xf32> to vector<1x32xf32>
    %25 = vector.broadcast %24 : vector<1x32xf32> to vector<16x32xf32>
    %26 = arith.addf %23, %25 : vector<16x32xf32>
    %27 = vector.extract_strided_slice %10 {offsets = [0, 0], sizes = [16, 8], strides = [1, 1]} : vector<16x32xf32> to vector<16x8xf32>
    %28 = vector.shape_cast %27 : vector<16x8xf32> to vector<4x4x8xf32>
    %29 = vector.extract_strided_slice %10 {offsets = [0, 8], sizes = [16, 8], strides = [1, 1]} : vector<16x32xf32> to vector<16x8xf32>
    %30 = vector.shape_cast %29 : vector<16x8xf32> to vector<4x4x8xf32>
    %31 = vector.extract_strided_slice %10 {offsets = [0, 16], sizes = [16, 8], strides = [1, 1]} : vector<16x32xf32> to vector<16x8xf32>
    %32 = vector.shape_cast %31 : vector<16x8xf32> to vector<4x4x8xf32>
    %33 = vector.extract_strided_slice %10 {offsets = [0, 24], sizes = [16, 8], strides = [1, 1]} : vector<16x32xf32> to vector<16x8xf32>
    %34 = vector.shape_cast %33 : vector<16x8xf32> to vector<4x4x8xf32>
    %35 = tpu.concatenate %28, %30, %32, %34 in 0 : vector<4x4x8xf32>, vector<4x4x8xf32>, vector<4x4x8xf32>, vector<4x4x8xf32> -> vector<16x4x8xf32>
    %36 = vector.extract_strided_slice %18 {offsets = [0, 0], sizes = [16, 8], strides = [1, 1]} : vector<16x32xf32> to vector<16x8xf32>
    %37 = vector.shape_cast %36 : vector<16x8xf32> to vector<4x4x8xf32>
    %38 = vector.extract_strided_slice %18 {offsets = [0, 8], sizes = [16, 8], strides = [1, 1]} : vector<16x32xf32> to vector<16x8xf32>
    %39 = vector.shape_cast %38 : vector<16x8xf32> to vector<4x4x8xf32>
    %40 = vector.extract_strided_slice %18 {offsets = [0, 16], sizes = [16, 8], strides = [1, 1]} : vector<16x32xf32> to vector<16x8xf32>
    %41 = vector.shape_cast %40 : vector<16x8xf32> to vector<4x4x8xf32>
    %42 = vector.extract_strided_slice %18 {offsets = [0, 24], sizes = [16, 8], strides = [1, 1]} : vector<16x32xf32> to vector<16x8xf32>
    %43 = vector.shape_cast %42 : vector<16x8xf32> to vector<4x4x8xf32>
    %44 = tpu.concatenate %37, %39, %41, %43 in 0 : vector<4x4x8xf32>, vector<4x4x8xf32>, vector<4x4x8xf32>, vector<4x4x8xf32> -> vector<16x4x8xf32>
    %45 = vector.extract_strided_slice %26 {offsets = [0, 0], sizes = [16, 8], strides = [1, 1]} : vector<16x32xf32> to vector<16x8xf32>
    %46 = vector.shape_cast %45 : vector<16x8xf32> to vector<4x4x8xf32>
    %47 = vector.extract_strided_slice %26 {offsets = [0, 8], sizes = [16, 8], strides = [1, 1]} : vector<16x32xf32> to vector<16x8xf32>
    %48 = vector.shape_cast %47 : vector<16x8xf32> to vector<4x4x8xf32>
    %49 = vector.extract_strided_slice %26 {offsets = [0, 16], sizes = [16, 8], strides = [1, 1]} : vector<16x32xf32> to vector<16x8xf32>
    %50 = vector.shape_cast %49 : vector<16x8xf32> to vector<4x4x8xf32>
    %51 = vector.extract_strided_slice %26 {offsets = [0, 24], sizes = [16, 8], strides = [1, 1]} : vector<16x32xf32> to vector<16x8xf32>
    %52 = vector.shape_cast %51 : vector<16x8xf32> to vector<4x4x8xf32>
    %53 = tpu.concatenate %46, %48, %50, %52 in 0 : vector<4x4x8xf32>, vector<4x4x8xf32>, vector<4x4x8xf32>, vector<4x4x8xf32> -> vector<16x4x8xf32>
    "tpu.trace_start"() <{level = 10 : i32, message = "nqd,nkd->nqk"}> : () -> ()
    %cst_8 = arith.constant dense<0.000000e+00> : vector<16x4x4xf32>
    %54 = tpu.matmul %35, %44, %cst_8 {dimension_numbers = #tpu.dot_dimension_numbers<[2], [2], [1], [1], [0, 0, 0, 1, 1, 1], [0], [0]>} : vector<16x4x8xf32>, vector<16x4x8xf32>, vector<16x4x4xf32> -> vector<16x4x4xf32>
    "tpu.trace_stop"() : () -> ()
    %cst_9 = arith.constant 0.353553385 : f32
    %55 = vector.broadcast %cst_9 : f32 to vector<16x4x4xf32>
    %56 = arith.mulf %54, %55 : vector<16x4x4xf32>
    %cst_10 = arith.constant dense<0xFF800000> : vector<16x4xf32>
    %57 = vector.multi_reduction <maximumf>, %56, %cst_10 [2] : vector<16x4x4xf32> to vector<16x4xf32>
    %58 = vector.shape_cast %57 : vector<16x4xf32> to vector<16x4x1xf32>
    %59 = vector.broadcast %58 : vector<16x4x1xf32> to vector<16x4x4xf32>
    %60 = arith.subf %56, %59 : vector<16x4x4xf32>
    %61 = math.exp %60 : vector<16x4x4xf32>
    %cst_11 = arith.constant dense<0.000000e+00> : vector<16x4xf32>
    %62 = vector.multi_reduction <add>, %61, %cst_11 [2] : vector<16x4x4xf32> to vector<16x4xf32>
    %63 = vector.shape_cast %62 : vector<16x4xf32> to vector<16x4x1xf32>
    %64 = tpu.reciprocal %63 {approx = true} : vector<16x4x1xf32> -> vector<16x4x1xf32>
    %65 = vector.broadcast %64 : vector<16x4x1xf32> to vector<16x4x4xf32>
    %66 = arith.mulf %61, %65 : vector<16x4x4xf32>
    "tpu.trace_start"() <{level = 10 : i32, message = "nqk,nkd->nqd"}> : () -> ()
    %cst_12 = arith.constant dense<0.000000e+00> : vector<16x4x8xf32>
    %67 = tpu.matmul %66, %53, %cst_12 {dimension_numbers = #tpu.dot_dimension_numbers<[2], [1], [1], [2], [0, 0, 0, 1, 1, 2], [0], [0]>} : vector<16x4x4xf32>, vector<16x4x8xf32>, vector<16x4x8xf32> -> vector<16x4x8xf32>
    "tpu.trace_stop"() : () -> ()
    %68 = vector.extract_strided_slice %67 {offsets = [0, 0, 0], sizes = [4, 4, 8], strides = [1, 1, 1]} : vector<16x4x8xf32> to vector<4x4x8xf32>
    %69 = vector.shape_cast %68 : vector<4x4x8xf32> to vector<16x8xf32>
    %70 = vector.extract_strided_slice %67 {offsets = [4, 0, 0], sizes = [4, 4, 8], strides = [1, 1, 1]} : vector<16x4x8xf32> to vector<4x4x8xf32>
    %71 = vector.shape_cast %70 : vector<4x4x8xf32> to vector<16x8xf32>
    %72 = vector.extract_strided_slice %67 {offsets = [8, 0, 0], sizes = [4, 4, 8], strides = [1, 1, 1]} : vector<16x4x8xf32> to vector<4x4x8xf32>
    %73 = vector.shape_cast %72 : vector<4x4x8xf32> to vector<16x8xf32>
    %74 = vector.extract_strided_slice %67 {offsets = [12, 0, 0], sizes = [4, 4, 8], strides = [1, 1, 1]} : vector<16x4x8xf32> to vector<4x4x8xf32>
    %75 = vector.shape_cast %74 : vector<4x4x8xf32> to vector<16x8xf32>
    %76 = tpu.concatenate %69, %71, %73, %75 in 1 : vector<16x8xf32>, vector<16x8xf32>, vector<16x8xf32>, vector<16x8xf32> -> vector<16x32xf32>
    %c0_13 = arith.constant 0 : index
    %c0_14 = arith.constant 0 : index
    %77 = vector.load %arg4[%c0_13, %c0_14] : memref<32x32xf32, #tpu.memory_space<vmem>>, vector<32x32xf32>
    %78 = arith.truncf %76 : vector<16x32xf32> to vector<16x32xbf16>
    %79 = arith.truncf %77 : vector<32x32xf32> to vector<32x32xbf16>
    %cst_15 = arith.constant dense<0.000000e+00> : vector<16x32xf32>
    %80 = tpu.matmul %78, %79, %cst_15 {dimension_numbers = #tpu.dot_dimension_numbers<[1], [0], [0], [1], [0, 0, 1, 1], [], []>} : vector<16x32xbf16>, vector<32x32xbf16>, vector<16x32xf32> -> vector<16x32xf32>
    %c0_16 = arith.constant 0 : index
    %c0_17 = arith.constant 0 : index
    %81 = vector.load %arg5[%c0_16, %c0_17] : memref<1x32xf32, #tpu.memory_space<vmem>>, vector<1x32xf32>
    %82 = vector.broadcast %81 : vector<1x32xf32> to vector<16x32xf32>
    %83 = arith.addf %80, %82 : vector<16x32xf32>
    %84 = arith.addf %0, %83 : vector<16x32xf32>
    %c0_18 = arith.constant 0 : index
    %c0_19 = arith.constant 0 : index
    %85 = vector.load %arg6[%c0_18, %c0_19] : memref<1x32xf32, #tpu.memory_space<vmem>>, vector<1x32xf32>
    %c0_20 = arith.constant 0 : index
    %c0_21 = arith.constant 0 : index
    %86 = vector.load %arg7[%c0_20, %c0_21] : memref<1x32xf32, #tpu.memory_space<vmem>>, vector<1x32xf32>
    %cst_22 = arith.constant dense<0.000000e+00> : vector<16xf32>
    %87 = vector.multi_reduction <add>, %84, %cst_22 [1] : vector<16x32xf32> to vector<16xf32>
    %88 = vector.shape_cast %87 : vector<16xf32> to vector<16x1xf32>
    %cst_23 = arith.constant 3.200000e+01 : f32
    %89 = vector.broadcast %cst_23 : f32 to vector<16x1xf32>
    %90 = arith.divf %88, %89 : vector<16x1xf32>
    %91 = vector.broadcast %90 : vector<16x1xf32> to vector<16x32xf32>
    %92 = arith.subf %84, %91 : vector<16x32xf32>
    %93 = arith.mulf %92, %92 : vector<16x32xf32>
    %cst_24 = arith.constant dense<0.000000e+00> : vector<16xf32>
    %94 = vector.multi_reduction <add>, %93, %cst_24 [1] : vector<16x32xf32> to vector<16xf32>
    %95 = vector.shape_cast %94 : vector<16xf32> to vector<16x1xf32>
    %cst_25 = arith.constant 3.200000e+01 : f32
    %96 = vector.broadcast %cst_25 : f32 to vector<16x1xf32>
    %97 = arith.divf %95, %96 : vector<16x1xf32>
    %98 = vector.broadcast %90 : vector<16x1xf32> to vector<16x32xf32>
    %99 = arith.subf %84, %98 : vector<16x32xf32>
    %cst_26 = arith.constant 9.99999974E-6 : f32
    %100 = vector.broadcast %cst_26 : f32 to vector<16x1xf32>
    %101 = arith.addf %97, %100 : vector<16x1xf32>
    %102 = math.rsqrt %101 : vector<16x1xf32>
    %103 = vector.broadcast %102 : vector<16x1xf32> to vector<16x32xf32>
    %104 = arith.mulf %99, %103 : vector<16x32xf32>
    %105 = vector.broadcast %85 : vector<1x32xf32> to vector<16x32xf32>
    %106 = arith.mulf %104, %105 : vector<16x32xf32>
    %107 = vector.broadcast %86 : vector<1x32xf32> to vector<16x32xf32>
    %108 = arith.addf %106, %107 : vector<16x32xf32>
    %c0_27 = arith.constant 0 : index
    %c0_28 = arith.constant 0 : index
    %109 = vector.load %arg8[%c0_27, %c0_28] : memref<32x64xf32, #tpu.memory_space<vmem>>, vector<32x64xf32>
    %110 = arith.truncf %108 : vector<16x32xf32> to vector<16x32xbf16>
    %111 = arith.truncf %109 : vector<32x64xf32> to vector<32x64xbf16>
    %cst_29 = arith.constant dense<0.000000e+00> : vector<16x64xf32>
    %112 = tpu.matmul %110, %111, %cst_29 {dimension_numbers = #tpu.dot_dimension_numbers<[1], [0], [0], [1], [0, 0, 1, 1], [], []>} : vector<16x32xbf16>, vector<32x64xbf16>, vector<16x64xf32> -> vector<16x64xf32>
    %c0_30 = arith.constant 0 : index
    %c0_31 = arith.constant 0 : index
    %113 = vector.load %arg9[%c0_30, %c0_31] : memref<1x64xf32, #tpu.memory_space<vmem>>, vector<1x64xf32>
    %114 = vector.broadcast %113 : vector<1x64xf32> to vector<16x64xf32>
    %115 = arith.addf %112, %114 : vector<16x64xf32>
    %cst_32 = arith.constant 0.000000e+00 : f32
    %116 = vector.broadcast %cst_32 : f32 to vector<16x64xf32>
    %117 = arith.maximumf %115, %116 : vector<16x64xf32>
    %c0_33 = arith.constant 0 : index
    %c0_34 = arith.constant 0 : index
    %118 = vector.load %arg10[%c0_33, %c0_34] : memref<64x32xf32, #tpu.memory_space<vmem>>, vector<64x32xf32>
    %119 = arith.truncf %117 : vector<16x64xf32> to vector<16x64xbf16>
    %120 = arith.truncf %118 : vector<64x32xf32> to vector<64x32xbf16>
    %cst_35 = arith.constant dense<0.000000e+00> : vector<16x32xf32>
    %121 = tpu.matmul %119, %120, %cst_35 {dimension_numbers = #tpu.dot_dimension_numbers<[1], [0], [0], [1], [0, 0, 1, 1], [], []>} : vector<16x64xbf16>, vector<64x32xbf16>, vector<16x32xf32> -> vector<16x32xf32>
    %c0_36 = arith.constant 0 : index
    %c0_37 = arith.constant 0 : index
    %122 = vector.load %arg11[%c0_36, %c0_37] : memref<1x32xf32, #tpu.memory_space<vmem>>, vector<1x32xf32>
    %123 = vector.broadcast %122 : vector<1x32xf32> to vector<16x32xf32>
    %124 = arith.addf %121, %123 : vector<16x32xf32>
    %125 = arith.addf %108, %124 : vector<16x32xf32>
    %c0_38 = arith.constant 0 : index
    %c0_39 = arith.constant 0 : index
    %126 = vector.load %arg12[%c0_38, %c0_39] : memref<1x32xf32, #tpu.memory_space<vmem>>, vector<1x32xf32>
    %c0_40 = arith.constant 0 : index
    %c0_41 = arith.constant 0 : index
    %127 = vector.load %arg13[%c0_40, %c0_41] : memref<1x32xf32, #tpu.memory_space<vmem>>, vector<1x32xf32>
    %cst_42 = arith.constant dense<0.000000e+00> : vector<16xf32>
    %128 = vector.multi_reduction <add>, %125, %cst_42 [1] : vector<16x32xf32> to vector<16xf32>
    %129 = vector.shape_cast %128 : vector<16xf32> to vector<16x1xf32>
    %cst_43 = arith.constant 3.200000e+01 : f32
    %130 = vector.broadcast %cst_43 : f32 to vector<16x1xf32>
    %131 = arith.divf %129, %130 : vector<16x1xf32>
    %132 = vector.broadcast %131 : vector<16x1xf32> to vector<16x32xf32>
    %133 = arith.subf %125, %132 : vector<16x32xf32>
    %134 = arith.mulf %133, %133 : vector<16x32xf32>
    %cst_44 = arith.constant dense<0.000000e+00> : vector<16xf32>
    %135 = vector.multi_reduction <add>, %134, %cst_44 [1] : vector<16x32xf32> to vector<16xf32>
    %136 = vector.shape_cast %135 : vector<16xf32> to vector<16x1xf32>
    %cst_45 = arith.constant 3.200000e+01 : f32
    %137 = vector.broadcast %cst_45 : f32 to vector<16x1xf32>
    %138 = arith.divf %136, %137 : vector<16x1xf32>
    %139 = vector.broadcast %131 : vector<16x1xf32> to vector<16x32xf32>
    %140 = arith.subf %125, %139 : vector<16x32xf32>
    %cst_46 = arith.constant 9.99999974E-6 : f32
    %141 = vector.broadcast %cst_46 : f32 to vector<16x1xf32>
    %142 = arith.addf %138, %141 : vector<16x1xf32>
    %143 = math.rsqrt %142 : vector<16x1xf32>
    %144 = vector.broadcast %143 : vector<16x1xf32> to vector<16x32xf32>
    %145 = arith.mulf %140, %144 : vector<16x32xf32>
    %146 = vector.broadcast %126 : vector<1x32xf32> to vector<16x32xf32>
    %147 = arith.mulf %145, %146 : vector<16x32xf32>
    %148 = vector.broadcast %127 : vector<1x32xf32> to vector<16x32xf32>
    %149 = arith.addf %147, %148 : vector<16x32xf32>
    %c0_47 = arith.constant 0 : index
    %c0_48 = arith.constant 0 : index
    %150 = vector.load %arg14[%c0_47, %c0_48] : memref<32x256xf32, #tpu.memory_space<vmem>>, vector<32x256xf32>
    %151 = arith.truncf %149 : vector<16x32xf32> to vector<16x32xbf16>
    %152 = arith.truncf %150 : vector<32x256xf32> to vector<32x256xbf16>
    %cst_49 = arith.constant dense<0.000000e+00> : vector<16x256xf32>
    %153 = tpu.matmul %151, %152, %cst_49 {dimension_numbers = #tpu.dot_dimension_numbers<[1], [0], [0], [1], [0, 0, 1, 1], [], []>} : vector<16x32xbf16>, vector<32x256xbf16>, vector<16x256xf32> -> vector<16x256xf32>
    %c0_50 = arith.constant 0 : index
    %c0_51 = arith.constant 0 : index
    %154 = vector.load %arg15[%c0_50, %c0_51] : memref<1x256xf32, #tpu.memory_space<vmem>>, vector<1x256xf32>
    %155 = vector.broadcast %154 : vector<1x256xf32> to vector<16x256xf32>
    %156 = arith.addf %153, %155 : vector<16x256xf32>
    %cst_52 = arith.constant 0.000000e+00 : f32
    %157 = vector.broadcast %cst_52 : f32 to vector<16x256xf32>
    %158 = arith.maximumf %156, %157 : vector<16x256xf32>
    %c0_53 = arith.constant 0 : index
    %c0_54 = arith.constant 0 : index
    %159 = vector.load %arg16[%c0_53, %c0_54] : memref<1x256xf32, #tpu.memory_space<vmem>>, vector<1x256xf32>
    %160 = vector.broadcast %159 : vector<1x256xf32> to vector<16x256xf32>
    %161 = arith.mulf %158, %160 : vector<16x256xf32>
    %cst_55 = arith.constant dense<0.000000e+00> : vector<16xf32>
    %162 = vector.multi_reduction <add>, %161, %cst_55 [1] : vector<16x256xf32> to vector<16xf32>
    %163 = vector.shape_cast %162 : vector<16xf32> to vector<16x1xf32>
    %c0_56 = arith.constant 0 : index
    %c0_57 = arith.constant 0 : index
    %164 = vector.load %arg17[%c0_56, %c0_57] : memref<1x1xf32, #tpu.memory_space<vmem>>, vector<1x1xf32>
    %165 = vector.broadcast %164 : vector<1x1xf32> to vector<16x1xf32>
    %166 = arith.addf %163, %165 : vector<16x1xf32>
    %167 = arith.negf %166 : vector<16x1xf32>
    %168 = math.exp %167 : vector<16x1xf32>
    %cst_58 = arith.constant 1.000000e+00 : f32
    %169 = vector.broadcast %cst_58 : f32 to vector<16x1xf32>
    %170 = arith.addf %169, %168 : vector<16x1xf32>
    %171 = arith.divf %169, %170 : vector<16x1xf32>
    %172 = vector.broadcast %171 : vector<16x1xf32> to vector<16x32xf32>
    %173 = arith.mulf %149, %172 : vector<16x32xf32>
    %c0_59 = arith.constant 0 : index
    %c0_60 = arith.constant 0 : index
    %174 = vector.load %arg18[%c0_59, %c0_60] : memref<16x32xf32, #tpu.memory_space<vmem>>, vector<16x32xf32>
    tpu.vector_store %arg18[%c0_59, %c0_60], %173 {strides = array<i32>} : memref<16x32xf32, #tpu.memory_space<vmem>>, vector<16x32xf32>,
    return
  }
  func.func @transform_0(%arg0: i32) -> (i32, i32) {
    %c0_i32 = arith.constant 0 : i32
    %c0_i32_0 = arith.constant 0 : i32
    return %arg0, %c0_i32 : i32, i32
  }
  func.func @transform_1(%arg0: i32) -> (i32, i32, i32) {
    %c0_i32 = arith.constant 0 : i32
    %c0_i32_0 = arith.constant 0 : i32
    %c0_i32_1 = arith.constant 0 : i32
    %c0_i32_2 = arith.constant 0 : i32
    return %c0_i32, %c0_i32_0, %c0_i32_1 : i32, i32, i32
  }
  func.func @transform_2(%arg0: i32) -> (i32, i32) {
    %c0_i32 = arith.constant 0 : i32
    %c0_i32_0 = arith.constant 0 : i32
    %c0_i32_1 = arith.constant 0 : i32
    return %c0_i32, %c0_i32_0 : i32, i32
  }
  func.func @transform_3(%arg0: i32) -> (i32, i32) {
    %c0_i32 = arith.constant 0 : i32
    %c0_i32_0 = arith.constant 0 : i32
    %c0_i32_1 = arith.constant 0 : i32
    return %c0_i32, %c0_i32_0 : i32, i32
  }
  func.func @transform_4(%arg0: i32) -> (i32, i32) {
    %c0_i32 = arith.constant 0 : i32
    %c0_i32_0 = arith.constant 0 : i32
    %c0_i32_1 = arith.constant 0 : i32
    return %c0_i32, %c0_i32_0 : i32, i32
  }
  func.func @transform_5(%arg0: i32) -> (i32, i32) {
    %c0_i32 = arith.constant 0 : i32
    %c0_i32_0 = arith.constant 0 : i32
    %c0_i32_1 = arith.constant 0 : i32
    return %c0_i32, %c0_i32_0 : i32, i32
  }
  func.func @transform_6(%arg0: i32) -> (i32, i32) {
    %c0_i32 = arith.constant 0 : i32
    %c0_i32_0 = arith.constant 0 : i32
    %c0_i32_1 = arith.constant 0 : i32
    return %c0_i32, %c0_i32_0 : i32, i32
  }
  func.func @transform_7(%arg0: i32) -> (i32, i32) {
    %c0_i32 = arith.constant 0 : i32
    %c0_i32_0 = arith.constant 0 : i32
    %c0_i32_1 = arith.constant 0 : i32
    return %c0_i32, %c0_i32_0 : i32, i32
  }
  func.func @transform_8(%arg0: i32) -> (i32, i32) {
    %c0_i32 = arith.constant 0 : i32
    %c0_i32_0 = arith.constant 0 : i32
    %c0_i32_1 = arith.constant 0 : i32
    return %c0_i32, %c0_i32_0 : i32, i32
  }
  func.func @transform_9(%arg0: i32) -> (i32, i32) {
    %c0_i32 = arith.constant 0 : i32
    %c0_i32_0 = arith.constant 0 : i32
    %c0_i32_1 = arith.constant 0 : i32
    return %c0_i32, %c0_i32_0 : i32, i32
  }
  func.func @transform_10(%arg0: i32) -> (i32, i32) {
    %c0_i32 = arith.constant 0 : i32
    %c0_i32_0 = arith.constant 0 : i32
    %c0_i32_1 = arith.constant 0 : i32
    return %c0_i32, %c0_i32_0 : i32, i32
  }
  func.func @transform_11(%arg0: i32) -> (i32, i32) {
    %c0_i32 = arith.constant 0 : i32
    %c0_i32_0 = arith.constant 0 : i32
    %c0_i32_1 = arith.constant 0 : i32
    return %c0_i32, %c0_i32_0 : i32, i32
  }
  func.func @transform_12(%arg0: i32) -> (i32, i32) {
    %c0_i32 = arith.constant 0 : i32
    %c0_i32_0 = arith.constant 0 : i32
    %c0_i32_1 = arith.constant 0 : i32
    return %c0_i32, %c0_i32_0 : i32, i32
  }
  func.func @transform_13(%arg0: i32) -> (i32, i32) {
    %c0_i32 = arith.constant 0 : i32
    %c0_i32_0 = arith.constant 0 : i32
    %c0_i32_1 = arith.constant 0 : i32
    return %c0_i32, %c0_i32_0 : i32, i32
  }
  func.func @transform_14(%arg0: i32) -> (i32, i32) {
    %c0_i32 = arith.constant 0 : i32
    %c0_i32_0 = arith.constant 0 : i32
    %c0_i32_1 = arith.constant 0 : i32
    return %c0_i32, %c0_i32_0 : i32, i32
  }
  func.func @transform_15(%arg0: i32) -> (i32, i32) {
    %c0_i32 = arith.constant 0 : i32
    %c0_i32_0 = arith.constant 0 : i32
    %c0_i32_1 = arith.constant 0 : i32
    return %c0_i32, %c0_i32_0 : i32, i32
  }
  func.func @transform_16(%arg0: i32) -> (i32, i32) {
    %c0_i32 = arith.constant 0 : i32
    %c0_i32_0 = arith.constant 0 : i32
    %c0_i32_1 = arith.constant 0 : i32
    return %c0_i32, %c0_i32_0 : i32, i32
  }
  func.func @transform_17(%arg0: i32) -> (i32, i32) {
    %c0_i32 = arith.constant 0 : i32
    %c0_i32_0 = arith.constant 0 : i32
    return %arg0, %c0_i32 : i32, i32
  }
}

module attributes {stable_mosaic.version = 11 : i64} {
  func.func @_encoder_layer_kernel(%arg0: i32, %arg1: memref<16x32xf32, #tpu.memory_space<vmem>>, %arg2: memref<3x32x32xf32, #tpu.memory_space<vmem>>, %arg3: memref<3x32xf32, #tpu.memory_space<vmem>>, %arg4: memref<32x32xf32, #tpu.memory_space<vmem>>, %arg5: memref<1x32xf32, #tpu.memory_space<vmem>>, %arg6: memref<1x32xf32, #tpu.memory_space<vmem>>, %arg7: memref<1x32xf32, #tpu.memory_space<vmem>>, %arg8: memref<32x64xf32, #tpu.memory_space<vmem>>, %arg9: memref<1x64xf32, #tpu.memory_space<vmem>>, %arg10: memref<64x32xf32, #tpu.memory_space<vmem>>, %arg11: memref<1x32xf32, #tpu.memory_space<vmem>>, %arg12: memref<1x32xf32, #tpu.memory_space<vmem>>, %arg13: memref<1x32xf32, #tpu.memory_space<vmem>>, %arg14: memref<16x32xf32, #tpu.memory_space<vmem>>) attributes {dimension_semantics = [#tpu.dimension_semantics<parallel>], iteration_bounds = array<i64: 2>, scalar_prefetch = 0 : i64, scratch_operands = 0 : i64, tpu.core_type = #tpu.core_type<tc>, window_params = [{transform_indices = @transform_0, window_bounds = array<i64: 16, 32>}, {pipeline_mode = #tpu.pipeline_mode<synchronous>, transform_indices = @transform_1, window_bounds = array<i64: 3, 32, 32>}, {pipeline_mode = #tpu.pipeline_mode<synchronous>, transform_indices = @transform_2, window_bounds = array<i64: 3, 32>}, {pipeline_mode = #tpu.pipeline_mode<synchronous>, transform_indices = @transform_3, window_bounds = array<i64: 32, 32>}, {pipeline_mode = #tpu.pipeline_mode<synchronous>, transform_indices = @transform_4, window_bounds = array<i64: 1, 32>}, {pipeline_mode = #tpu.pipeline_mode<synchronous>, transform_indices = @transform_5, window_bounds = array<i64: 1, 32>}, {pipeline_mode = #tpu.pipeline_mode<synchronous>, transform_indices = @transform_6, window_bounds = array<i64: 1, 32>}, {pipeline_mode = #tpu.pipeline_mode<synchronous>, transform_indices = @transform_7, window_bounds = array<i64: 32, 64>}, {pipeline_mode = #tpu.pipeline_mode<synchronous>, transform_indices = @transform_8, window_bounds = array<i64: 1, 64>}, {pipeline_mode = #tpu.pipeline_mode<synchronous>, transform_indices = @transform_9, window_bounds = array<i64: 64, 32>}, {pipeline_mode = #tpu.pipeline_mode<synchronous>, transform_indices = @transform_10, window_bounds = array<i64: 1, 32>}, {pipeline_mode = #tpu.pipeline_mode<synchronous>, transform_indices = @transform_11, window_bounds = array<i64: 1, 32>}, {pipeline_mode = #tpu.pipeline_mode<synchronous>, transform_indices = @transform_12, window_bounds = array<i64: 1, 32>}, {transform_indices = @transform_13, window_bounds = array<i64: 16, 32>}]} {
    %c0 = arith.constant 0 : index
    %c0_0 = arith.constant 0 : index
    %0 = vector.load %arg1[%c0, %c0_0] : memref<16x32xf32, #tpu.memory_space<vmem>>, vector<16x32xf32>
    %c0_1 = arith.constant 0 : index
    %c0_2 = arith.constant 0 : index
    %c0_3 = arith.constant 0 : index
    %1 = vector.load %arg2[%c0_1, %c0_2, %c0_3] : memref<3x32x32xf32, #tpu.memory_space<vmem>>, vector<3x32x32xf32>
    %c0_4 = arith.constant 0 : index
    %c0_5 = arith.constant 0 : index
    %2 = vector.load %arg3[%c0_4, %c0_5] : memref<3x32xf32, #tpu.memory_space<vmem>>, vector<3x32xf32>
    %3 = vector.extract_strided_slice %1 {offsets = [0, 0, 0], sizes = [1, 32, 32], strides = [1, 1, 1]} : vector<3x32x32xf32> to vector<1x32x32xf32>
    %4 = vector.shape_cast %3 : vector<1x32x32xf32> to vector<32x32xf32>
    %5 = arith.truncf %0 : vector<16x32xf32> to vector<16x32xbf16>
    %6 = arith.truncf %4 : vector<32x32xf32> to vector<32x32xbf16>
    %cst = arith.constant dense<0.000000e+00> : vector<16x32xf32>
    %7 = tpu.matmul %5, %6, %cst {dimension_numbers = #tpu.dot_dimension_numbers<[1], [0], [0], [1], [0, 0, 1, 1], [], []>} : vector<16x32xbf16>, vector<32x32xbf16>, vector<16x32xf32> -> vector<16x32xf32>
    %8 = vector.extract_strided_slice %2 {offsets = [0, 0], sizes = [1, 32], strides = [1, 1]} : vector<3x32xf32> to vector<1x32xf32>
    %9 = vector.broadcast %8 : vector<1x32xf32> to vector<16x32xf32>
    %10 = arith.addf %7, %9 : vector<16x32xf32>
    %11 = vector.extract_strided_slice %1 {offsets = [1, 0, 0], sizes = [1, 32, 32], strides = [1, 1, 1]} : vector<3x32x32xf32> to vector<1x32x32xf32>
    %12 = vector.shape_cast %11 : vector<1x32x32xf32> to vector<32x32xf32>
    %13 = arith.truncf %0 : vector<16x32xf32> to vector<16x32xbf16>
    %14 = arith.truncf %12 : vector<32x32xf32> to vector<32x32xbf16>
    %cst_6 = arith.constant dense<0.000000e+00> : vector<16x32xf32>
    %15 = tpu.matmul %13, %14, %cst_6 {dimension_numbers = #tpu.dot_dimension_numbers<[1], [0], [0], [1], [0, 0, 1, 1], [], []>} : vector<16x32xbf16>, vector<32x32xbf16>, vector<16x32xf32> -> vector<16x32xf32>
    %16 = vector.extract_strided_slice %2 {offsets = [1, 0], sizes = [1, 32], strides = [1, 1]} : vector<3x32xf32> to vector<1x32xf32>
    %17 = vector.broadcast %16 : vector<1x32xf32> to vector<16x32xf32>
    %18 = arith.addf %15, %17 : vector<16x32xf32>
    %19 = vector.extract_strided_slice %1 {offsets = [2, 0, 0], sizes = [1, 32, 32], strides = [1, 1, 1]} : vector<3x32x32xf32> to vector<1x32x32xf32>
    %20 = vector.shape_cast %19 : vector<1x32x32xf32> to vector<32x32xf32>
    %21 = arith.truncf %0 : vector<16x32xf32> to vector<16x32xbf16>
    %22 = arith.truncf %20 : vector<32x32xf32> to vector<32x32xbf16>
    %cst_7 = arith.constant dense<0.000000e+00> : vector<16x32xf32>
    %23 = tpu.matmul %21, %22, %cst_7 {dimension_numbers = #tpu.dot_dimension_numbers<[1], [0], [0], [1], [0, 0, 1, 1], [], []>} : vector<16x32xbf16>, vector<32x32xbf16>, vector<16x32xf32> -> vector<16x32xf32>
    %24 = vector.extract_strided_slice %2 {offsets = [2, 0], sizes = [1, 32], strides = [1, 1]} : vector<3x32xf32> to vector<1x32xf32>
    %25 = vector.broadcast %24 : vector<1x32xf32> to vector<16x32xf32>
    %26 = arith.addf %23, %25 : vector<16x32xf32>
    %27 = vector.extract_strided_slice %10 {offsets = [0, 0], sizes = [16, 8], strides = [1, 1]} : vector<16x32xf32> to vector<16x8xf32>
    %28 = vector.shape_cast %27 : vector<16x8xf32> to vector<4x4x8xf32>
    %29 = vector.extract_strided_slice %10 {offsets = [0, 8], sizes = [16, 8], strides = [1, 1]} : vector<16x32xf32> to vector<16x8xf32>
    %30 = vector.shape_cast %29 : vector<16x8xf32> to vector<4x4x8xf32>
    %31 = vector.extract_strided_slice %10 {offsets = [0, 16], sizes = [16, 8], strides = [1, 1]} : vector<16x32xf32> to vector<16x8xf32>
    %32 = vector.shape_cast %31 : vector<16x8xf32> to vector<4x4x8xf32>
    %33 = vector.extract_strided_slice %10 {offsets = [0, 24], sizes = [16, 8], strides = [1, 1]} : vector<16x32xf32> to vector<16x8xf32>
    %34 = vector.shape_cast %33 : vector<16x8xf32> to vector<4x4x8xf32>
    %35 = tpu.concatenate %28, %30, %32, %34 in 0 : vector<4x4x8xf32>, vector<4x4x8xf32>, vector<4x4x8xf32>, vector<4x4x8xf32> -> vector<16x4x8xf32>
    %36 = vector.extract_strided_slice %18 {offsets = [0, 0], sizes = [16, 8], strides = [1, 1]} : vector<16x32xf32> to vector<16x8xf32>
    %37 = vector.shape_cast %36 : vector<16x8xf32> to vector<4x4x8xf32>
    %38 = vector.extract_strided_slice %18 {offsets = [0, 8], sizes = [16, 8], strides = [1, 1]} : vector<16x32xf32> to vector<16x8xf32>
    %39 = vector.shape_cast %38 : vector<16x8xf32> to vector<4x4x8xf32>
    %40 = vector.extract_strided_slice %18 {offsets = [0, 16], sizes = [16, 8], strides = [1, 1]} : vector<16x32xf32> to vector<16x8xf32>
    %41 = vector.shape_cast %40 : vector<16x8xf32> to vector<4x4x8xf32>
    %42 = vector.extract_strided_slice %18 {offsets = [0, 24], sizes = [16, 8], strides = [1, 1]} : vector<16x32xf32> to vector<16x8xf32>
    %43 = vector.shape_cast %42 : vector<16x8xf32> to vector<4x4x8xf32>
    %44 = tpu.concatenate %37, %39, %41, %43 in 0 : vector<4x4x8xf32>, vector<4x4x8xf32>, vector<4x4x8xf32>, vector<4x4x8xf32> -> vector<16x4x8xf32>
    %45 = vector.extract_strided_slice %26 {offsets = [0, 0], sizes = [16, 8], strides = [1, 1]} : vector<16x32xf32> to vector<16x8xf32>
    %46 = vector.shape_cast %45 : vector<16x8xf32> to vector<4x4x8xf32>
    %47 = vector.extract_strided_slice %26 {offsets = [0, 8], sizes = [16, 8], strides = [1, 1]} : vector<16x32xf32> to vector<16x8xf32>
    %48 = vector.shape_cast %47 : vector<16x8xf32> to vector<4x4x8xf32>
    %49 = vector.extract_strided_slice %26 {offsets = [0, 16], sizes = [16, 8], strides = [1, 1]} : vector<16x32xf32> to vector<16x8xf32>
    %50 = vector.shape_cast %49 : vector<16x8xf32> to vector<4x4x8xf32>
    %51 = vector.extract_strided_slice %26 {offsets = [0, 24], sizes = [16, 8], strides = [1, 1]} : vector<16x32xf32> to vector<16x8xf32>
    %52 = vector.shape_cast %51 : vector<16x8xf32> to vector<4x4x8xf32>
    %53 = tpu.concatenate %46, %48, %50, %52 in 0 : vector<4x4x8xf32>, vector<4x4x8xf32>, vector<4x4x8xf32>, vector<4x4x8xf32> -> vector<16x4x8xf32>
    "tpu.trace_start"() <{level = 10 : i32, message = "nqd,nkd->nqk"}> : () -> ()
    %cst_8 = arith.constant dense<0.000000e+00> : vector<16x4x4xf32>
    %54 = tpu.matmul %35, %44, %cst_8 {dimension_numbers = #tpu.dot_dimension_numbers<[2], [2], [1], [1], [0, 0, 0, 1, 1, 1], [0], [0]>} : vector<16x4x8xf32>, vector<16x4x8xf32>, vector<16x4x4xf32> -> vector<16x4x4xf32>
    "tpu.trace_stop"() : () -> ()
    %cst_9 = arith.constant 0.353553385 : f32
    %55 = vector.broadcast %cst_9 : f32 to vector<16x4x4xf32>
    %56 = arith.mulf %54, %55 : vector<16x4x4xf32>
    %cst_10 = arith.constant dense<0xFF800000> : vector<16x4xf32>
    %57 = vector.multi_reduction <maximumf>, %56, %cst_10 [2] : vector<16x4x4xf32> to vector<16x4xf32>
    %58 = vector.shape_cast %57 : vector<16x4xf32> to vector<16x4x1xf32>
    %59 = vector.broadcast %58 : vector<16x4x1xf32> to vector<16x4x4xf32>
    %60 = arith.subf %56, %59 : vector<16x4x4xf32>
    %61 = math.exp %60 : vector<16x4x4xf32>
    %cst_11 = arith.constant dense<0.000000e+00> : vector<16x4xf32>
    %62 = vector.multi_reduction <add>, %61, %cst_11 [2] : vector<16x4x4xf32> to vector<16x4xf32>
    %63 = vector.shape_cast %62 : vector<16x4xf32> to vector<16x4x1xf32>
    %64 = tpu.reciprocal %63 {approx = true} : vector<16x4x1xf32> -> vector<16x4x1xf32>
    %65 = vector.broadcast %64 : vector<16x4x1xf32> to vector<16x4x4xf32>
    %66 = arith.mulf %61, %65 : vector<16x4x4xf32>
    "tpu.trace_start"() <{level = 10 : i32, message = "nqk,nkd->nqd"}> : () -> ()
    %cst_12 = arith.constant dense<0.000000e+00> : vector<16x4x8xf32>
    %67 = tpu.matmul %66, %53, %cst_12 {dimension_numbers = #tpu.dot_dimension_numbers<[2], [1], [1], [2], [0, 0, 0, 1, 1, 2], [0], [0]>} : vector<16x4x4xf32>, vector<16x4x8xf32>, vector<16x4x8xf32> -> vector<16x4x8xf32>
    "tpu.trace_stop"() : () -> ()
    %68 = vector.extract_strided_slice %67 {offsets = [0, 0, 0], sizes = [4, 4, 8], strides = [1, 1, 1]} : vector<16x4x8xf32> to vector<4x4x8xf32>
    %69 = vector.shape_cast %68 : vector<4x4x8xf32> to vector<16x8xf32>
    %70 = vector.extract_strided_slice %67 {offsets = [4, 0, 0], sizes = [4, 4, 8], strides = [1, 1, 1]} : vector<16x4x8xf32> to vector<4x4x8xf32>
    %71 = vector.shape_cast %70 : vector<4x4x8xf32> to vector<16x8xf32>
    %72 = vector.extract_strided_slice %67 {offsets = [8, 0, 0], sizes = [4, 4, 8], strides = [1, 1, 1]} : vector<16x4x8xf32> to vector<4x4x8xf32>
    %73 = vector.shape_cast %72 : vector<4x4x8xf32> to vector<16x8xf32>
    %74 = vector.extract_strided_slice %67 {offsets = [12, 0, 0], sizes = [4, 4, 8], strides = [1, 1, 1]} : vector<16x4x8xf32> to vector<4x4x8xf32>
    %75 = vector.shape_cast %74 : vector<4x4x8xf32> to vector<16x8xf32>
    %76 = tpu.concatenate %69, %71, %73, %75 in 1 : vector<16x8xf32>, vector<16x8xf32>, vector<16x8xf32>, vector<16x8xf32> -> vector<16x32xf32>
    %c0_13 = arith.constant 0 : index
    %c0_14 = arith.constant 0 : index
    %77 = vector.load %arg4[%c0_13, %c0_14] : memref<32x32xf32, #tpu.memory_space<vmem>>, vector<32x32xf32>
    %78 = arith.truncf %76 : vector<16x32xf32> to vector<16x32xbf16>
    %79 = arith.truncf %77 : vector<32x32xf32> to vector<32x32xbf16>
    %cst_15 = arith.constant dense<0.000000e+00> : vector<16x32xf32>
    %80 = tpu.matmul %78, %79, %cst_15 {dimension_numbers = #tpu.dot_dimension_numbers<[1], [0], [0], [1], [0, 0, 1, 1], [], []>} : vector<16x32xbf16>, vector<32x32xbf16>, vector<16x32xf32> -> vector<16x32xf32>
    %c0_16 = arith.constant 0 : index
    %c0_17 = arith.constant 0 : index
    %81 = vector.load %arg5[%c0_16, %c0_17] : memref<1x32xf32, #tpu.memory_space<vmem>>, vector<1x32xf32>
    %82 = vector.broadcast %81 : vector<1x32xf32> to vector<16x32xf32>
    %83 = arith.addf %80, %82 : vector<16x32xf32>
    %84 = arith.addf %0, %83 : vector<16x32xf32>
    %c0_18 = arith.constant 0 : index
    %c0_19 = arith.constant 0 : index
    %85 = vector.load %arg6[%c0_18, %c0_19] : memref<1x32xf32, #tpu.memory_space<vmem>>, vector<1x32xf32>
    %c0_20 = arith.constant 0 : index
    %c0_21 = arith.constant 0 : index
    %86 = vector.load %arg7[%c0_20, %c0_21] : memref<1x32xf32, #tpu.memory_space<vmem>>, vector<1x32xf32>
    %cst_22 = arith.constant dense<0.000000e+00> : vector<16xf32>
    %87 = vector.multi_reduction <add>, %84, %cst_22 [1] : vector<16x32xf32> to vector<16xf32>
    %88 = vector.shape_cast %87 : vector<16xf32> to vector<16x1xf32>
    %cst_23 = arith.constant 3.200000e+01 : f32
    %89 = vector.broadcast %cst_23 : f32 to vector<16x1xf32>
    %90 = arith.divf %88, %89 : vector<16x1xf32>
    %91 = vector.broadcast %90 : vector<16x1xf32> to vector<16x32xf32>
    %92 = arith.subf %84, %91 : vector<16x32xf32>
    %93 = arith.mulf %92, %92 : vector<16x32xf32>
    %cst_24 = arith.constant dense<0.000000e+00> : vector<16xf32>
    %94 = vector.multi_reduction <add>, %93, %cst_24 [1] : vector<16x32xf32> to vector<16xf32>
    %95 = vector.shape_cast %94 : vector<16xf32> to vector<16x1xf32>
    %cst_25 = arith.constant 3.200000e+01 : f32
    %96 = vector.broadcast %cst_25 : f32 to vector<16x1xf32>
    %97 = arith.divf %95, %96 : vector<16x1xf32>
    %98 = vector.broadcast %90 : vector<16x1xf32> to vector<16x32xf32>
    %99 = arith.subf %84, %98 : vector<16x32xf32>
    %cst_26 = arith.constant 9.99999974E-6 : f32
    %100 = vector.broadcast %cst_26 : f32 to vector<16x1xf32>
    %101 = arith.addf %97, %100 : vector<16x1xf32>
    %102 = math.rsqrt %101 : vector<16x1xf32>
    %103 = vector.broadcast %102 : vector<16x1xf32> to vector<16x32xf32>
    %104 = arith.mulf %99, %103 : vector<16x32xf32>
    %105 = vector.broadcast %85 : vector<1x32xf32> to vector<16x32xf32>
    %106 = arith.mulf %104, %105 : vector<16x32xf32>
    %107 = vector.broadcast %86 : vector<1x32xf32> to vector<16x32xf32>
    %108 = arith.addf %106, %107 : vector<16x32xf32>
    %c0_27 = arith.constant 0 : index
    %c0_28 = arith.constant 0 : index
    %109 = vector.load %arg8[%c0_27, %c0_28] : memref<32x64xf32, #tpu.memory_space<vmem>>, vector<32x64xf32>
    %110 = arith.truncf %108 : vector<16x32xf32> to vector<16x32xbf16>
    %111 = arith.truncf %109 : vector<32x64xf32> to vector<32x64xbf16>
    %cst_29 = arith.constant dense<0.000000e+00> : vector<16x64xf32>
    %112 = tpu.matmul %110, %111, %cst_29 {dimension_numbers = #tpu.dot_dimension_numbers<[1], [0], [0], [1], [0, 0, 1, 1], [], []>} : vector<16x32xbf16>, vector<32x64xbf16>, vector<16x64xf32> -> vector<16x64xf32>
    %c0_30 = arith.constant 0 : index
    %c0_31 = arith.constant 0 : index
    %113 = vector.load %arg9[%c0_30, %c0_31] : memref<1x64xf32, #tpu.memory_space<vmem>>, vector<1x64xf32>
    %114 = vector.broadcast %113 : vector<1x64xf32> to vector<16x64xf32>
    %115 = arith.addf %112, %114 : vector<16x64xf32>
    %cst_32 = arith.constant 0.000000e+00 : f32
    %116 = vector.broadcast %cst_32 : f32 to vector<16x64xf32>
    %117 = arith.maximumf %115, %116 : vector<16x64xf32>
    %c0_33 = arith.constant 0 : index
    %c0_34 = arith.constant 0 : index
    %118 = vector.load %arg10[%c0_33, %c0_34] : memref<64x32xf32, #tpu.memory_space<vmem>>, vector<64x32xf32>
    %119 = arith.truncf %117 : vector<16x64xf32> to vector<16x64xbf16>
    %120 = arith.truncf %118 : vector<64x32xf32> to vector<64x32xbf16>
    %cst_35 = arith.constant dense<0.000000e+00> : vector<16x32xf32>
    %121 = tpu.matmul %119, %120, %cst_35 {dimension_numbers = #tpu.dot_dimension_numbers<[1], [0], [0], [1], [0, 0, 1, 1], [], []>} : vector<16x64xbf16>, vector<64x32xbf16>, vector<16x32xf32> -> vector<16x32xf32>
    %c0_36 = arith.constant 0 : index
    %c0_37 = arith.constant 0 : index
    %122 = vector.load %arg11[%c0_36, %c0_37] : memref<1x32xf32, #tpu.memory_space<vmem>>, vector<1x32xf32>
    %123 = vector.broadcast %122 : vector<1x32xf32> to vector<16x32xf32>
    %124 = arith.addf %121, %123 : vector<16x32xf32>
    %125 = arith.addf %108, %124 : vector<16x32xf32>
    %c0_38 = arith.constant 0 : index
    %c0_39 = arith.constant 0 : index
    %126 = vector.load %arg12[%c0_38, %c0_39] : memref<1x32xf32, #tpu.memory_space<vmem>>, vector<1x32xf32>
    %c0_40 = arith.constant 0 : index
    %c0_41 = arith.constant 0 : index
    %127 = vector.load %arg13[%c0_40, %c0_41] : memref<1x32xf32, #tpu.memory_space<vmem>>, vector<1x32xf32>
    %cst_42 = arith.constant dense<0.000000e+00> : vector<16xf32>
    %128 = vector.multi_reduction <add>, %125, %cst_42 [1] : vector<16x32xf32> to vector<16xf32>
    %129 = vector.shape_cast %128 : vector<16xf32> to vector<16x1xf32>
    %cst_43 = arith.constant 3.200000e+01 : f32
    %130 = vector.broadcast %cst_43 : f32 to vector<16x1xf32>
    %131 = arith.divf %129, %130 : vector<16x1xf32>
    %132 = vector.broadcast %131 : vector<16x1xf32> to vector<16x32xf32>
    %133 = arith.subf %125, %132 : vector<16x32xf32>
    %134 = arith.mulf %133, %133 : vector<16x32xf32>
    %cst_44 = arith.constant dense<0.000000e+00> : vector<16xf32>
    %135 = vector.multi_reduction <add>, %134, %cst_44 [1] : vector<16x32xf32> to vector<16xf32>
    %136 = vector.shape_cast %135 : vector<16xf32> to vector<16x1xf32>
    %cst_45 = arith.constant 3.200000e+01 : f32
    %137 = vector.broadcast %cst_45 : f32 to vector<16x1xf32>
    %138 = arith.divf %136, %137 : vector<16x1xf32>
    %139 = vector.broadcast %131 : vector<16x1xf32> to vector<16x32xf32>
    %140 = arith.subf %125, %139 : vector<16x32xf32>
    %cst_46 = arith.constant 9.99999974E-6 : f32
    %141 = vector.broadcast %cst_46 : f32 to vector<16x1xf32>
    %142 = arith.addf %138, %141 : vector<16x1xf32>
    %143 = math.rsqrt %142 : vector<16x1xf32>
    %144 = vector.broadcast %143 : vector<16x1xf32> to vector<16x32xf32>
    %145 = arith.mulf %140, %144 : vector<16x32xf32>
    %146 = vector.broadcast %126 : vector<1x32xf32> to vector<16x32xf32>
    %147 = arith.mulf %145, %146 : vector<16x32xf32>
    %148 = vector.broadcast %127 : vector<1x32xf32> to vector<16x32xf32>
    %149 = arith.addf %147, %148 : vector<16x32xf32>
    %c0_47 = arith.constant 0 : index
    %c0_48 = arith.constant 0 : index
    %150 = vector.load %arg14[%c0_47, %c0_48] : memref<16x32xf32, #tpu.memory_space<vmem>>, vector<16x32xf32>
    tpu.vector_store %arg14[%c0_47, %c0_48], %149 {strides = array<i32>} : memref<16x32xf32, #tpu.memory_space<vmem>>, vector<16x32xf32>,
    return
  }
  func.func @transform_0(%arg0: i32) -> (i32, i32) {
    %c0_i32 = arith.constant 0 : i32
    %c0_i32_0 = arith.constant 0 : i32
    return %arg0, %c0_i32 : i32, i32
  }
  func.func @transform_1(%arg0: i32) -> (i32, i32, i32) {
    %c0_i32 = arith.constant 0 : i32
    %c0_i32_0 = arith.constant 0 : i32
    %c0_i32_1 = arith.constant 0 : i32
    %c0_i32_2 = arith.constant 0 : i32
    return %c0_i32, %c0_i32_0, %c0_i32_1 : i32, i32, i32
  }
  func.func @transform_2(%arg0: i32) -> (i32, i32) {
    %c0_i32 = arith.constant 0 : i32
    %c0_i32_0 = arith.constant 0 : i32
    %c0_i32_1 = arith.constant 0 : i32
    return %c0_i32, %c0_i32_0 : i32, i32
  }
  func.func @transform_3(%arg0: i32) -> (i32, i32) {
    %c0_i32 = arith.constant 0 : i32
    %c0_i32_0 = arith.constant 0 : i32
    %c0_i32_1 = arith.constant 0 : i32
    return %c0_i32, %c0_i32_0 : i32, i32
  }
  func.func @transform_4(%arg0: i32) -> (i32, i32) {
    %c0_i32 = arith.constant 0 : i32
    %c0_i32_0 = arith.constant 0 : i32
    %c0_i32_1 = arith.constant 0 : i32
    return %c0_i32, %c0_i32_0 : i32, i32
  }
  func.func @transform_5(%arg0: i32) -> (i32, i32) {
    %c0_i32 = arith.constant 0 : i32
    %c0_i32_0 = arith.constant 0 : i32
    %c0_i32_1 = arith.constant 0 : i32
    return %c0_i32, %c0_i32_0 : i32, i32
  }
  func.func @transform_6(%arg0: i32) -> (i32, i32) {
    %c0_i32 = arith.constant 0 : i32
    %c0_i32_0 = arith.constant 0 : i32
    %c0_i32_1 = arith.constant 0 : i32
    return %c0_i32, %c0_i32_0 : i32, i32
  }
  func.func @transform_7(%arg0: i32) -> (i32, i32) {
    %c0_i32 = arith.constant 0 : i32
    %c0_i32_0 = arith.constant 0 : i32
    %c0_i32_1 = arith.constant 0 : i32
    return %c0_i32, %c0_i32_0 : i32, i32
  }
  func.func @transform_8(%arg0: i32) -> (i32, i32) {
    %c0_i32 = arith.constant 0 : i32
    %c0_i32_0 = arith.constant 0 : i32
    %c0_i32_1 = arith.constant 0 : i32
    return %c0_i32, %c0_i32_0 : i32, i32
  }
  func.func @transform_9(%arg0: i32) -> (i32, i32) {
    %c0_i32 = arith.constant 0 : i32
    %c0_i32_0 = arith.constant 0 : i32
    %c0_i32_1 = arith.constant 0 : i32
    return %c0_i32, %c0_i32_0 : i32, i32
  }
  func.func @transform_10(%arg0: i32) -> (i32, i32) {
    %c0_i32 = arith.constant 0 : i32
    %c0_i32_0 = arith.constant 0 : i32
    %c0_i32_1 = arith.constant 0 : i32
    return %c0_i32, %c0_i32_0 : i32, i32
  }
  func.func @transform_11(%arg0: i32) -> (i32, i32) {
    %c0_i32 = arith.constant 0 : i32
    %c0_i32_0 = arith.constant 0 : i32
    %c0_i32_1 = arith.constant 0 : i32
    return %c0_i32, %c0_i32_0 : i32, i32
  }
  func.func @transform_12(%arg0: i32) -> (i32, i32) {
    %c0_i32 = arith.constant 0 : i32
    %c0_i32_0 = arith.constant 0 : i32
    %c0_i32_1 = arith.constant 0 : i32
    return %c0_i32, %c0_i32_0 : i32, i32
  }
  func.func @transform_13(%arg0: i32) -> (i32, i32) {
    %c0_i32 = arith.constant 0 : i32
    %c0_i32_0 = arith.constant 0 : i32
    return %arg0, %c0_i32 : i32, i32
  }
}

</mosaic_0001>

<bundles_post_ra>
// kernel: temporal_transformer_forward.3
= control target key start
LH: loop header
LB: loop body
LE: loop exit
PB: predicated region body
PF: predicated region fallthrough
CT: control target
= control target key end

     0   :  { %s6714_s0 = inlined_call_operand.hbm [shape: f32[32,32], index: 0, kind: input, shape index: {}]   ;;  %s6715_s1 = inlined_call_operand.hbm [shape: f32[3,32,32], index: 1, kind: input, shape index: {}]   ;;  %s6716_s2 = inlined_call_operand.hbm [shape: f32[3,32], index: 2, kind: input, shape index: {}]   ;;  %s6717_s3 = inlined_call_operand.hbm [shape: f32[32,32], index: 3, kind: input, shape index: {}]   ;;  %s6718_s4 = inlined_call_operand.hbm [shape: f32[1,32], index: 4, kind: input, shape index: {}]   ;;  %s6719_s5 = inlined_call_operand.hbm [shape: f32[1,32], index: 5, kind: input, shape index: {}]   ;;  %s6720_s6 = inlined_call_operand.hbm [shape: f32[1,32], index: 6, kind: input, shape index: {}]   ;;  %s6721_s7 = inlined_call_operand.hbm [shape: f32[32,64], index: 7, kind: input, shape index: {}]   ;;  %s6722_s8 = inlined_call_operand.hbm [shape: f32[1,64], index: 8, kind: input, shape index: {}]   ;;  %s6723_s9 = inlined_call_operand.hbm [shape: f32[64,32], index: 9, kind: input, shape index: {}]   ;;  %s6724_s10 = inlined_call_operand.hbm [shape: f32[1,32], index: 10, kind: input, shape index: {}]   ;;  %s6725_s11 = inlined_call_operand.hbm [shape: f32[1,32], index: 11, kind: input, shape index: {}]   ;;  %s6726_s12 = inlined_call_operand.hbm [shape: f32[1,32], index: 12, kind: input, shape index: {}]   ;;  %s6727_s13 = inlined_call_operand.hbm [shape: f32[32,256], index: 13, kind: input, shape index: {}]   ;;  %s6728_s14 = inlined_call_operand.hbm [shape: f32[1,256], index: 14, kind: input, shape index: {}]   ;;  %s6729_s15 = inlined_call_operand.hbm [shape: f32[1,256], index: 15, kind: input, shape index: {}]   ;;  %s6730_s16 = inlined_call_operand.<no memory space> [shape: f32[1,1], index: 16, kind: input, shape index: {}]   ;;  %s6731_s17 = inlined_call_operand.hbm [shape: f32[32,32], index: 17, kind: output, shape index: {}]  }
   0x1   :  { %6749 = sst [smem:[#allocation46_spill]] %s6714_s0  ;;  %v22_v0 = vstv %s6730_s16 }
   0x2   :  { %6750 = sst [smem:[#allocation47_spill]] %s6715_s1  ;;  %23 = vst [vmem:[#allocation2] sm:$0x1] %v22_v0 }
   0x3   :  { %6751 = sst [smem:[#allocation48_spill]] %s6717_s3 }
   0x4   :  { %6752 = sst [smem:[#allocation49_spill]] %s6719_s5 }
   0x5   :  { %6753 = sst [smem:[#allocation50_spill]] %s6721_s7 }
   0x6   :  { %6754 = sst [smem:[#allocation51_spill]] %s6731_s17 }
   0x7   :  { %24 = vsyncpa [#allocation4], 0 }
   0x8   :  { %26 = vsyncpa [#allocation4 + $0x1], 0 }
   0x9   :  { %27 = vsyncpa [#allocation7], 0 }
   0xa   :  { %28 = vsyncpa [#allocation10], 0 }
   0xb   :  { %29 = vsyncpa [#allocation13], 0 }
   0xc   :  { %30 = vsyncpa [#allocation16], 0 }
   0xd   :  { %31 = vsyncpa [#allocation19], 0 }
   0xe   :  { %32 = vsyncpa [#allocation22], 0 }
   0xf   :  { %33 = vsyncpa [#allocation25], 0 }
  0x10   :  { %34 = vsyncpa [#allocation28], 0 }
  0x11   :  { %35 = vsyncpa [#allocation5], 0 }
  0x12   :  { %37 = vsyncpa [#allocation5 + $0x1], 0  ;;  %s5692_s26 = smov 0   ;;  %s5694_s27 = smov 0  }
  0x13   :  { %s5696_s28 = smov 0   ;;  %s5698_s16 = smov 0  }
  0x14 LB: > { %6755 = sst [smem:[#allocation40_spill]] %s5554_s26  ;;  %s5568_s29 = smov [#allocation6]   ;;  %s5566_s16 = sphi %s5698_s16, %s6043_s16   ;;  %s5562_s28 = sphi %s5696_s28, %s6055_s28   ;;  %s5558_s27 = sphi %s5694_s27, %s6808_s27   ;;  %s5554_s26 = sphi %s5692_s26, %s6807_s26  }
  0x15   : > { %6756 = sst [smem:[#allocation41_spill]] %s5558_s27  ;;  %s448_s0 = sshll.u32 %s5568_s29, 4  ;;  %s5718_s0 = int_to_ptr.vmem [resolvable:$true] %s448_s0 }
  0x16   : > { %6757 = sst [smem:[#allocation42_spill]] %s5562_s28  ;;  %s5713_s30 = sadd.s32 4294967295, %s5566_s16  }
  0x17   : > { %6758 = sst [smem:[#allocation43_spill]] %s5566_s16  ;;  %p4286_p0 = scmp.ge.s32.totalorder %s5566_s16, 1 }
  0x18   : > { %6759 = sst [smem:[#allocation44_spill]] %s5713_s30  ;;  %p6745_p1 = scmp.eq.s32.totalorder %s5713_s30, 0 }
  0x19   : > { %p436_p2 = scmp.lt.s32.totalorder %s5566_s16, 3  ;;  %s5569_s19 = smov [#allocation9]  }
  0x1a   : > { %s472_s1 = sshll.u32 %s5569_s19, 4  ;;  %s5570_s21 = smov [#allocation12]   ;;  %s5733_s1 = int_to_ptr.vmem [resolvable:$true] %s472_s1 }
  0x1b   : > { %p5720_p3 = pnand %p4286_p0, %p436_p2  ;;  %s497_s22 = sshll.u32 %s5570_s21, 4  ;;  %s5735_s22 = int_to_ptr.vmem [resolvable:$true] %s497_s22 }
  0x1c   : > { %s6763_s25 = sld [smem:[#allocation47_spill]] }
  0x1d   : > { %s6760_s18 = scalar_select %p5720_p3, 1, 0 }
  0x1e   : > { %p4772_p5 = pneg %p5720_p3 }
  0x1f   : > { %6761 = sst [smem:[#allocation45_spill]] %s6760_s18 }
  0x20   : > { %p5729_p6 = pnand %p4772_p5, %p6745_p1 }
  0x22   : > { %s5018_s29 = scalar_lea.hbm %s6763_s25, 1536  ;;  %p5745_p8 = pneg %p5729_p6 }
  0x23   : > { %p5019_p7 = scmp.ne.s32.totalorder %s6763_s25, %s5018_s29  ;;  %p5025_p11 = scmp.lt.u32.totalorder %s5018_s29, %s6763_s25 }
  0x25   : > { %p5021_p9 = pnand %p5745_p8, %p5019_p7 }
  0x27   : > { %p5022_p10 = pneg %p5021_p9 }
  0x29   : > { %p5027_p12 = pnand %p5025_p11, %p5022_p10 }
  0x2b   : > { %5030 = shalt.err (!%p5027_p12)
}
  0x2c   : > { %s5031_s17 = scalar_lea.vmem %s5718_s0, 1536  ;;  %p5039_p5 = scmp.lt.s32.totalorder %s5718_s0, %s5718_s0 }
  0x2d   : > { %p5032_p13 = scmp.ne.s32.totalorder %s5718_s0, %s5031_s17  ;;  %p5040_p4 = scmp.lt.s32.totalorder %s5031_s17, %s5031_s17 }
  0x2f   : > { %p5034_p0 = pnand %p5032_p13, %p5745_p8  ;;  %p5041_p7 = por %p5040_p4, %p5039_p5 }
  0x31   : > { %p5035_p2 = pneg %p5034_p0 }
  0x33   : > { %p5042_p9 = pnand %p5041_p7, %p5035_p2 }
  0x35   : > { %5045 = shalt.err (!%p5042_p9)
}
  0x36   : > { %s6743_s18 = smov 128   ;;  %s6747_s30 = smov 8  }
  0x37   : > { %4775 = dma.hbm_to_vmem [thread:$0]  (!%p5729_p6), %s6763_s25, 1536, %s5718_s0, [#allocation7], %s6743_s18, %s6743_s18, %s6747_s30  }
  0x38   : > { %s6765_s3 = sld [smem:[#allocation48_spill]] }
  0x3e   : > { %s5046_s17 = scalar_lea.hbm %s6765_s3, 512 }
  0x3f   : > { %p5047_p4 = scmp.ne.s32.totalorder %s6765_s3, %s5046_s17  ;;  %p5053_p12 = scmp.lt.u32.totalorder %s5046_s17, %s6765_s3 }
  0x41   : > { %p5049_p10 = pnand %p5047_p4, %p5745_p8 }
  0x43   : > { %p5050_p11 = pneg %p5049_p10 }
  0x45   : > { %p5055_p13 = pnand %p5053_p12, %p5050_p11 }
  0x47   : > { %5058 = shalt.err (!%p5055_p13)
}
  0x48   : > { %s5059_s0 = scalar_lea.vmem %s5733_s1, 512  ;;  %p5067_p7 = scmp.lt.s32.totalorder %s5733_s1, %s5733_s1 }
  0x49   : > { %p5060_p0 = scmp.ne.s32.totalorder %s5733_s1, %s5059_s0  ;;  %p5068_p9 = scmp.lt.s32.totalorder %s5059_s0, %s5059_s0 }
  0x4b   : > { %p5062_p2 = pnand %p5060_p0, %p5745_p8  ;;  %p5069_p4 = por %p5068_p9, %p5067_p7 }
  0x4d   : > { %p5063_p5 = pneg %p5062_p2 }
  0x4f   : > { %p5070_p10 = pnand %p5069_p4, %p5063_p5 }
  0x51   : > { %5073 = shalt.err (!%p5070_p10)
}
  0x52   : > { %4781 = dma.hbm_to_vmem [thread:$0]  (!%p5729_p6), %s6765_s3, 512, %s5733_s1, [#allocation10], %s6743_s18, %s6743_s18, %s6747_s30  }
  0x53   : > { %s6766_s5 = sld [smem:[#allocation49_spill]] }
  0x59   : > { %s5074_s23 = scalar_lea.hbm %s6766_s5, 16 }
  0x5a   : > { %p5075_p11 = scmp.ne.s32.totalorder %s6766_s5, %s5074_s23  ;;  %p5081_p0 = scmp.lt.u32.totalorder %s5074_s23, %s6766_s5 }
  0x5c   : > { %p5077_p12 = pnand %p5075_p11, %p5745_p8 }
  0x5e   : > { %p5078_p13 = pneg %p5077_p12 }
  0x60   : > { %p5083_p2 = pnand %p5081_p0, %p5078_p13 }
  0x62   : > { %5086 = shalt.err (!%p5083_p2)
}
  0x63   : > { %s5087_s1 = scalar_lea.vmem %s5735_s22, 16  ;;  %s5094_s0 = scalar_lea.vmem %s5735_s22, 32 }
  0x64   : > { %p5088_p5 = scmp.ne.s32.totalorder %s5735_s22, %s5087_s1  ;;  %p5095_p4 = scmp.lt.s32.totalorder %s5735_s22, %s5735_s22 }
  0x65   : > { %p5096_p10 = scmp.lt.s32.totalorder %s5094_s0, %s5087_s1 }
  0x66   : > { %p5090_p7 = pnand %p5088_p5, %p5745_p8 }
  0x67   : > { %p5097_p11 = por %p5096_p10, %p5095_p4 }
  0x68   : > { %p5091_p9 = pneg %p5090_p7 }
  0x6a   : > { %p5098_p12 = pnand %p5097_p11, %p5091_p9 }
  0x6c   : > { %5101 = shalt.err (!%p5098_p12)
}
  0x6d   : > { %4787 = dma.hbm_to_vmem [thread:$0]  (!%p5729_p6), %s6766_s5, 16, %s5735_s22, [#allocation13]  }
  0x6e   : > { %s5573_s28 = smov [#allocation15]   ;;  %s5574_s23 = smov [#allocation18]  }
  0x6f   : > { %s518_s16 = sshll.u32 %s5573_s28, 4  ;;  %s542_s24 = sshll.u32 %s5574_s23, 4  ;;  %s519_s16 = int_to_ptr.vmem [resolvable:$true] %s518_s16  ;;  %s543_s24 = int_to_ptr.vmem [resolvable:$true] %s542_s24 }
  0x70   : > { %s6767_s7 = sld [smem:[#allocation50_spill]] }
  0x76   : > { %s5102_s17 = scalar_lea.hbm %s6767_s7, 512 }
  0x77   : > { %p5103_p13 = scmp.ne.s32.totalorder %s6767_s7, %s5102_s17  ;;  %p5109_p5 = scmp.lt.u32.totalorder %s5102_s17, %s6767_s7 }
  0x79   : > { %p5105_p0 = pnand %p5103_p13, %p5745_p8 }
  0x7b   : > { %p5106_p2 = pneg %p5105_p0 }
  0x7d   : > { %p5111_p7 = pnand %p5109_p5, %p5106_p2 }
  0x7f   : > { %5114 = shalt.err (!%p5111_p7)
}
  0x80   : > { %s5115_s22 = scalar_lea.vmem %s519_s16, 512  ;;  %p5123_p11 = scmp.lt.s32.totalorder %s519_s16, %s519_s16 }
  0x81   : > { %p5116_p9 = scmp.ne.s32.totalorder %s519_s16, %s5115_s22  ;;  %p5124_p12 = scmp.lt.s32.totalorder %s5115_s22, %s5115_s22 }
  0x83   : > { %p5118_p4 = pnand %p5116_p9, %p5745_p8  ;;  %p5125_p1 = por %p5124_p12, %p5123_p11 }
  0x85   : > { %p5119_p10 = pneg %p5118_p4 }
  0x87   : > { %p5126_p3 = pnand %p5125_p1, %p5119_p10 }
  0x89   : > { %5129 = shalt.err (!%p5126_p3)
}
  0x8a   : > { %s6768_s27 = smov 128   ;;  %s5130_s21 = scalar_lea.hbm %s6723_s9, 1024 }
  0x8b   : > { %4793 = dma.hbm_to_vmem [thread:$0]  (!%p5729_p6), %s6767_s7, 512, %s519_s16, [#allocation16], %s6768_s27, %s6768_s27, %s6747_s30  }
  0x8c   : > { %p5131_p1 = scmp.ne.s32.totalorder %s6723_s9, %s5130_s21  ;;  %p5137_p0 = scmp.lt.u32.totalorder %s5130_s21, %s6723_s9 }
  0x8e   : > { %p5133_p3 = pnand %p5131_p1, %p5745_p8 }
  0x90   : > { %p5134_p13 = pneg %p5133_p3 }
  0x92   : > { %p5139_p2 = pnand %p5137_p0, %p5134_p13 }
  0x94   : > { %5142 = shalt.err (!%p5139_p2)
}
  0x95   : > { %s5143_s22 = scalar_lea.vmem %s543_s24, 1024  ;;  %p5151_p4 = scmp.lt.s32.totalorder %s543_s24, %s543_s24 }
  0x96   : > { %p5144_p5 = scmp.ne.s32.totalorder %s543_s24, %s5143_s22  ;;  %p5152_p10 = scmp.lt.s32.totalorder %s5143_s22, %s5143_s22 }
  0x98   : > { %p5146_p7 = pnand %p5144_p5, %p5745_p8  ;;  %p5153_p11 = por %p5152_p10, %p5151_p4 }
  0x9a   : > { %p5147_p9 = pneg %p5146_p7 }
  0x9c   : > { %p5154_p12 = pnand %p5153_p11, %p5147_p9 }
  0x9e   : > { %5157 = shalt.err (!%p5154_p12)
}
  0x9f   : > { %4799 = dma.hbm_to_vmem [thread:$0]  (!%p5729_p6), %s6723_s9, 1024, %s543_s24, [#allocation19], %s6768_s27, %s6768_s27, %s6747_s30  }
  0xa0   : > { %s5575_s28 = smov [#allocation21]   ;;  %s5576_s29 = smov [#allocation24]  }
  0xa1   : > { %s567_s23 = sshll.u32 %s5575_s28, 4  ;;  %s588_s21 = sshll.u32 %s5576_s29, 4  ;;  %s568_s23 = int_to_ptr.vmem [resolvable:$true] %s567_s23  ;;  %s589_s21 = int_to_ptr.vmem [resolvable:$true] %s588_s21 }
  0xa2   : > { %s5158_s0 = scalar_lea.hbm %s6725_s11, 16 }
  0xa3   : > { %p5159_p1 = scmp.ne.s32.totalorder %s6725_s11, %s5158_s0  ;;  %p5165_p0 = scmp.lt.u32.totalorder %s5158_s0, %s6725_s11 }
  0xa5   : > { %p5161_p3 = pnand %p5159_p1, %p5745_p8 }
  0xa7   : > { %p5162_p13 = pneg %p5161_p3 }
  0xa9   : > { %p5167_p2 = pnand %p5165_p0, %p5162_p13 }
  0xab   : > { %5170 = shalt.err (!%p5167_p2)
}
  0xac   : > { %s5171_s24 = scalar_lea.vmem %s568_s23, 16  ;;  %s5178_s18 = scalar_lea.vmem %s568_s23, 32 }
  0xad   : > { %p5172_p5 = scmp.ne.s32.totalorder %s568_s23, %s5171_s24  ;;  %p5179_p4 = scmp.lt.s32.totalorder %s568_s23, %s568_s23 }
  0xae   : > { %p5180_p10 = scmp.lt.s32.totalorder %s5178_s18, %s5171_s24 }
  0xaf   : > { %p5174_p7 = pnand %p5172_p5, %p5745_p8 }
  0xb0   : > { %p5181_p11 = por %p5180_p10, %p5179_p4 }
  0xb1   : > { %p5175_p9 = pneg %p5174_p7 }
  0xb3   : > { %p5182_p12 = pnand %p5181_p11, %p5175_p9 }
  0xb5   : > { %5185 = shalt.err (!%p5182_p12)
}
  0xb6   : > { %4805 = dma.hbm_to_vmem [thread:$0]  (!%p5729_p6), %s6725_s11, 16, %s568_s23, [#allocation22]  }
  0xb7   : > { %s5186_s1 = scalar_lea.hbm %s6727_s13, 1024 }
  0xb8   : > { %p5187_p1 = scmp.ne.s32.totalorder %s6727_s13, %s5186_s1  ;;  %p5193_p0 = scmp.lt.u32.totalorder %s5186_s1, %s6727_s13 }
  0xba   : > { %p5189_p3 = pnand %p5187_p1, %p5745_p8 }
  0xbc   : > { %p5190_p13 = pneg %p5189_p3 }
  0xbe   : > { %p5195_p2 = pnand %p5193_p0, %p5190_p13 }
  0xc0   : > { %5198 = shalt.err (!%p5195_p2)
}
  0xc1   : > { %s5199_s24 = scalar_lea.vmem %s589_s21, 1024  ;;  %p5207_p4 = scmp.lt.s32.totalorder %s589_s21, %s589_s21 }
  0xc2   : > { %p5200_p5 = scmp.ne.s32.totalorder %s589_s21, %s5199_s24  ;;  %p5208_p10 = scmp.lt.s32.totalorder %s5199_s24, %s5199_s24 }
  0xc4   : > { %p5202_p7 = pnand %p5200_p5, %p5745_p8  ;;  %p5209_p11 = por %p5208_p10, %p5207_p4 }
  0xc6   : > { %p5203_p9 = pneg %p5202_p7 }
  0xc8   : > { %p5210_p12 = pnand %p5209_p11, %p5203_p9 }
  0xca   : > { %5213 = shalt.err (!%p5210_p12)
}
  0xcb   : > { %s5577_s23 = smov 256   ;;  %s5578_s18 = smov 16  }
  0xcc   : > { %4811 = dma.hbm_to_vmem [thread:$0]  (!%p5729_p6), %s6727_s13, 1024, %s589_s21, [#allocation25], %s5577_s23, %s5577_s23, %s5578_s18  }
  0xcd   : > { %s5579_s3 = smov [#allocation8]   ;;  %s5580_s1 = smov [#allocation11]  }
  0xce   : > { %s462_s17 = sshll.u32 %s5579_s3, 4  ;;  %s486_s0 = sshll.u32 %s5580_s1, 4  ;;  %s463_s17 = int_to_ptr.vmem [resolvable:$true] %s462_s17  ;;  %s487_s0 = int_to_ptr.vmem [resolvable:$true] %s486_s0 }
  0xcf   : > { %s5214_s16 = scalar_lea.hbm %s6716_s2, 64 }
  0xd0   : > { %p5215_p1 = scmp.ne.s32.totalorder %s6716_s2, %s5214_s16  ;;  %p5221_p0 = scmp.lt.u32.totalorder %s5214_s16, %s6716_s2 }
  0xd2   : > { %p5217_p3 = pnand %p5215_p1, %p5745_p8 }
  0xd4   : > { %p5218_p13 = pneg %p5217_p3 }
  0xd6   : > { %p5223_p2 = pnand %p5221_p0, %p5218_p13 }
  0xd8   : > { %5226 = shalt.err (!%p5223_p2)
}
  0xd9   : > { %s5227_s21 = scalar_lea.vmem %s463_s17, 64  ;;  %p5235_p4 = scmp.lt.s32.totalorder %s463_s17, %s463_s17 }
  0xda   : > { %p5228_p5 = scmp.ne.s32.totalorder %s463_s17, %s5227_s21  ;;  %p5236_p10 = scmp.lt.s32.totalorder %s5227_s21, %s5227_s21 }
  0xdc   : > { %p5230_p7 = pnand %p5228_p5, %p5745_p8  ;;  %p5237_p11 = por %p5236_p10, %p5235_p4 }
  0xde   : > { %p5231_p9 = pneg %p5230_p7 }
  0xe0   : > { %p5238_p12 = pnand %p5237_p11, %p5231_p9 }
  0xe2   : > { %5241 = shalt.err (!%p5238_p12)
}
  0xe3   : > { %4778 = dma.hbm_to_vmem [thread:$0]  (!%p5729_p6), %s6716_s2, 64, %s463_s17, [#allocation7]  }
  0xe4   : > { %s5242_s18 = scalar_lea.hbm %s6718_s4, 16 }
  0xe5   : > { %p5243_p1 = scmp.ne.s32.totalorder %s6718_s4, %s5242_s18  ;;  %p5249_p0 = scmp.lt.u32.totalorder %s5242_s18, %s6718_s4 }
  0xe7   : > { %p5245_p3 = pnand %p5243_p1, %p5745_p8 }
  0xe9   : > { %p5246_p13 = pneg %p5245_p3 }
  0xeb   : > { %p5251_p2 = pnand %p5249_p0, %p5246_p13 }
  0xed   : > { %5254 = shalt.err (!%p5251_p2)
}
  0xee   : > { %s5255_s26 = scalar_lea.vmem %s487_s0, 16  ;;  %s5262_s17 = scalar_lea.vmem %s487_s0, 32 }
  0xef   : > { %p5256_p5 = scmp.ne.s32.totalorder %s487_s0, %s5255_s26  ;;  %p5263_p4 = scmp.lt.s32.totalorder %s487_s0, %s487_s0 }
  0xf0   : > { %p5264_p10 = scmp.lt.s32.totalorder %s5262_s17, %s5255_s26 }
  0xf1   : > { %p5258_p7 = pnand %p5256_p5, %p5745_p8 }
  0xf2   : > { %p5265_p11 = por %p5264_p10, %p5263_p4 }
  0xf3   : > { %p5259_p9 = pneg %p5258_p7 }
  0xf5   : > { %p5266_p12 = pnand %p5265_p11, %p5259_p9 }
  0xf7   : > { %5269 = shalt.err (!%p5266_p12)
}
  0xf8   : > { %4784 = dma.hbm_to_vmem [thread:$0]  (!%p5729_p6), %s6718_s4, 16, %s487_s0, [#allocation10]  }
  0xf9   : > { %s5581_s24 = smov [#allocation14]   ;;  %s5582_s30 = smov [#allocation17]  }
  0xfa   : > { %s508_s21 = sshll.u32 %s5581_s24, 4  ;;  %s532_s23 = sshll.u32 %s5582_s30, 4  ;;  %s509_s21 = int_to_ptr.vmem [resolvable:$true] %s508_s21  ;;  %s533_s23 = int_to_ptr.vmem [resolvable:$true] %s532_s23 }
  0xfb   : > { %s5270_s18 = scalar_lea.hbm %s6720_s6, 16 }
  0xfc   : > { %p5271_p1 = scmp.ne.s32.totalorder %s6720_s6, %s5270_s18  ;;  %p5277_p0 = scmp.lt.u32.totalorder %s5270_s18, %s6720_s6 }
  0xfe   : > { %p5273_p3 = pnand %p5271_p1, %p5745_p8 }
 0x100   : > { %p5274_p13 = pneg %p5273_p3 }
 0x102   : > { %p5279_p2 = pnand %p5277_p0, %p5274_p13 }
 0x104   : > { %5282 = shalt.err (!%p5279_p2)
}
 0x105   : > { %s5283_s0 = scalar_lea.vmem %s509_s21, 16  ;;  %s5290_s26 = scalar_lea.vmem %s509_s21, 32 }
 0x106   : > { %p5284_p5 = scmp.ne.s32.totalorder %s509_s21, %s5283_s0  ;;  %p5291_p4 = scmp.lt.s32.totalorder %s509_s21, %s509_s21 }
 0x107   : > { %p5292_p10 = scmp.lt.s32.totalorder %s5290_s26, %s5283_s0 }
 0x108   : > { %p5286_p7 = pnand %p5284_p5, %p5745_p8 }
 0x109   : > { %p5293_p11 = por %p5292_p10, %p5291_p4 }
 0x10a   : > { %p5287_p9 = pneg %p5286_p7 }
 0x10c   : > { %p5294_p12 = pnand %p5293_p11, %p5287_p9 }
 0x10e   : > { %5297 = shalt.err (!%p5294_p12)
}
 0x10f   : > { %4790 = dma.hbm_to_vmem [thread:$0]  (!%p5729_p6), %s6720_s6, 16, %s509_s21, [#allocation13]  }
 0x110   : > { %s5298_s30 = scalar_lea.hbm %s6722_s8, 16 }
 0x111   : > { %p5299_p1 = scmp.ne.s32.totalorder %s6722_s8, %s5298_s30  ;;  %p5305_p0 = scmp.lt.u32.totalorder %s5298_s30, %s6722_s8 }
 0x113   : > { %p5301_p3 = pnand %p5299_p1, %p5745_p8 }
 0x115   : > { %p5302_p13 = pneg %p5301_p3 }
 0x117   : > { %p5307_p2 = pnand %p5305_p0, %p5302_p13 }
 0x119   : > { %5310 = shalt.err (!%p5307_p2)
}
 0x11a   : > { %s5311_s29 = scalar_lea.vmem %s533_s23, 16  ;;  %s5318_s21 = scalar_lea.vmem %s533_s23, 32 }
 0x11b   : > { %p5312_p5 = scmp.ne.s32.totalorder %s533_s23, %s5311_s29  ;;  %p5319_p4 = scmp.lt.s32.totalorder %s533_s23, %s533_s23 }
 0x11c   : > { %p5320_p10 = scmp.lt.s32.totalorder %s5318_s21, %s5311_s29 }
 0x11d   : > { %p5314_p7 = pnand %p5312_p5, %p5745_p8 }
 0x11e   : > { %p5321_p11 = por %p5320_p10, %p5319_p4 }
 0x11f   : > { %p5315_p9 = pneg %p5314_p7 }
 0x121   : > { %p5322_p12 = pnand %p5321_p11, %p5315_p9 }
 0x123   : > { %5325 = shalt.err (!%p5322_p12)
}
 0x124   : > { %4796 = dma.hbm_to_vmem [thread:$0]  (!%p5729_p6), %s6722_s8, 16, %s533_s23, [#allocation16]  }
 0x125   : > { %s5583_s0 = smov [#allocation20]   ;;  %s5584_s17 = smov [#allocation23]  }
 0x126   : > { %s556_s26 = sshll.u32 %s5583_s0, 4  ;;  %s578_s22 = sshll.u32 %s5584_s17, 4  ;;  %s557_s26 = int_to_ptr.vmem [resolvable:$true] %s556_s26  ;;  %s579_s22 = int_to_ptr.vmem [resolvable:$true] %s578_s22 }
 0x127   : > { %s5326_s30 = scalar_lea.hbm %s6724_s10, 16 }
 0x128   : > { %p5327_p1 = scmp.ne.s32.totalorder %s6724_s10, %s5326_s30  ;;  %p5333_p0 = scmp.lt.u32.totalorder %s5326_s30, %s6724_s10 }
 0x12a   : > { %p5329_p3 = pnand %p5327_p1, %p5745_p8 }
 0x12c   : > { %p5330_p13 = pneg %p5329_p3 }
 0x12e   : > { %p5335_p2 = pnand %p5333_p0, %p5330_p13 }
 0x130   : > { %5338 = shalt.err (!%p5335_p2)
}
 0x131   : > { %s5339_s23 = scalar_lea.vmem %s557_s26, 16  ;;  %s5346_s29 = scalar_lea.vmem %s557_s26, 32 }
 0x132   : > { %p5340_p5 = scmp.ne.s32.totalorder %s557_s26, %s5339_s23  ;;  %p5347_p4 = scmp.lt.s32.totalorder %s557_s26, %s557_s26 }
 0x133   : > { %p5348_p10 = scmp.lt.s32.totalorder %s5346_s29, %s5339_s23 }
 0x134   : > { %p5342_p7 = pnand %p5340_p5, %p5745_p8 }
 0x135   : > { %p5349_p11 = por %p5348_p10, %p5347_p4 }
 0x136   : > { %p5343_p9 = pneg %p5342_p7 }
 0x138   : > { %p5350_p12 = pnand %p5349_p11, %p5343_p9 }
 0x13a   : > { %5353 = shalt.err (!%p5350_p12)
}
 0x13b   : > { %4802 = dma.hbm_to_vmem [thread:$0]  (!%p5729_p6), %s6724_s10, 16, %s557_s26, [#allocation19]  }
 0x13c   : > { %s5354_s17 = scalar_lea.hbm %s6726_s12, 16 }
 0x13d   : > { %p5355_p1 = scmp.ne.s32.totalorder %s6726_s12, %s5354_s17  ;;  %p5361_p0 = scmp.lt.u32.totalorder %s5354_s17, %s6726_s12 }
 0x13f   : > { %p5357_p3 = pnand %p5355_p1, %p5745_p8 }
 0x141   : > { %p5358_p13 = pneg %p5357_p3 }
 0x143   : > { %p5363_p2 = pnand %p5361_p0, %p5358_p13 }
 0x145   : > { %5366 = shalt.err (!%p5363_p2)
}
 0x146   : > { %s5367_s7 = scalar_lea.vmem %s579_s22, 16  ;;  %s5374_s26 = scalar_lea.vmem %s579_s22, 32 }
 0x147   : > { %p5368_p5 = scmp.ne.s32.totalorder %s579_s22, %s5367_s7  ;;  %p5375_p4 = scmp.lt.s32.totalorder %s579_s22, %s579_s22 }
 0x148   : > { %p5376_p10 = scmp.lt.s32.totalorder %s5374_s26, %s5367_s7 }
 0x149   : > { %p5370_p7 = pnand %p5368_p5, %p5745_p8 }
 0x14a   : > { %p5377_p11 = por %p5376_p10, %p5375_p4 }
 0x14b   : > { %p5371_p9 = pneg %p5370_p7 }
 0x14d   : > { %p5378_p12 = pnand %p5377_p11, %p5371_p9 }
 0x14f   : > { %5381 = shalt.err (!%p5378_p12)
}
 0x150   : > { %4808 = dma.hbm_to_vmem [thread:$0]  (!%p5729_p6), %s6726_s12, 16, %s579_s22, [#allocation22]  }
 0x151   : > { %s5585_s23 = smov [#allocation26]   ;;  %s5586_s21 = smov [#allocation27]  }
 0x152   : > { %s602_s29 = sshll.u32 %s5585_s23, 4  ;;  %s613_s3 = sshll.u32 %s5586_s21, 4  ;;  %s603_s29 = int_to_ptr.vmem [resolvable:$true] %s602_s29  ;;  %s614_s3 = int_to_ptr.vmem [resolvable:$true] %s613_s3 }
 0x153   : > { %s5382_s17 = scalar_lea.hbm %s6728_s14, 32 }
 0x154   : > { %p5383_p1 = scmp.ne.s32.totalorder %s6728_s14, %s5382_s17  ;;  %p5389_p0 = scmp.lt.u32.totalorder %s5382_s17, %s6728_s14 }
 0x156   : > { %p5385_p3 = pnand %p5383_p1, %p5745_p8 }
 0x158   : > { %p5386_p13 = pneg %p5385_p3 }
 0x15a   : > { %p5391_p2 = pnand %p5389_p0, %p5386_p13 }
 0x15c   : > { %5394 = shalt.err (!%p5391_p2)
}
 0x15d   : > { %s5395_s22 = scalar_lea.vmem %s603_s29, 32  ;;  %p5403_p4 = scmp.lt.s32.totalorder %s603_s29, %s603_s29 }
 0x15e   : > { %p5396_p5 = scmp.ne.s32.totalorder %s603_s29, %s5395_s22  ;;  %p5404_p10 = scmp.lt.s32.totalorder %s5395_s22, %s5395_s22 }
 0x160   : > { %p5398_p7 = pnand %p5396_p5, %p5745_p8  ;;  %p5405_p11 = por %p5404_p10, %p5403_p4 }
 0x162   : > { %p5399_p9 = pneg %p5398_p7 }
 0x164   : > { %p5406_p12 = pnand %p5405_p11, %p5399_p9 }
 0x166   : > { %5409 = shalt.err (!%p5406_p12)
}
 0x167   : > { %4814 = dma.hbm_to_vmem [thread:$0]  (!%p5729_p6), %s6728_s14, 32, %s603_s29, [#allocation25]  }
 0x168   : > { %s5410_s23 = scalar_lea.hbm %s6729_s15, 32 }
 0x169   : > { %p5411_p1 = scmp.ne.s32.totalorder %s6729_s15, %s5410_s23  ;;  %p5417_p0 = scmp.lt.u32.totalorder %s5410_s23, %s6729_s15 }
 0x16b   : > { %p5413_p3 = pnand %p5411_p1, %p5745_p8 }
 0x16d   : > { %p5414_p13 = pneg %p5413_p3 }
 0x16f   : > { %p5419_p2 = pnand %p5417_p0, %p5414_p13 }
 0x171   : > { %5422 = shalt.err (!%p5419_p2)
}
 0x172   : > { %s5423_s16 = scalar_lea.vmem %s614_s3, 32  ;;  %p5431_p4 = scmp.lt.s32.totalorder %s614_s3, %s614_s3 }
 0x173   : > { %p5424_p5 = scmp.ne.s32.totalorder %s614_s3, %s5423_s16  ;;  %p5432_p10 = scmp.lt.s32.totalorder %s5423_s16, %s5423_s16 }
 0x175   : > { %p5426_p7 = pnand %p5424_p5, %p5745_p8  ;;  %p5433_p11 = por %p5432_p10, %p5431_p4 }
 0x177   : > { %p5427_p9 = pneg %p5426_p7 }
 0x179   : > { %p5434_p12 = pnand %p5433_p11, %p5427_p9 }
 0x17b   : > { %5437 = shalt.err (!%p5434_p12)
}
 0x17c   : > { %s6769_s30 = sld [smem:[#allocation43_spill]]  ;;  %s6770_s5 = sld [smem:[#allocation42_spill]] }
 0x17d   : > { %s6771_s22 = sld [smem:[#allocation41_spill]]  ;;  %s6772_s19 = sld [smem:[#allocation40_spill]] }
 0x17e   : > { %s6773_s7 = sld [smem:[#allocation44_spill]] }
 0x17f   : > { %4817 = dma.hbm_to_vmem [thread:$0]  (!%p5729_p6), %s6729_s15, 32, %s614_s3, [#allocation28]  }
 0x182   : > { %s4285_s26 = sadd.s32 4294967294, %s6769_s30   ;;  %s6043_s16 = sadd.s32 1, %s6769_s30  }
 0x183   : > { %s50_s20 = sadd.s32 1, %s6770_s5  ;;  %s47_s18 = ssub.s32 %s6769_s30, %s6043_s16 }
 0x184   : > { %p57_p8 = scmp.ne.s32.totalorder %s6770_s5, %s6771_s22  ;;  %p48_p1 = scmp.eq.s32.totalorder %s47_s18, 0 }
 0x185   : > { %p58_p3 = scmp.eq.s32.totalorder %s6769_s30, 0  ;;  %p63_p13 = scmp.ne.s32.totalorder %s6771_s22, %s6772_s19 }
 0x186   : > { %p423_p0 = scmp.eq.s32.totalorder %s6773_s7, 1  ;;  %p6774_p5 = scmp.eq.s32.totalorder %s6773_s7, 0 }
 0x187   : > { %s6055_s28 = scalar_select %p48_p1, %s6770_s5, %s50_s20  }
 0x188   : > { %p59_p2 = por %p58_p3, %p57_p8  ;;  %p6059_p7 = por %p6774_p5, %p63_p13 }
 0x189   : > { %p6063_p6 = por %p423_p0, %p57_p8  ;;  %p429_p9 = scmp.eq.s32.totalorder %s4285_s26, 1 }
 0x18a   : > { %p4841_p4 = scmp.lt.s32.totalorder %s6769_s30, 2  ;;  %s627_s21 = sand.u32 1, %s6770_s5  }
 0x18b   : > { %s6776_s3 = scalar_select %p6063_p6, 1, 0 }
 0x18c   : > { %p6069_p10 = por %p429_p9, %p63_p13  ;;  %s4303_s0 = sshll.u32 %s627_s21, 4 }
 0x18d   : > { %s4410_s17 = sshll.u32 %s6769_s30, 8  ;;  %s6778_s22 = sld [smem:[#allocation46_spill]] }
 0x18e   : > { %s6777_s1 = scalar_select %p6069_p10, 1, 0 }
 0x18f   : > { %s631_s7 = scalar_lea.vmem [#allocation3], %s4303_s0  ;;  %p6079_p11 = pnand %p4841_p4, %p59_p2 }
 0x190   : > { %s638_s20 = sshll.u32 %s631_s7, 4  ;;  %s6085_s30 = scalar_lea.sflag [#allocation4], %s627_s21  ;;  %s6083_s20 = int_to_ptr.vmem [resolvable:$true] %s638_s20 }
 0x191   : > { %p5440_p8 = pneg %p6079_p11 }
 0x193   : > { %s6077_s19 = scalar_lea.hbm %s6778_s22, %s4410_s17  ;;  %s5443_s17 = scalar_lea.hbm %s6778_s22, 512 }
 0x194   : > { %s5438_s5 = scalar_lea.hbm %s6077_s19, 256  ;;  %p5444_p13 = scmp.lt.u32.totalorder %s6077_s19, %s6778_s22 }
 0x195   : > { %p5439_p12 = scmp.ne.s32.totalorder %s6077_s19, %s5438_s5  ;;  %p5445_p0 = scmp.lt.u32.totalorder %s5443_s17, %s5438_s5 }
 0x196   : > { %p5447_p5 = scmp.lt.u32.totalorder %s5438_s5, %s6077_s19 }
 0x197   : > { %p5441_p1 = pnand %p5440_p8, %p5439_p12  ;;  %p5446_p2 = por %p5445_p0, %p5444_p13 }
 0x199   : > { %p5442_p3 = pneg %p5441_p1  ;;  %p5448_p9 = por %p5447_p5, %p5446_p2 }
 0x19b   : > { %p5449_p4 = pnand %p5448_p9, %p5442_p3 }
 0x19d   : > { %5452 = shalt.err (!%p5449_p4)
}
 0x19e   : > { %s5453_s21 = scalar_lea.vmem %s6083_s20, 256  ;;  %s5587_s7 = smov [#allocation3]  }
 0x19f   : > { %p5454_p12 = scmp.ne.s32.totalorder %s6083_s20, %s5453_s21  ;;  %s5458_s18 = sshll.u32 %s5587_s7, 4  ;;  %s5459_s18 = int_to_ptr.vmem [resolvable:$false] %s5458_s18 }
 0x1a0   : > { %s5460_s0 = scalar_lea.vmem %s5459_s18, 512  ;;  %p5461_p6 = scmp.lt.s32.totalorder %s6083_s20, %s5459_s18 }
 0x1a1   : > { %p5456_p1 = pnand %p5454_p12, %p5440_p8  ;;  %p5462_p13 = scmp.lt.s32.totalorder %s5460_s0, %s5453_s21 }
 0x1a3   : > { %p5457_p10 = pneg %p5456_p1  ;;  %p5463_p0 = por %p5462_p13, %p5461_p6 }
 0x1a5   : > { %p5464_p2 = pnand %p5463_p0, %p5457_p10 }
 0x1a7   : > { %5467 = shalt.err (!%p5464_p2)
}
 0x1a8   : > { %s6780_s5 = smov 8   ;;  %s6781_s17 = sld [smem:[#allocation45_spill]] }
 0x1a9   : > { %4821 = dma.hbm_to_vmem [thread:$0]  (!%p6079_p11), %s6077_s19, 256, %s6083_s20, %s6085_s30, %s6768_s27, %s6768_s27, %s6780_s5  }
 0x1ae   : > { %p6782_p8 = scmp.ne.s32.totalorder %s6781_s17, 0 }
 0x1af   : > { %s6783_s29 = sld [smem:[#allocation41_spill]] (!%p6782_p8) }
 0x1b0   : > { %650 = sbr.rel (%p6782_p8) target bundleno = 3544 (0xdd8), region = 88 }
 0x1b5   : > { %s6119_s24 = sand.u32 (!%p6782_p8), 1, %s6783_s29  }
 0x1b6   : > { %s4307_s21 = sshll.u32 (!%p6782_p8), %s6119_s24, 4  ;;  %s653_s7 = scalar_lea.sflag (!%p6782_p8), [#allocation4], %s6119_s24 }
 0x1b7   : > { %s6125_s26 = scalar_lea.vmem [#allocation3], %s4307_s21 }
 0x1b8   : > { %5513 = dma.done.wait (%p6059_p7), %s653_s7, 256  }
 0x1b9   : > { %5515 = vsyncadd (%p6059_p7), %s653_s7, 4294967040  ;;  %s6784_s27 = sld [smem:[#allocation44_spill]] }
 0x1bf   : > { %p6785_p6 = scmp.eq.s32.totalorder %s6784_s27, 0 }
 0x1c1   : > { %5517 = dma.done.wait (%p6785_p6), [#allocation7], 1600   ;;  %p6786_p10 = pmov %p6785_p6 }
 0x1c2   : > { %p6787_p11 = pmov %p6785_p6 }
 0x1c3   : > { %5519 = vsyncadd (%p6786_p10), [#allocation7], 4294965696 }
 0x1c4   : > { %5521 = dma.done.wait (%p6787_p11), [#allocation10], 528   ;;  %p6788_p3 = pmov %p6785_p6 }
 0x1c6   : > { %5523 = vsyncadd (%p6788_p3), [#allocation10], 4294966768  ;;  %p6789_p5 = pmov %p6788_p3 }
 0x1c7   : > { %p6790_p9 = pmov %p6788_p3 }
 0x1c8   : > { %5525 = dma.done.wait (%p6789_p5), [#allocation13], 32  }
 0x1c9   : > { %5527 = vsyncadd (%p6790_p9), [#allocation13], 4294967264  ;;  %p6791_p7 = pmov %p6788_p3 }
 0x1ca   : > { %p6792_p4 = pmov %p6788_p3 }
 0x1cb   : > { %5529 = dma.done.wait (%p6791_p7), [#allocation16], 528  }
 0x1cc   : > { %5531 = vsyncadd (%p6792_p4), [#allocation16], 4294966768  ;;  %p6793_p12 = pmov %p6788_p3 }
 0x1cd   : > { %p6794_p1 = pmov %p6788_p3 }
 0x1ce   : > { %5533 = dma.done.wait (%p6793_p12), [#allocation19], 1040  }
 0x1cf   : > { %5535 = vsyncadd (%p6794_p1), [#allocation19], 4294966256  ;;  %p6795_p13 = pmov %p6794_p1 }
 0x1d0   : > { %p6796_p0 = pmov %p6794_p1 }
 0x1d1   : > { %5537 = dma.done.wait (%p6795_p13), [#allocation22], 32  }
 0x1d2   : > { %5539 = vsyncadd (%p6796_p0), [#allocation22], 4294967264  ;;  %p6797_p2 = pmov %p6796_p0 }
 0x1d3   : > { %p6798_p8 = pmov %p6796_p0 }
 0x1d4   : > { %5541 = dma.done.wait (%p6797_p2), [#allocation25], 1056  }
 0x1d5   : > { %5543 = vsyncadd (%p6798_p8), [#allocation25], 4294966240  ;;  %p6799_p6 = pmov %p6796_p0 }
 0x1d6   : > { %p6800_p10 = pmov %p6796_p0 }
 0x1d7   : > { %5545 = dma.done.wait (%p6799_p6), [#allocation28], 32  }
 0x1d8   : > { %5547 = vsyncadd (%p6800_p10), [#allocation28], 4294967264  ;;  %v5588_v1 = vmov 0.0   ;;  %vm5589_vm0 = vmmov 0   ;;  %v772_v2 = vld [vmem:[#allocation6] sm:$0xff]  ;;  %v773_v3 = vld [vmem:[#allocation6 + $0x8] sm:$0xff]  ;;  %v788_v23 = vlaneseq }
 0x1d9   : > { %4496 = vmatprep.subr.bf16.mxu0 %v5588_v1  ;;  %4504 = vmatprep.subr.bf16.mxu1 %v5588_v1  ;;  %v776_v4 = vld [vmem:[#allocation6 + $0x20] sm:$0xff]  ;;  %v786_v5 = vpack.c.bf16 %v773_v3, %v772_v2  ;;  %v777_v6 = vld [vmem:[#allocation6 + $0x28] sm:$0xff]  ;;  %v774_v7 = vld [vmem:[#allocation6 + $0x10] sm:$0xff]  ;;  %vm792_vm1 = vcmask 261120   ;;  %vm1015_vm2 = vcmask 64512   ;;  %s5590_s23 = smov 120  }
 0x1da   : > { %4500 = vmatprep.mubr.msk.bf16.mxu0 %vm5589_vm0, %v5588_v1  ;;  %4508 = vmatprep.mubr.msk.bf16.mxu1 %vm5589_vm0, %v5588_v1  ;;  %v775_v8 = vld [vmem:[#allocation6 + $0x18] sm:$0xff]  ;;  %v837_v9 = vpack.c.bf16 %v777_v6, %v776_v4  ;;  %v778_v10 = vld [vmem:[#allocation6 + $0x30] sm:$0xff]  ;;  %v780_v16 = vld [vmem:[#allocation6 + $0x40] sm:$0xff]  ;;  %v6186_v24 = vshrl.u32 %v788_v23, 7  ;;  %s5591_s19 = smov 112   ;;  %s5592_s20 = smov 104  }
 0x1db   : > { %v779_v11 = vld [vmem:[#allocation6 + $0x38] sm:$0xff]  ;;  %4497 = vmatpush3.bf16.msra.mxu0 %v786_v5  ;;  %v787_v12 = vpack.c.bf16 %v775_v8, %v774_v7  ;;  %v770_v13 = vld [vmem:[%s6125_s26] sm:$0xff]  ;;  %v781_v17 = vld [vmem:[#allocation6 + $0x48] sm:$0xff]  ;;  %vm2397_vm3 = vcmask 1043456   ;;  %vm2216_vm4 = vcmask 27648   ;;  %vm2393_vm5 = vcmask 31744  }
 0x1dc   : > { %v771_v14 = vld [vmem:[%s6125_s26 + $0x8] sm:$0xff]  ;;  %4505 = vmatpush3.bf16.msra.mxu1 %v837_v9  ;;  %4498 = vmatprep.subr.bf16.mxu0 %v5588_v1  ;;  %v838_v15 = vpack.c.bf16 %v779_v11, %v778_v10  ;;  %v884_v19 = vpack.c.bf16 %v781_v17, %v780_v16  ;;  %v782_v20 = vld [vmem:[#allocation6 + $0x50] sm:$0xff]  ;;  %v6189_v25 = vsub.s32 0, %v6186_v24  ;;  %v6191_v26 = vld [vmem:[#allocation8] sm:$0x7]  ;;  %v6194_v27 = vsub.s32 1, %v6186_v24 }
 0x1dd   : > { %4506 = vmatprep.subr.bf16.mxu1 %v5588_v1  ;;  %v785_v18 = vpack.c.bf16 %v771_v14, %v770_v13  ;;  %v783_v21 = vld [vmem:[#allocation6 + $0x58] sm:$0xff]  ;;  %v888_v50 = vsub.s32 2, %v6186_v24  ;;  %s5593_s30 = smov 8   ;;  %s5594_s18 = smov 16   ;;  %vm3641_vm6 = vcmask 130048   ;;  %vm3644_vm7 = vcmask 195584  }
 0x1de   : > { %v885_v22 = vpack.c.bf16 %v783_v21, %v782_v20  ;;  %v791_v28 = vrot.slane %v6191_v26, %v6189_v25  ;;  %v842_v29 = vrot.slane %v6191_v26, %v6194_v27  ;;  %s5595_s0 = smov 24   ;;  %vm3832_vm8 = vcmask 523264   ;;  %s766_s5 = scalar_lea.vmem [#allocation29], %s4307_s21 }
 0x1df   : > { %4499 = vmatpush3.bf16.msra.mxu0 %v787_v12  ;;  %v889_v51 = vrot.slane %v6191_v26, %v888_v50  ;;  %s4069_s17 = sshll.u32 %s766_s5, 4  ;;  %s4411_s29 = sshll.u32 %s6784_s27, 8  ;;  %s6662_s17 = int_to_ptr.vmem [resolvable:$true] %s4069_s17 }
 0x1e0   : > { %4507 = vmatpush3.bf16.msra.mxu1 %v838_v15  ;;  %4512 = vmatprep.subr.bf16.mxu0 %v5588_v1  ;;  %s4056_s21 = scalar_lea.sflag [#allocation5], %s6119_s24  ;;  %p6802_p3 = scmp.ne.s32.totalorder %s6776_s3, 0 }
 0x1e1   : > { %4520 = vmatprep.subr.mxu1 %v5588_v1  ;;  %s5597_s27 = smov [#allocation29]  }
 0x1e2   : > { %4501 = vmatmul.mubr.msk.bf16.vlgmr.msra.gmra.mrb[0].mxu0 %vm792_vm1, %v785_v18 }
 0x1e3   : > { %4509 = vmatmul.mubr.msk.bf16.vlgmr.msra.gmra.mrb[0].mxu1 %vm792_vm1, %v785_v18  ;;  %4513 = vmatpush3.bf16.msra.mxu0 %v884_v19 }
 0x1e4   : > { %4514 = vmatprep.subr.bf16.mxu0 %v5588_v1  ;;  %4516 = vmatprep.mubr.msk.bf16.mxu0 %vm5589_vm0, %v5588_v1 }
 0x1e5   : > { %4522 = vmatprep.mubr.msk.f32.mxu1 %vm5589_vm0, %v5588_v1 }
 0x1e7   : > { %4515 = vmatpush3.bf16.msra.mxu0 %v885_v22 }
 0x1e8   : > { %4540 = vmatprep.subr.mxu0 %v5588_v1 }
 0x1ea   : > { %4517 = vmatmul.mubr.msk.bf16.vlgmr.msra.gmra.mrb[4].mxu0 %vm792_vm1, %v785_v18 }
 0x1eb   : > { %4542 = vmatprep.mubr.msk.f32.mxu0 %vm5589_vm0, %v5588_v1 }
 0x2b5   : > { %v830_v30 = vpop.f32.mrb[0].mxu0 }
 0x2b6   : > { %v831_v31 = vadd.f32 %v830_v30, %v791_v28  ;;  %v877_v32 = vpop.f32.mrb[0].mxu1  ;;  %v4502_v33 = vpop.f32.mrb[1].mxu0 }
 0x2b7   : > { %v878_v34 = vadd.f32 %v877_v32, %v842_v29  ;;  %v4510_v35 = vpop.f32.mrb[1].mxu1  ;;  %v833_v36 = vpop.f32.mrb[2].mxu0 }
 0x2b8   : > { %v880_v37 = vpop.f32.mrb[2].mxu1  ;;  %935 = vrot.lane.b32.xlu1 %v831_v31, %s5590_s23  ;;  %v4503_v38 = vpop.f32.mrb[3].mxu0  ;;  %v933_v40 = vcombine.high %v831_v31, %v831_v31  ;;  %v834_v43 = vadd.f32 %v833_v36, %v791_v28 }
 0x2b9   : > { %963 = vrot.lane.b32.xlu0 %v878_v34, %s5590_s23  ;;  %v4511_v39 = vpop.f32.mrb[3].mxu1  ;;  %4521 = vmatpush3.xpose.msk.msra.mxu1 %vm1015_vm2, %v878_v34  ;;  %v961_v41 = vcombine.high %v878_v34, %v878_v34  ;;  %v881_v42 = vadd.f32 %v880_v37, %v842_v29 }
 0x2ba   : > { %4525 = vmatprep.subr.mxu1 %v5588_v1  ;;  %v934_v45 = vcombine.high %v834_v43, %v834_v43 }
 0x2bb   : > { %v962_v44 = vcombine.high %v881_v42, %v881_v42 }
 0x2bc   : > { %4523 = vmatmul.mubr.msk.f32.vlgmr.msra.gmra.mrb[4].mxu1 %vm1015_vm2, %v831_v31  ;;  %937 = vrot.lane.b32.xlu1 %v933_v40, %s5590_s23 }
 0x2bd   : > { %971 = vrot.lane.b32.xlu0 %v878_v34, %s5591_s19  ;;  %4526 = vmatpush3.xpose.msk.msra.mxu1 %vm1015_vm2, %v961_v41  ;;  %v924_v46 = vpop.f32.mrb[4].mxu0 }
 0x2be   : > { %4527 = vmatprep.mubr.msk.f32.mxu1 %vm5589_vm0, %v5588_v1  ;;  %4530 = vmatprep.subr.mxu1 %v5588_v1  ;;  %v4518_v47 = vpop.f32.mrb[5].mxu0  ;;  %v6245_v52 = vadd.f32 %v924_v46, %v889_v51 }
 0x2bf   : > { %v927_v48 = vpop.f32.mrb[6].mxu0 }
 0x2c0   : > { %4528 = vmatmul.mubr.msk.f32.vlgmr.msra.gmra.mrb[6].mxu1 %vm1015_vm2, %v933_v40  ;;  %973 = vrot.lane.b32.xlu1 %v961_v41, %s5591_s19  ;;  %v4519_v49 = vpop.f32.mrb[7].mxu0  ;;  %v6250_v53 = vadd.f32 %v927_v48, %v889_v51  ;;  %v6256_v54 = vcombine.high %v6245_v52, %v6245_v52 }
 0x2c1   : > { %943 = vrot.lane.b32.xlu0 %v831_v31, %s5591_s19  ;;  %4531 = vmatpush3.xpose.msk.msra.mxu1 %vm1015_vm2, %v881_v42 }
 0x2c2   : > { %4532 = vmatprep.mubr.msk.f32.mxu1 %vm5589_vm0, %v5588_v1  ;;  %4535 = vmatprep.subr.mxu1 %v5588_v1  ;;  %v6266_v55 = vcombine.high %v6250_v53, %v6250_v53 }
 0x2c4   : > { %4533 = vmatmul.mubr.msk.f32.vlgmr.msra.gmra.mrb[8].mxu1 %vm1015_vm2, %v834_v43  ;;  %945 = vrot.lane.b32.xlu1 %v933_v40, %s5591_s19 }
 0x2c5   : > { %979 = vrot.lane.b32.xlu0 %v878_v34, %s5592_s20  ;;  %4536 = vmatpush3.xpose.msk.msra.mxu1 %vm1015_vm2, %v962_v44 }
 0x2c6   : > { %4537 = vmatprep.mubr.msk.f32.mxu1 %vm5589_vm0, %v5588_v1  ;;  %4545 = vmatprep.subr.mxu1 %v5588_v1 }
 0x2c8   : > { %4538 = vmatmul.mubr.msk.f32.vlgmr.msra.gmra.mrb[10].mxu1 %vm1015_vm2, %v934_v45  ;;  %981 = vrot.lane.b32.xlu1 %v961_v41, %s5592_s20 }
 0x2c9   : > { %951 = vrot.lane.b32.xlu0 %v831_v31, %s5592_s20  ;;  %4547 = vmatprep.mubr.msk.f32.mxu1 %vm5589_vm0, %v5588_v1 }
 0x2cc   : > { %953 = vrot.lane.b32.xlu1 %v933_v40, %s5592_s20 }
 0x2cd   : > { %965 = vrot.lane.b32.xlu0 %v961_v41, %s5590_s23 }
 0x2d0   : > { %969 = vrot.lane.b32.xlu1 %v962_v44, %s5590_s23 }
 0x2d1   : > { %967 = vrot.lane.b32.xlu0 %v881_v42, %s5590_s23 }
 0x2d4   : > { %941 = vrot.lane.b32.xlu1 %v934_v45, %s5590_s23 }
 0x2d5   : > { %939 = vrot.lane.b32.xlu0 %v834_v43, %s5590_s23 }
 0x2d8   : > { %977 = vrot.lane.b32.xlu1 %v962_v44, %s5591_s19 }
 0x2d9   : > { %975 = vrot.lane.b32.xlu0 %v881_v42, %s5591_s19 }
 0x2dc   : > { %949 = vrot.lane.b32.xlu1 %v934_v45, %s5591_s19 }
 0x2dd   : > { %947 = vrot.lane.b32.xlu0 %v834_v43, %s5591_s19 }
 0x2e0   : > { %985 = vrot.lane.b32.xlu1 %v962_v44, %s5592_s20 }
 0x2e1   : > { %983 = vrot.lane.b32.xlu0 %v881_v42, %s5592_s20 }
 0x2e4   : > { %957 = vrot.lane.b32.xlu1 %v934_v45, %s5592_s20 }
 0x2e5   : > { %955 = vrot.lane.b32.xlu0 %v834_v43, %s5592_s20 }
 0x2e8   : > { %991 = vrot.lane.b32.xlu1 %v6245_v52, %s5590_s23 }
 0x2e9   : > { %999 = vrot.lane.b32.xlu0 %v6245_v52, %s5591_s19 }
 0x2ec   : > { %995 = vrot.lane.b32.xlu1 %v6250_v53, %s5590_s23 }
 0x2ed   : > { %993 = vrot.lane.b32.xlu0 %v6256_v54, %s5590_s23 }
 0x2f0   : > { %1001 = vrot.lane.b32.xlu1 %v6256_v54, %s5591_s19 }
 0x2f4   : > { %997 = vrot.lane.b32.xlu1 %v6266_v55, %s5590_s23  ;;  %s6801_s23 = sld [smem:[#allocation51_spill]] }
 0x32a   : > { %v936_v56 = vpop.permute.xlu1 %935 }
 0x32b   : > { %v964_v57 = vpop.permute.xlu0 %963 }
 0x32c   : > { %4541 = vmatpush3.xpose.msk.msra.mxu0 %vm1015_vm2, %v964_v57 }
 0x32d   : > { %4550 = vmatprep.subr.mxu0 %v5588_v1 }
 0x32e   : > { %v938_v58 = vpop.permute.xlu1 %937 }
 0x32f   : > { %v972_v59 = vpop.permute.xlu0 %971  ;;  %4543 = vmatmul.mubr.msk.f32.vlgmr.msra.gmra.mrb[8].mxu0 %vm1015_vm2, %v936_v56 }
 0x330   : > { %4552 = vmatprep.mubr.msk.f32.mxu0 %vm5589_vm0, %v5588_v1 }
 0x332   : > { %v974_v60 = vpop.permute.xlu1 %973 }
 0x333   : > { %v944_v61 = vpop.permute.xlu0 %943 }
 0x336   : > { %v946_v62 = vpop.permute.xlu1 %945 }
 0x337   : > { %v980_v63 = vpop.permute.xlu0 %979 }
 0x33a   : > { %v982_v0 = vpop.permute.xlu1 %981 }
 0x33b   : > { %v952_v2 = vpop.permute.xlu0 %951 }
 0x33e   : > { %v954_v3 = vpop.permute.xlu1 %953 }
 0x33f   : > { %v966_v4 = vpop.permute.xlu0 %965 }
 0x340   : > { %4546 = vmatpush3.xpose.msk.msra.mxu1 %vm1015_vm2, %v966_v4 }
 0x341   : > { %4555 = vmatprep.subr.mxu1 %v5588_v1 }
 0x342   : > { %v970_v5 = vpop.permute.xlu1 %969 }
 0x343   : > { %v968_v6 = vpop.permute.xlu0 %967  ;;  %4548 = vmatmul.mubr.msk.f32.vlgmr.msra.gmra.mrb[12].mxu1 %vm1015_vm2, %v938_v58 }
 0x344   : > { %4551 = vmatpush3.xpose.msk.msra.mxu0 %vm1015_vm2, %v968_v6  ;;  %4556 = vmatpush3.xpose.msk.msra.mxu1 %vm1015_vm2, %v970_v5 }
 0x345   : > { %4560 = vmatprep.subr.mxu0 %v5588_v1  ;;  %4557 = vmatprep.mubr.msk.f32.mxu1 %vm5589_vm0, %v5588_v1 }
 0x346   : > { %v942_v7 = vpop.permute.xlu1 %941  ;;  %4565 = vmatprep.subr.mxu1 %v5588_v1 }
 0x347   : > { %v940_v8 = vpop.permute.xlu0 %939  ;;  %4558 = vmatmul.mubr.msk.f32.vlgmr.msra.gmra.mrb[14].mxu1 %vm1015_vm2, %v942_v7 }
 0x348   : > { %4553 = vmatmul.mubr.msk.f32.vlgmr.msra.gmra.mrb[10].mxu0 %vm1015_vm2, %v940_v8  ;;  %4566 = vmatpush3.xpose.msk.msra.mxu1 %vm1015_vm2, %v974_v60 }
 0x349   : > { %4561 = vmatpush3.xpose.msk.msra.mxu0 %vm1015_vm2, %v972_v59  ;;  %4562 = vmatprep.mubr.msk.f32.mxu0 %vm5589_vm0, %v5588_v1 }
 0x34a   : > { %4570 = vmatprep.subr.mxu0 %v5588_v1  ;;  %v978_v9 = vpop.permute.xlu1 %977  ;;  %4567 = vmatprep.mubr.msk.f32.mxu1 %vm5589_vm0, %v5588_v1 }
 0x34b   : > { %v976_v10 = vpop.permute.xlu0 %975  ;;  %4575 = vmatprep.subr.mxu1 %v5588_v1  ;;  %4568 = vmatmul.mubr.msk.f32.vlgmr.msra.gmra.mrb[16].mxu1 %vm1015_vm2, %v946_v62 }
 0x34c   : > { %4563 = vmatmul.mubr.msk.f32.vlgmr.msra.gmra.mrb[12].mxu0 %vm1015_vm2, %v944_v61  ;;  %4576 = vmatpush3.xpose.msk.msra.mxu1 %vm1015_vm2, %v978_v9 }
 0x34d   : > { %4571 = vmatpush3.xpose.msk.msra.mxu0 %vm1015_vm2, %v976_v10  ;;  %4572 = vmatprep.mubr.msk.f32.mxu0 %vm5589_vm0, %v5588_v1 }
 0x34e   : > { %4580 = vmatprep.subr.mxu0 %v5588_v1  ;;  %v950_v11 = vpop.permute.xlu1 %949  ;;  %4577 = vmatprep.mubr.msk.f32.mxu1 %vm5589_vm0, %v5588_v1 }
 0x34f   : > { %v948_v12 = vpop.permute.xlu0 %947  ;;  %4585 = vmatprep.subr.mxu1 %v5588_v1  ;;  %4578 = vmatmul.mubr.msk.f32.vlgmr.msra.gmra.mrb[18].mxu1 %vm1015_vm2, %v950_v11 }
 0x350   : > { %4573 = vmatmul.mubr.msk.f32.vlgmr.msra.gmra.mrb[14].mxu0 %vm1015_vm2, %v948_v12  ;;  %4586 = vmatpush3.xpose.msk.msra.mxu1 %vm1015_vm2, %v982_v0 }
 0x351   : > { %4581 = vmatpush3.xpose.msk.msra.mxu0 %vm1015_vm2, %v980_v63  ;;  %4582 = vmatprep.mubr.msk.f32.mxu0 %vm5589_vm0, %v5588_v1 }
 0x352   : > { %4590 = vmatprep.subr.mxu0 %v5588_v1  ;;  %v986_v13 = vpop.permute.xlu1 %985  ;;  %4587 = vmatprep.mubr.msk.f32.mxu1 %vm5589_vm0, %v5588_v1 }
 0x353   : > { %v984_v14 = vpop.permute.xlu0 %983  ;;  %4595 = vmatprep.subr.mxu1 %v5588_v1  ;;  %4588 = vmatmul.mubr.msk.f32.vlgmr.msra.gmra.mrb[20].mxu1 %vm1015_vm2, %v954_v3 }
 0x354   : > { %4583 = vmatmul.mubr.msk.f32.vlgmr.msra.gmra.mrb[16].mxu0 %vm1015_vm2, %v952_v2  ;;  %4596 = vmatpush3.xpose.msk.msra.mxu1 %vm1015_vm2, %v986_v13 }
 0x355   : > { %4591 = vmatpush3.xpose.msk.msra.mxu0 %vm1015_vm2, %v984_v14  ;;  %4592 = vmatprep.mubr.msk.f32.mxu0 %vm5589_vm0, %v5588_v1 }
 0x356   : > { %v958_v15 = vpop.permute.xlu1 %957  ;;  %4597 = vmatprep.mubr.msk.f32.mxu1 %vm5589_vm0, %v5588_v1  ;;  %4600 = vmatprep.subr.mxu0 %v5588_v1 }
 0x357   : > { %v956_v16 = vpop.permute.xlu0 %955  ;;  %4598 = vmatmul.mubr.msk.f32.vlgmr.msra.gmra.mrb[22].mxu1 %vm1015_vm2, %v958_v15  ;;  %4605 = vmatprep.subr.mxu1 %v5588_v1 }
 0x358   : > { %4593 = vmatmul.mubr.msk.f32.vlgmr.msra.gmra.mrb[18].mxu0 %vm1015_vm2, %v956_v16  ;;  %4606 = vmatpush3.msk.msra.mxu1 %vm2397_vm3, %v6256_v54 }
 0x359   : > { %4601 = vmatpush3.msk.msra.mxu0 %vm2397_vm3, %v6245_v52  ;;  %4602 = vmatprep.mubr.msk.f32.mxu0 %vm5589_vm0, %v5588_v1 }
 0x35a   : > { %4607 = vmatprep.mubr.msk.f32.mxu1 %vm5589_vm0, %v5588_v1  ;;  %4610 = vmatprep.subr.mxu0 %v5588_v1 }
 0x35b   : > { %4615 = vmatprep.subr.mxu1 %v5588_v1 }
 0x38f   : > { %v1086_v17 = vpop.f32.mrb[4].mxu1 }
 0x390   : > { %v6336_v18 = vmul.f32 0.35355338, %v1086_v17  ;;  %v4524_v19 = vpop.f32.mrb[5].mxu1 }
 0x392   : > { %v2217_v20 = vsel %vm2216_vm4, %v6336_v18, -inf }
 0x393   : > { %v1160_v21 = vpop.f32.mrb[6].mxu1  ;;  %2218 = vmax.xlane.f32.xlu0 %v2217_v20 }
 0x394   : > { %v6340_v22 = vmul.f32 0.35355338, %v1160_v21  ;;  %v4529_v23 = vpop.f32.mrb[7].mxu1 }
 0x396   : > { %v2220_v24 = vsel %vm2216_vm4, %v6340_v22, -inf }
 0x397   : > { %v1234_v26 = vpop.f32.mrb[8].mxu1  ;;  %2221 = vmax.xlane.f32.xlu1 %v2220_v24 }
 0x398   : > { %v6344_v28 = vmul.f32 0.35355338, %v1234_v26  ;;  %v4534_v29 = vpop.f32.mrb[9].mxu1 }
 0x399   : > { %v6400_v29 = vpop.permute.xlu1 %991 }
 0x39a   : > { %v2223_v30 = vsel %vm2216_vm4, %v6344_v28, -inf }
 0x39b   : > { %v1308_v31 = vpop.f32.mrb[10].mxu1  ;;  %2224 = vmax.xlane.f32.xlu0 %v2223_v30  ;;  %v6402_v30 = vpop.permute.xlu0 %999 }
 0x39c   : > { %v6348_v32 = vmul.f32 0.35355338, %v1308_v31  ;;  %v4539_v33 = vpop.f32.mrb[11].mxu1 }
 0x39d   : > { %v6404_v31 = vpop.permute.xlu1 %995 }
 0x39e   : > { %v2226_v34 = vsel %vm2216_vm4, %v6348_v32, -inf }
 0x39f   : > { %2227 = vmax.xlane.f32.xlu0 %v2226_v34  ;;  %v6408_v33 = vpop.permute.xlu0 %993 }
 0x3a1   : > { %v6410_v34 = vpop.permute.xlu1 %1001 }
 0x402   : > { %v1382_v35 = vpop.f32.mrb[8].mxu0 }
 0x403   : > { %v6352_v36 = vmul.f32 0.35355338, %v1382_v35  ;;  %v4544_v37 = vpop.f32.mrb[9].mxu0 }
 0x404   : > { %v6416_v37 = vpop.permute.xlu1 %997 }
 0x405   : > { %v2229_v38 = vsel %vm2216_vm4, %v6352_v36, -inf }
 0x406   : > { %2230 = vmax.xlane.f32.xlu1 %v2229_v38 }
 0x416   : > { %v1456_v39 = vpop.f32.mrb[12].mxu1 }
 0x417   : > { %v6356_v40 = vmul.f32 0.35355338, %v1456_v39  ;;  %v4549_v41 = vpop.f32.mrb[13].mxu1 }
 0x419   : > { %v2232_v42 = vsel %vm2216_vm4, %v6356_v40, -inf }
 0x41a   : > { %2233 = vmax.xlane.f32.xlu0 %v2232_v42  ;;  %v1604_v43 = vpop.f32.mrb[14].mxu1 }
 0x41b   : > { %v1530_v44 = vpop.f32.mrb[10].mxu0  ;;  %v6360_v45 = vmul.f32 0.35355338, %v1604_v43  ;;  %v4559_v46 = vpop.f32.mrb[15].mxu1 }
 0x41c   : > { %v6362_v47 = vmul.f32 0.35355338, %v1530_v44  ;;  %v4554_v48 = vpop.f32.mrb[11].mxu0 }
 0x41d   : > { %v2238_v49 = vsel %vm2216_vm4, %v6360_v45, -inf }
 0x41e   : > { %v1752_v50 = vpop.f32.mrb[16].mxu1  ;;  %2239 = vmax.xlane.f32.xlu0 %v2238_v49  ;;  %v2235_v51 = vsel %vm2216_vm4, %v6362_v47, -inf }
 0x41f   : > { %v6368_v56 = vmul.f32 0.35355338, %v1752_v50  ;;  %2236 = vmax.xlane.f32.xlu1 %v2235_v51  ;;  %v1678_v57 = vpop.f32.mrb[12].mxu0  ;;  %v4569_v58 = vpop.f32.mrb[17].mxu1 }
 0x420   : > { %v6370_v59 = vmul.f32 0.35355338, %v1678_v57  ;;  %v4564_v60 = vpop.f32.mrb[13].mxu0  ;;  %v2219_v35 = vpop.xlane.xlu0 %2218 }
 0x421   : > { %v2244_v61 = vsel %vm2216_vm4, %v6368_v56, -inf  ;;  %v2265_v42 = vsub.f32 %v6336_v18, %v2219_v35 }
 0x422   : > { %v1900_v62 = vpop.f32.mrb[18].mxu1  ;;  %2245 = vmax.xlane.f32.xlu0 %v2244_v61  ;;  %v2241_v63 = vsel %vm2216_vm4, %v6370_v59, -inf }
 0x423   : > { %v6376_v0 = vmul.f32 0.35355338, %v1900_v62  ;;  %2242 = vmax.xlane.f32.xlu1 %v2241_v63  ;;  %v1826_v2 = vpop.f32.mrb[14].mxu0  ;;  %v4579_v3 = vpop.f32.mrb[19].mxu1 }
 0x424   : > { %v6378_v4 = vmul.f32 0.35355338, %v1826_v2  ;;  %v4574_v5 = vpop.f32.mrb[15].mxu0  ;;  %v2222_v39 = vpop.xlane.xlu1 %2221 }
 0x425   : > { %v2250_v6 = vsel %vm2216_vm4, %v6376_v0, -inf  ;;  %v2266_v41 = vsub.f32 %v6340_v22, %v2222_v39 }
 0x426   : > { %v2048_v7 = vpop.f32.mrb[20].mxu1  ;;  %2251 = vmax.xlane.f32.xlu0 %v2250_v6  ;;  %v2247_v8 = vsel %vm2216_vm4, %v6378_v4, -inf }
 0x427   : > { %v6384_v9 = vmul.f32 0.35355338, %v2048_v7  ;;  %2248 = vmax.xlane.f32.xlu1 %v2247_v8  ;;  %v1974_v10 = vpop.f32.mrb[16].mxu0  ;;  %v4589_v11 = vpop.f32.mrb[21].mxu1  ;;  %v2283_v44 = vmul.f32 1.442695, %v2266_v41 }
 0x428   : > { %v6386_v12 = vmul.f32 0.35355338, %v1974_v10  ;;  %v4584_v13 = vpop.f32.mrb[17].mxu0  ;;  %v2225_v38 = vpop.xlane.xlu0 %2224 }
 0x429   : > { %v2256_v14 = vsel %vm2216_vm4, %v6384_v9, -inf  ;;  %v2267_v48 = vsub.f32 %v6344_v28, %v2225_v38  ;;  %4936 = vpow2.f32 %v2283_v44 }
 0x42a   : > { %v2196_v15 = vpop.f32.mrb[22].mxu1  ;;  %2257 = vmax.xlane.f32.xlu0 %v2256_v14  ;;  %v2253_v16 = vsel %vm2216_vm4, %v6386_v12, -inf }
 0x42b   : > { %v6392_v17 = vmul.f32 0.35355338, %v2196_v15  ;;  %2254 = vmax.xlane.f32.xlu1 %v2253_v16  ;;  %v2122_v19 = vpop.f32.mrb[18].mxu0  ;;  %v4599_v20 = vpop.f32.mrb[23].mxu1  ;;  %v2285_v50 = vmul.f32 1.442695, %v2267_v48 }
 0x42c   : > { %v6394_v21 = vmul.f32 0.35355338, %v2122_v19  ;;  %v4594_v23 = vpop.f32.mrb[19].mxu0  ;;  %v2228_v43 = vpop.xlane.xlu0 %2227 }
 0x42d   : > { %v2262_v24 = vsel %vm2216_vm4, %v6392_v17, -inf  ;;  %v2268_v46 = vsub.f32 %v6348_v32, %v2228_v43 }
 0x42e   : > { %2263 = vmax.xlane.f32.xlu0 %v2262_v24  ;;  %v2259_v26 = vsel %vm2216_vm4, %v6394_v21, -inf }
 0x42f   : > { %2260 = vmax.xlane.f32.xlu1 %v2259_v26  ;;  %v2287_v49 = vmul.f32 1.442695, %v2268_v46 }
 0x440   : > { %1005 = vrot.lane.b32.xlu1 %v6266_v55, %s5591_s19 }
 0x444   : > { %1009 = vrot.lane.b32.xlu1 %v6256_v54, %s5592_s20  ;;  %1003 = vrot.lane.b32.xlu0 %v6250_v53, %s5591_s19  ;;  %v2281_v54 = vmul.f32 1.442695, %v2265_v42  ;;  %s6668_s19 = scalar_lea.hbm %s6801_s23, %s4411_s29 }
 0x446   : > { %4938 = vpow2.f32 %v2281_v54 }
 0x447   : > { %4940 = vpow2.f32 %v2287_v49 }
 0x448   : > { %1007 = vrot.lane.b32.xlu0 %v6245_v52, %s5592_s20  ;;  %4942 = vpow2.f32 %v2285_v50  ;;  %v6424_v52 = vpop.eup %4936 }
 0x449   : > { %v2316_v18 = vsel %vm2216_vm4, %v6424_v52, 0.0 }
 0x450   : > { %v6426_v51 = vpop.eup %4938 }
 0x451   : > { %v6430_v22 = vpop.eup %4940  ;;  %v2313_v32 = vsel %vm2216_vm4, %v6426_v51, 0.0 }
 0x452   : > { %v6434_v28 = vpop.eup %4942  ;;  %v2322_v57 = vsel %vm2216_vm4, %v6430_v22, 0.0 }
 0x453   : > { %v2319_v58 = vsel %vm2216_vm4, %v6434_v28, 0.0 }
 0x467   : > { %2317 = vadd.xlane.f32.xlu0 %v2316_v18 }
 0x468   : > { %2314 = vadd.xlane.f32.xlu1 %v2313_v32 }
 0x46b   : > { %2323 = vadd.xlane.f32.xlu0 %v2322_v57 }
 0x46c   : > { %2320 = vadd.xlane.f32.xlu1 %v2319_v58 }
 0x493   : > { %v2231_v60 = vpop.xlane.xlu1 %2230 }
 0x494   : > { %v2269_v61 = vsub.f32 %v6352_v36, %v2231_v60 }
 0x496   : > { %v2289_v62 = vmul.f32 1.442695, %v2269_v61 }
 0x498   : > { %4944 = vpow2.f32 %v2289_v62 }
 0x4a2   : > { %v6441_v63 = vpop.eup %4944 }
 0x4a3   : > { %v2325_v2 = vsel %vm2216_vm4, %v6441_v63, 0.0 }
 0x4a4   : > { %2326 = vadd.xlane.f32.xlu1 %v2325_v2 }
 0x4a7   : > { %v2234_v3 = vpop.xlane.xlu0 %2233 }
 0x4a8   : > { %v2270_v5 = vsub.f32 %v6356_v40, %v2234_v3 }
 0x4aa   : > { %v2291_v6 = vmul.f32 1.442695, %v2270_v5 }
 0x4ab   : > { %v2240_v7 = vpop.xlane.xlu0 %2239 }
 0x4ac   : > { %4946 = vpow2.f32 %v2291_v6  ;;  %v2272_v8 = vsub.f32 %v6360_v45, %v2240_v7  ;;  %v2237_v10 = vpop.xlane.xlu1 %2236 }
 0x4ad   : > { %v2271_v11 = vsub.f32 %v6362_v47, %v2237_v10 }
 0x4ae   : > { %v2295_v36 = vmul.f32 1.442695, %v2272_v8 }
 0x4af   : > { %v2293_v13 = vmul.f32 1.442695, %v2271_v11  ;;  %v2246_v14 = vpop.xlane.xlu0 %2245 }
 0x4b0   : > { %4948 = vpow2.f32 %v2295_v36  ;;  %v2274_v15 = vsub.f32 %v6368_v56, %v2246_v14  ;;  %v2243_v16 = vpop.xlane.xlu1 %2242 }
 0x4b1   : > { %4950 = vpow2.f32 %v2293_v13  ;;  %v2273_v19 = vsub.f32 %v6370_v59, %v2243_v16 }
 0x4b2   : > { %v2299_v20 = vmul.f32 1.442695, %v2274_v15 }
 0x4b3   : > { %v2297_v40 = vmul.f32 1.442695, %v2273_v19  ;;  %v2252_v23 = vpop.xlane.xlu0 %2251 }
 0x4b4   : > { %4952 = vpow2.f32 %v2299_v20  ;;  %v2276_v24 = vsub.f32 %v6376_v0, %v2252_v23  ;;  %v2249_v45 = vpop.xlane.xlu1 %2248 }
 0x4b5   : > { %4954 = vpow2.f32 %v2297_v40  ;;  %v2275_v47 = vsub.f32 %v6378_v4, %v2249_v45 }
 0x4b6   : > { %v6452_v26 = vpop.eup %4946  ;;  %v2303_v35 = vmul.f32 1.442695, %v2276_v24 }
 0x4b7   : > { %v2301_v38 = vmul.f32 1.442695, %v2275_v47  ;;  %v2258_v39 = vpop.xlane.xlu0 %2257  ;;  %v2328_v56 = vsel %vm2216_vm4, %v6452_v26, 0.0 }
 0x4b8   : > { %4956 = vpow2.f32 %v2303_v35  ;;  %v2278_v59 = vsub.f32 %v6384_v9, %v2258_v39  ;;  %2329 = vadd.xlane.f32.xlu0 %v2328_v56  ;;  %v2255_v41 = vpop.xlane.xlu1 %2254 }
 0x4b9   : > { %4958 = vpow2.f32 %v2301_v38  ;;  %v2277_v0 = vsub.f32 %v6386_v12, %v2255_v41 }
 0x4ba   : > { %v6458_v42 = vpop.eup %4948  ;;  %v2307_v43 = vmul.f32 1.442695, %v2278_v59 }
 0x4bb   : > { %v6460_v4 = vpop.eup %4950  ;;  %v2305_v44 = vmul.f32 1.442695, %v2277_v0  ;;  %v2264_v46 = vpop.xlane.xlu0 %2263  ;;  %v2334_v54 = vsel %vm2216_vm4, %v6458_v42, 0.0 }
 0x4bc   : > { %4960 = vpow2.f32 %v2307_v43  ;;  %v2280_v48 = vsub.f32 %v6392_v17, %v2264_v46  ;;  %v2261_v49 = vpop.xlane.xlu1 %2260  ;;  %2335 = vadd.xlane.f32.xlu0 %v2334_v54  ;;  %v2331_v9 = vsel %vm2216_vm4, %v6460_v4, 0.0 }
 0x4bd   : > { %4962 = vpow2.f32 %v2305_v44  ;;  %v2279_v12 = vsub.f32 %v6394_v21, %v2261_v49  ;;  %2332 = vadd.xlane.f32.xlu1 %v2331_v9 }
 0x4be   : > { %v6468_v50 = vpop.eup %4952  ;;  %v2311_v18 = vmul.f32 1.442695, %v2280_v48 }
 0x4bf   : > { %v6470_v32 = vpop.eup %4954  ;;  %v2309_v57 = vmul.f32 1.442695, %v2279_v12  ;;  %v2340_v58 = vsel %vm2216_vm4, %v6468_v50, 0.0  ;;  %v6504_v36 = vpop.permute.xlu0 %1003 }
 0x4c0   : > { %4964 = vpow2.f32 %v2311_v18  ;;  %2341 = vadd.xlane.f32.xlu0 %v2340_v58  ;;  %v2337_v17 = vsel %vm2216_vm4, %v6470_v32, 0.0  ;;  %v6506_v13 = vpop.permute.xlu1 %1005 }
 0x4c1   : > { %4966 = vpow2.f32 %v2309_v57  ;;  %2338 = vadd.xlane.f32.xlu1 %v2337_v17 }
 0x4c2   : > { %v6476_v60 = vpop.eup %4956 }
 0x4c3   : > { %v6478_v21 = vpop.eup %4958  ;;  %v2346_v61 = vsel %vm2216_vm4, %v6476_v60, 0.0  ;;  %v6508_v14 = vpop.permute.xlu0 %1007 }
 0x4c4   : > { %2347 = vadd.xlane.f32.xlu0 %v2346_v61  ;;  %v2343_v62 = vsel %vm2216_vm4, %v6478_v21, 0.0  ;;  %v6510_v15 = vpop.permute.xlu1 %1009 }
 0x4c5   : > { %2344 = vadd.xlane.f32.xlu1 %v2343_v62 }
 0x4c6   : > { %v6484_v2 = vpop.eup %4960 }
 0x4c7   : > { %v6486_v3 = vpop.eup %4962  ;;  %v2352_v5 = vsel %vm2216_vm4, %v6484_v2, 0.0 }
 0x4c8   : > { %2353 = vadd.xlane.f32.xlu0 %v2352_v5  ;;  %v2349_v6 = vsel %vm2216_vm4, %v6486_v3, 0.0 }
 0x4c9   : > { %2350 = vadd.xlane.f32.xlu1 %v2349_v6 }
 0x4ca   : > { %v6492_v7 = vpop.eup %4964 }
 0x4cb   : > { %v6494_v8 = vpop.eup %4966  ;;  %v2358_v10 = vsel %vm2216_vm4, %v6492_v7, 0.0 }
 0x4cc   : > { %2359 = vadd.xlane.f32.xlu0 %v2358_v10  ;;  %v2355_v11 = vsel %vm2216_vm4, %v6494_v8, 0.0 }
 0x4cd   : > { %2356 = vadd.xlane.f32.xlu1 %v2355_v11 }
 0x4de   : > { %1013 = vrot.lane.b32.xlu1 %v6266_v55, %s5592_s20 }
 0x4e2   : > { %1011 = vrot.lane.b32.xlu0 %v6250_v53, %s5592_s20  ;;  %s5468_s20 = scalar_lea.vmem %s6662_s17, 256 }
 0x4e3   : > { %p5469_p11 = scmp.ne.s32.totalorder %s6662_s17, %s5468_s20 }
 0x4e5   : > { %p5470_p5 = pnand %p5469_p11, %p6802_p3 }
 0x4e7   : > { %p5471_p9 = pneg %p5470_p5 }
 0x4f4   : > { %v2318_v16 = vpop.xlane.xlu0 %2317 }
 0x4f5   : > { %4968 = vrcp.f32 %v2318_v16  ;;  %v2315_v19 = vpop.xlane.xlu1 %2314 }
 0x4f6   : > { %4970 = vrcp.f32 %v2315_v19 }
 0x4f8   : > { %v2324_v20 = vpop.xlane.xlu0 %2323 }
 0x4f9   : > { %4972 = vrcp.f32 %v2324_v20  ;;  %v2321_v40 = vpop.xlane.xlu1 %2320 }
 0x4fa   : > { %4974 = vrcp.f32 %v2321_v40 }
 0x4ff   : > { %v4969_v23 = vpop.eup %4968 }
 0x500   : > { %v4971_v24 = vpop.eup %4970  ;;  %v2378_v45 = vmul.f32 %v4969_v23, %v6424_v52 }
 0x501   : > { %v2377_v47 = vmul.f32 %v4971_v24, %v6426_v51 }
 0x502   : > { %4608 = vmatmul.mubr.msk.f32.vlgmr.msra.gmra.mrb[24].mxu1 %vm2393_vm5, %v2378_v45 }
 0x503   : > { %v4973_v35 = vpop.eup %4972  ;;  %4603 = vmatmul.mubr.msk.f32.vlgmr.msra.gmra.mrb[20].mxu0 %vm2393_vm5, %v2377_v47  ;;  %4616 = vmatpush3.msk.msra.mxu1 %vm2397_vm3, %v6266_v55 }
 0x504   : > { %v4975_v38 = vpop.eup %4974  ;;  %v2380_v39 = vmul.f32 %v4973_v35, %v6430_v22  ;;  %4611 = vmatpush3.msk.msra.mxu0 %vm2397_vm3, %v6250_v53  ;;  %4612 = vmatprep.mubr.msk.f32.mxu0 %vm5589_vm0, %v5588_v1 }
 0x505   : > { %v2379_v52 = vmul.f32 %v4975_v38, %v6434_v28  ;;  %4617 = vmatprep.mubr.msk.f32.mxu1 %vm5589_vm0, %v5588_v1  ;;  %4620 = vmatprep.subr.mxu0 %v5588_v1  ;;  %v3647_v38 = vld [vmem:[#allocation9] sm:$0xff] }
 0x506   : > { %4625 = vmatprep.subr.mxu1 %v5588_v1  ;;  %4618 = vmatmul.mubr.msk.f32.vlgmr.msra.gmra.mrb[26].mxu1 %vm2393_vm5, %v2380_v39  ;;  %v3648_v39 = vld [vmem:[#allocation9 + $0x8] sm:$0xff] }
 0x507   : > { %4613 = vmatmul.mubr.msk.f32.vlgmr.msra.gmra.mrb[22].mxu0 %vm2393_vm5, %v2379_v52  ;;  %4626 = vmatpush3.msk.msra.mxu1 %vm2397_vm3, %v6408_v33 }
 0x508   : > { %4621 = vmatpush3.msk.msra.mxu0 %vm2397_vm3, %v6400_v29  ;;  %4622 = vmatprep.mubr.msk.f32.mxu0 %vm5589_vm0, %v5588_v1 }
 0x509   : > { %4630 = vmatprep.subr.mxu0 %v5588_v1  ;;  %4627 = vmatprep.mubr.msk.f32.mxu1 %vm5589_vm0, %v5588_v1 }
 0x50a   : > { %4635 = vmatprep.subr.mxu1 %v5588_v1 }
 0x531   : > { %v2327_v53 = vpop.xlane.xlu1 %2326 }
 0x532   : > { %4976 = vrcp.f32 %v2327_v53 }
 0x53c   : > { %v4977_v55 = vpop.eup %4976 }
 0x53d   : > { %v2381_v51 = vmul.f32 %v4977_v55, %v6441_v63  ;;  %v3652_v55 = vpack.c.bf16 %v3648_v39, %v3647_v38 }
 0x53f   : > { %4623 = vmatmul.mubr.msk.f32.vlgmr.msra.gmra.mrb[24].mxu0 %vm2393_vm5, %v2381_v51 }
 0x540   : > { %4631 = vmatpush3.msk.msra.mxu0 %vm2397_vm3, %v6404_v31  ;;  %4632 = vmatprep.mubr.msk.f32.mxu0 %vm5589_vm0, %v5588_v1 }
 0x541   : > { %4640 = vmatprep.subr.mxu0 %v5588_v1 }
 0x545   : > { %v2330_v29 = vpop.xlane.xlu0 %2329 }
 0x546   : > { %4978 = vrcp.f32 %v2330_v29 }
 0x549   : > { %v2336_v33 = vpop.xlane.xlu0 %2335 }
 0x54a   : > { %4980 = vrcp.f32 %v2336_v33  ;;  %v2333_v22 = vpop.xlane.xlu1 %2332 }
 0x54b   : > { %4982 = vrcp.f32 %v2333_v22 }
 0x54d   : > { %v2342_v28 = vpop.xlane.xlu0 %2341 }
 0x54e   : > { %4984 = vrcp.f32 %v2342_v28  ;;  %v2339_v56 = vpop.xlane.xlu1 %2338 }
 0x54f   : > { %4986 = vrcp.f32 %v2339_v56 }
 0x550   : > { %v4979_v63 = vpop.eup %4978 }
 0x551   : > { %v2382_v59 = vmul.f32 %v4979_v63, %v6452_v26  ;;  %v2348_v41 = vpop.xlane.xlu0 %2347 }
 0x552   : > { %4988 = vrcp.f32 %v2348_v41  ;;  %v2345_v31 = vpop.xlane.xlu1 %2344  ;;  %v3650_v41 = vld [vmem:[#allocation9 + $0x18] sm:$0xff] }
 0x553   : > { %4990 = vrcp.f32 %v2345_v31  ;;  %4628 = vmatmul.mubr.msk.f32.vlgmr.msra.gmra.mrb[28].mxu1 %vm2393_vm5, %v2382_v59  ;;  %v3649_v59 = vld [vmem:[#allocation9 + $0x10] sm:$0xff] }
 0x554   : > { %v4981_v0 = vpop.eup %4980  ;;  %4636 = vmatpush3.msk.msra.mxu1 %vm2397_vm3, %v6416_v37  ;;  %4637 = vmatprep.mubr.msk.f32.mxu1 %vm5589_vm0, %v5588_v1 }
 0x555   : > { %v4983_v43 = vpop.eup %4982  ;;  %v2384_v44 = vmul.f32 %v4981_v0, %v6458_v42  ;;  %v2354_v46 = vpop.xlane.xlu0 %2353  ;;  %4645 = vmatprep.subr.mxu1 %v5588_v1 }
 0x556   : > { %v2383_v26 = vmul.f32 %v4983_v43, %v6460_v4  ;;  %4992 = vrcp.f32 %v2354_v46  ;;  %v2351_v54 = vpop.xlane.xlu1 %2350  ;;  %v3653_v43 = vpack.c.bf16 %v3650_v41, %v3649_v59  ;;  %v3812_v41 = vld [vmem:[#allocation18] sm:$0xff] }
 0x557   : > { %4994 = vrcp.f32 %v2351_v54  ;;  %4638 = vmatmul.mubr.msk.f32.vlgmr.msra.gmra.mrb[30].mxu1 %vm2393_vm5, %v2384_v44 }
 0x558   : > { %v4985_v48 = vpop.eup %4984  ;;  %4633 = vmatmul.mubr.msk.f32.vlgmr.msra.gmra.mrb[26].mxu0 %vm2393_vm5, %v2383_v26  ;;  %4646 = vmatpush3.msk.msra.mxu1 %vm2397_vm3, %v6410_v34 }
 0x559   : > { %v4987_v37 = vpop.eup %4986  ;;  %v2386_v49 = vmul.f32 %v4985_v48, %v6468_v50  ;;  %4641 = vmatpush3.msk.msra.mxu0 %vm2397_vm3, %v6402_v30  ;;  %v2360_v42 = vpop.xlane.xlu0 %2359  ;;  %4642 = vmatprep.mubr.msk.f32.mxu0 %vm5589_vm0, %v5588_v1 }
 0x55a   : > { %v2385_v4 = vmul.f32 %v4987_v37, %v6470_v32  ;;  %4996 = vrcp.f32 %v2360_v42  ;;  %v2357_v9 = vpop.xlane.xlu1 %2356  ;;  %4647 = vmatprep.mubr.msk.f32.mxu1 %vm5589_vm0, %v5588_v1  ;;  %4650 = vmatprep.subr.mxu0 %v5588_v1 }
 0x55b   : > { %4998 = vrcp.f32 %v2357_v9  ;;  %4655 = vmatprep.subr.mxu1 %v5588_v1  ;;  %4648 = vmatmul.mubr.msk.f32.vlgmr.msra.gmra.mrb[32].mxu1 %vm2393_vm5, %v2386_v49 }
 0x55c   : > { %v4989_v34 = vpop.eup %4988  ;;  %4643 = vmatmul.mubr.msk.f32.vlgmr.msra.gmra.mrb[28].mxu0 %vm2393_vm5, %v2385_v4  ;;  %4656 = vmatpush3.msk.msra.mxu1 %vm2397_vm3, %v6506_v13 }
 0x55d   : > { %v4991_v30 = vpop.eup %4990  ;;  %v2388_v12 = vmul.f32 %v4989_v34, %v6476_v60  ;;  %4651 = vmatpush3.msk.msra.mxu0 %vm2397_vm3, %v6504_v36  ;;  %4652 = vmatprep.mubr.msk.f32.mxu0 %vm5589_vm0, %v5588_v1 }
 0x55e   : > { %v2387_v50 = vmul.f32 %v4991_v30, %v6478_v21  ;;  %4657 = vmatprep.mubr.msk.f32.mxu1 %vm5589_vm0, %v5588_v1  ;;  %4660 = vmatprep.subr.mxu0 %v5588_v1  ;;  %v1014_v17 = vpop.permute.xlu1 %1013  ;;  %v1012_v21 = vpop.permute.xlu0 %1011 }
 0x55f   : > { %4665 = vmatprep.subr.mxu1 %v5588_v1  ;;  %4658 = vmatmul.mubr.msk.f32.vlgmr.msra.gmra.mrb[34].mxu1 %vm2393_vm5, %v2388_v12 }
 0x560   : > { %v4993_v18 = vpop.eup %4992  ;;  %4653 = vmatmul.mubr.msk.f32.vlgmr.msra.gmra.mrb[30].mxu0 %vm2393_vm5, %v2387_v50  ;;  %4666 = vmatpush3.msk.msra.mxu1 %vm2397_vm3, %v6510_v15 }
 0x561   : > { %v4995_v32 = vpop.eup %4994  ;;  %v2390_v57 = vmul.f32 %v4993_v18, %v6484_v2  ;;  %4661 = vmatpush3.msk.msra.mxu0 %vm2397_vm3, %v6508_v14  ;;  %4662 = vmatprep.mubr.msk.f32.mxu0 %vm5589_vm0, %v5588_v1 }
 0x562   : > { %v2389_v58 = vmul.f32 %v4995_v32, %v6486_v3  ;;  %4667 = vmatprep.mubr.msk.f32.mxu1 %vm5589_vm0, %v5588_v1  ;;  %4670 = vmatprep.subr.mxu0 %v5588_v1 }
 0x563   : > { %4675 = vmatprep.subr.mxu1 %v5588_v1  ;;  %4668 = vmatmul.mubr.msk.f32.vlgmr.msra.gmra.mrb[36].mxu1 %vm2393_vm5, %v2390_v57 }
 0x564   : > { %v4997_v60 = vpop.eup %4996  ;;  %4663 = vmatmul.mubr.msk.f32.vlgmr.msra.gmra.mrb[32].mxu0 %vm2393_vm5, %v2389_v58  ;;  %4676 = vmatpush3.msk.msra.mxu1 %vm2397_vm3, %v1014_v17 }
 0x565   : > { %v4999_v61 = vpop.eup %4998  ;;  %v2392_v62 = vmul.f32 %v4997_v60, %v6492_v7  ;;  %4671 = vmatpush3.msk.msra.mxu0 %vm2397_vm3, %v1012_v21  ;;  %4672 = vmatprep.mubr.msk.f32.mxu0 %vm5589_vm0, %v5588_v1 }
 0x566   : > { %v2391_v2 = vmul.f32 %v4999_v61, %v6494_v8  ;;  %4677 = vmatprep.mubr.msk.f32.mxu1 %vm5589_vm0, %v5588_v1  ;;  %4680 = vmatprep.subr.bf16.mxu0 %v5588_v1 }
 0x567   : > { %4678 = vmatmul.mubr.msk.f32.vlgmr.msra.gmra.mrb[38].mxu1 %vm2393_vm5, %v2392_v62  ;;  %4688 = vmatprep.subr.bf16.mxu1 %v5588_v1 }
 0x568   : > { %4673 = vmatmul.mubr.msk.f32.vlgmr.msra.gmra.mrb[34].mxu0 %vm2393_vm5, %v2391_v2  ;;  %4692 = vmatprep.mubr.msk.bf16.mxu1 %vm5589_vm0, %v5588_v1 }
 0x569   : > { %4684 = vmatprep.mubr.msk.bf16.mxu0 %vm5589_vm0, %v5588_v1  ;;  %4681 = vmatpush3.bf16.msra.mxu0 %v3652_v55 }
 0x56a   : > { %4682 = vmatprep.subr.bf16.mxu0 %v5588_v1 }
 0x56d   : > { %4683 = vmatpush3.bf16.msra.mxu0 %v3653_v43 }
 0x56e   : > { %4696 = vmatprep.subr.bf16.mxu0 %v5588_v1 }
 0x5d5   : > { %v6616_v3 = vpop.f32.mrb[24].mxu1 }
 0x5d6   : > { %v6618_v5 = vpop.f32.mrb[20].mxu0  ;;  %v4609_v6 = vpop.f32.mrb[25].mxu1 }
 0x5d7   : > { %v3599_v7 = vcombine.low %v6618_v5, %v6616_v3  ;;  %v4604_v8 = vpop.f32.mrb[21].mxu0 }
 0x5d9   : > { %v6622_v10 = vpop.f32.mrb[26].mxu1 }
 0x5da   : > { %v6624_v11 = vpop.f32.mrb[22].mxu0  ;;  %v4619_v36 = vpop.f32.mrb[27].mxu1 }
 0x5db   : > { %v3600_v13 = vcombine.low %v6624_v11, %v6622_v10  ;;  %v4614_v14 = vpop.f32.mrb[23].mxu0  ;;  %v4391_v36 = vld [vmem:[#allocation11] ss:$0 sm:$0xff] }
 0x612   : > { %v2766_v15 = vpop.f32.mrb[24].mxu0 }
 0x613   : > { %v4624_v16 = vpop.f32.mrb[25].mxu0 }
 0x614   : > { %v5016_v16 = vld [vmem:[%s6125_s26] sm:$0xff] }
 0x626   : > { %v2841_v19 = vpop.f32.mrb[28].mxu1 }
 0x627   : > { %v3607_v20 = vcombine.low %v2766_v15, %v2841_v19  ;;  %v4629_v40 = vpop.f32.mrb[29].mxu1 }
 0x628   : > { %v5017_v40 = vld [vmem:[%s6125_s26 + $0x8] sm:$0xff] }
 0x62a   : > { %v2991_v23 = vpop.f32.mrb[30].mxu1 }
 0x62b   : > { %v2916_v24 = vpop.f32.mrb[26].mxu0  ;;  %v4639_v45 = vpop.f32.mrb[31].mxu1 }
 0x62c   : > { %v3608_v47 = vcombine.low %v2916_v24, %v2991_v23  ;;  %v4634_v35 = vpop.f32.mrb[27].mxu0 }
 0x62e   : > { %v4919_v52 = vpack.i.bf16 %v3608_v47, %v3607_v20  ;;  %v3141_v53 = vpop.f32.mrb[32].mxu1 }
 0x62f   : > { %v3066_v51 = vpop.f32.mrb[28].mxu0  ;;  %v4649_v29 = vpop.f32.mrb[33].mxu1 }
 0x630   : > { %v3619_v33 = vcombine.low %v3066_v51, %v3141_v53  ;;  %4920 = vrot.lane.b32.xlu0 %v4919_v52, %s5593_s30  ;;  %v4644_v22 = vpop.f32.mrb[29].mxu0 }
 0x631   : > { %v3753_v22 = vld [vmem:[#allocation15 + $0x8] sm:$0xff] }
 0x632   : > { %v3291_v28 = vpop.f32.mrb[34].mxu1 }
 0x633   : > { %v3216_v56 = vpop.f32.mrb[30].mxu0  ;;  %v4659_v63 = vpop.f32.mrb[35].mxu1 }
 0x634   : > { %v3620_v31 = vcombine.low %v3216_v56, %v3291_v28  ;;  %v4654_v0 = vpop.f32.mrb[31].mxu0  ;;  %v3754_v56 = vld [vmem:[#allocation15 + $0x10] sm:$0xff]  ;;  %v3755_v63 = vld [vmem:[#allocation15 + $0x18] sm:$0xff] }
 0x635   : > { %v3758_v59 = vpack.c.bf16 %v3755_v63, %v3754_v56  ;;  %v3814_v0 = vld [vmem:[#allocation18 + $0x10] sm:$0xff] }
 0x636   : > { %v4924_v44 = vpack.i.bf16 %v3620_v31, %v3619_v33  ;;  %v3441_v46 = vpop.f32.mrb[36].mxu1  ;;  %v3752_v33 = vld [vmem:[#allocation15] sm:$0xff]  ;;  %v3813_v31 = vld [vmem:[#allocation18 + $0x8] sm:$0xff] }
 0x637   : > { %v3366_v26 = vpop.f32.mrb[32].mxu0  ;;  %v4669_v54 = vpop.f32.mrb[37].mxu1  ;;  %v3757_v28 = vpack.c.bf16 %v3753_v22, %v3752_v33  ;;  %v3821_v43 = vpack.c.bf16 %v3813_v31, %v3812_v41  ;;  %v3924_v63 = vld [vmem:[#allocation24 + $0x8] sm:$0xff]  ;;  %v3923_v31 = vld [vmem:[#allocation24] sm:$0xff] }
 0x638   : > { %v3631_v48 = vcombine.low %v3366_v26, %v3441_v46  ;;  %4925 = vrot.lane.b32.xlu1 %v4924_v44, %s5594_s18  ;;  %v4664_v37 = vpop.f32.mrb[33].mxu0  ;;  %v3815_v44 = vld [vmem:[#allocation18 + $0x18] sm:$0xff]  ;;  %s5472_s18 = sshll.u32 %s5597_s27, 4  ;;  %s5473_s18 = int_to_ptr.vmem [resolvable:$false] %s5472_s18 }
 0x639   : > { %4689 = vmatpush3.bf16.msra.mxu1 %v3757_v28  ;;  %v3822_v46 = vpack.c.bf16 %v3815_v44, %v3814_v0  ;;  %v3925_v0 = vld [vmem:[#allocation24 + $0x10] sm:$0xff]  ;;  %v3928_v44 = vld [vmem:[#allocation24 + $0x28] sm:$0xff]  ;;  %p5475_p7 = scmp.lt.s32.totalorder %s6662_s17, %s5473_s18 }
 0x63a   : > { %v3591_v49 = vpop.f32.mrb[38].mxu1  ;;  %4690 = vmatprep.subr.bf16.mxu1 %v5588_v1 }
 0x63b   : > { %v3516_v42 = vpop.f32.mrb[34].mxu0  ;;  %v4679_v4 = vpop.f32.mrb[39].mxu1 }
 0x63c   : > { %v3632_v9 = vcombine.low %v3516_v42, %v3591_v49  ;;  %v4674_v34 = vpop.f32.mrb[35].mxu0 }
 0x63d   : > { %4691 = vmatpush3.bf16.msra.mxu1 %v3758_v59  ;;  %v3926_v59 = vld [vmem:[#allocation24 + $0x18] sm:$0xff] }
 0x63e   : > { %v4929_v30 = vpack.i.bf16 %v3632_v9, %v3631_v48  ;;  %v4393_v9 = vld [vmem:[#allocation12] ss:$0 sm:$0xff]  ;;  %v3933_v41 = vpack.c.bf16 %v3926_v59, %v3924_v63 }
 0x640   : > { %4930 = vrot.lane.b32.xlu0 %v4929_v30, %s5595_s0  ;;  %3951 = vmatprep.subr.bf16.mxu1 %v3933_v41  ;;  %s5474_s0 = scalar_lea.vmem %s5473_s18, 512 }
 0x641   : > { %p5476_p4 = scmp.lt.s32.totalorder %s5474_s0, %s5468_s20 }
 0x643   : > { %p5477_p12 = por %p5476_p4, %p5475_p7 }
 0x645   : > { %p5478_p1 = pnand %p5477_p12, %p5471_p9 }
 0x6a2   : > { %v4921_v12 = vpop.permute.xlu0 %4920 }
 0x6a3   : > { %v4923_v18 = vunpack.i.h.bf16 %v4921_v12  ;;  %v4922_v32 = vunpack.i.l.bf16 %v4921_v12 }
 0x6a5   : > { %v3640_v60 = vsel %vm1015_vm2, %v3600_v13, %v4923_v18  ;;  %v3639_v21 = vsel %vm1015_vm2, %v3599_v7, %v4922_v32  ;;  %v4394_v18 = vld [vmem:[#allocation14] ss:$0 sm:$0xff] }
 0x6aa   : > { %v4926_v50 = vpop.permute.xlu1 %4925 }
 0x6ab   : > { %v4928_v57 = vunpack.i.h.bf16 %v4926_v50  ;;  %v4927_v58 = vunpack.i.l.bf16 %v4926_v50 }
 0x6ad   : > { %v3643_v2 = vsel %vm3641_vm6, %v3640_v60, %v4928_v57  ;;  %v3642_v6 = vsel %vm3641_vm6, %v3639_v21, %v4927_v58  ;;  %v3816_v60 = vld [vmem:[#allocation18 + $0x20] sm:$0xff]  ;;  %v3817_v21 = vld [vmem:[#allocation18 + $0x28] sm:$0xff] }
 0x6b2   : > { %v4931_v17 = vpop.permute.xlu0 %4930 }
 0x6b3   : > { %v4933_v61 = vunpack.i.h.bf16 %v4931_v17  ;;  %v4932_v62 = vunpack.i.l.bf16 %v4931_v17 }
 0x6b5   : > { %v3646_v8 = vsel %vm3644_vm7, %v3643_v2, %v4933_v61  ;;  %v3645_v10 = vsel %vm3644_vm7, %v3642_v6, %v4932_v62  ;;  %v3823_v61 = vpack.c.bf16 %v3817_v21, %v3816_v60  ;;  %v3818_v62 = vld [vmem:[#allocation18 + $0x30] sm:$0xff]  ;;  %v3819_v2 = vld [vmem:[#allocation18 + $0x38] sm:$0xff]  ;;  %v4400_v60 = vld [vmem:[#allocation23] ss:$0 sm:$0xff] }
 0x6b6   : > { %v3651_v11 = vpack.c.bf16 %v3646_v8, %v3645_v10  ;;  %v3824_v6 = vpack.c.bf16 %v3819_v2, %v3818_v62  ;;  %v4395_v8 = vld [vmem:[#allocation17] ss:$0 sm:$0xff] }
 0x6b8   : > { %4685 = vmatmul.mubr.msk.bf16.vlgmr.msra.gmra.mrb[36].mxu0 %vm792_vm1, %v3651_v11 }
 0x6b9   : > { %4704 = vmatprep.mubr.msk.bf16.mxu0 %vm5589_vm0, %v5588_v1  ;;  %4697 = vmatpush3.bf16.msra.mxu0 %v3821_v43  ;;  %v3932_v43 = vpack.c.bf16 %v3925_v0, %v3923_v31 }
 0x6ba   : > { %4698 = vmatprep.subr.bf16.mxu0 %v5588_v1 }
 0x6bd   : > { %4699 = vmatpush3.bf16.msra.mxu0 %v3822_v46  ;;  %v3930_v46 = vld [vmem:[#allocation24 + $0x38] sm:$0xff] }
 0x6be   : > { %4700 = vmatprep.subr.bf16.mxu0 %v5588_v1 }
 0x6c1   : > { %4701 = vmatpush3.bf16.msra.mxu0 %v3823_v61 }
 0x6c2   : > { %4702 = vmatprep.subr.bf16.mxu0 %v5588_v1 }
 0x6c5   : > { %4703 = vmatpush3.bf16.msra.mxu0 %v3824_v6  ;;  %v3936_v6 = vld [vmem:[#allocation26] sm:$0x3] }
 0x78b   : > { %v3698_v13 = vpop.f32.mrb[36].mxu0 }
 0x78c   : > { %v3699_v14 = vadd.f32 %v4391_v36, %v3698_v13  ;;  %v4686_v3 = vpop.f32.mrb[37].mxu0 }
 0x78d   : > { %v3701_v5 = vpop.f32.mrb[38].mxu0 }
 0x78e   : > { %v3702_v7 = vadd.f32 %v4391_v36, %v3701_v5  ;;  %v4687_v15 = vpop.f32.mrb[39].mxu0  ;;  %v3705_v19 = vadd.f32 %v5016_v16, %v3699_v14  ;;  %v4397_v16 = vld [vmem:[#allocation20] ss:$0 sm:$0xff] }
 0x790   : > { %v3709_v20 = vsel %vm792_vm1, %v3705_v19, 0.0  ;;  %v3706_v23 = vadd.f32 %v5017_v40, %v3702_v7 }
 0x791   : > { %3710 = vadd.xlane.f32.xlu1 %v3709_v20 }
 0x792   : > { %v3712_v24 = vsel %vm792_vm1, %v3706_v23, 0.0 }
 0x793   : > { %3713 = vadd.xlane.f32.xlu0 %v3712_v24 }
 0x81e   : > { %v3711_v45 = vpop.xlane.xlu1 %3710 }
 0x81f   : > { %v3716_v47 = vmul.f32 0.03125, %v3711_v45 }
 0x820   : > { %v3714_v35 = vpop.xlane.xlu0 %3713 }
 0x821   : > { %v3718_v38 = vsub.f32 %v3705_v19, %v3716_v47  ;;  %v3717_v39 = vmul.f32 0.03125, %v3714_v35 }
 0x823   : > { %v3719_v52 = vsub.f32 %v3706_v23, %v3717_v39  ;;  %v3720_v53 = vmul.f32 %v3718_v38, %v3718_v38 }
 0x825   : > { %v3722_v55 = vsel %vm792_vm1, %v3720_v53, 0.0  ;;  %v3721_v51 = vmul.f32 %v3719_v52, %v3719_v52 }
 0x826   : > { %3723 = vadd.xlane.f32.xlu0 %v3722_v55 }
 0x827   : > { %v3725_v29 = vsel %vm792_vm1, %v3721_v51, 0.0 }
 0x828   : > { %3726 = vadd.xlane.f32.xlu1 %v3725_v29 }
 0x8b3   : > { %v3724_v26 = vpop.xlane.xlu0 %3723 }
 0x8b4   : > { %v3728_v54 = vmul.f32 0.03125, %v3724_v26  ;;  %v3927_v26 = vld [vmem:[#allocation24 + $0x20] sm:$0xff] }
 0x8b5   : > { %v3727_v48 = vpop.xlane.xlu1 %3726 }
 0x8b6   : > { %v3730_v37 = vadd.f32 1e-05, %v3728_v54  ;;  %v3729_v49 = vmul.f32 0.03125, %v3727_v48  ;;  %v3935_v54 = vpack.c.bf16 %v3930_v46, %v3928_v44  ;;  %v3929_v48 = vld [vmem:[#allocation24 + $0x30] sm:$0xff] }
 0x8b8   : > { %5000 = vrsqrt.f32 %v3730_v37  ;;  %v3731_v42 = vadd.f32 1e-05, %v3729_v49  ;;  %v5596_v37 = vmov 0   ;;  %v3934_v49 = vpack.c.bf16 %v3929_v48, %v3927_v26 }
 0x8b9   : > { %4934 = vset.pattern.permute.xlu0 %v5596_v37  ;;  %4935 = vset.pattern.permute.xlu1 %v5596_v37 }
 0x8ba   : > { %5002 = vrsqrt.f32 %v3731_v42 }
 0x8c2   : > { %v5001_v4 = vpop.eup %5000 }
 0x8c3   : > { %v3734_v34 = vmul.f32 %v5001_v4, %v3718_v38 }
 0x8c4   : > { %v5003_v30 = vpop.eup %5002 }
 0x8c5   : > { %v3742_v12 = vmul.f32 %v4393_v9, %v3734_v34  ;;  %v3735_v50 = vmul.f32 %v5003_v30, %v3719_v52 }
 0x8c7   : > { %v3743_v32 = vmul.f32 %v4393_v9, %v3735_v50  ;;  %v3750_v57 = vadd.f32 %v4394_v18, %v3742_v12 }
 0x8c9   : > { %v3751_v58 = vadd.f32 %v4394_v18, %v3743_v32  ;;  %v4399_v18 = vld [vmem:[#allocation21] ss:$0 sm:$0xff] }
 0x8cb   : > { %v3756_v17 = vpack.c.bf16 %v3751_v58, %v3750_v57 }
 0x8cd   : > { %4693 = vmatmul.mubr.msk.bf16.vlgmr.msra.gmra.mrb[40].mxu1 %vm792_vm1, %v3756_v17 }
 0x8ce   : > { %3952 = vmatpush1.bf16.msra.mxu1 %v3932_v43  ;;  %3983 = vmatprep.mubr.bf16.mxu1 %v5596_v37 }
 0x8cf   : > { %3953 = vmatprep.subr.bf16.mxu1 %v3935_v54 }
 0x8d2   : > { %3954 = vmatpush1.bf16.msra.mxu1 %v3934_v49 }
 0x9a0   : > { %v3803_v10 = vpop.f32.mrb[40].mxu1 }
 0x9a1   : > { %v3804_v11 = vadd.f32 %v4395_v8, %v3803_v10  ;;  %v4694_v36 = vpop.f32.mrb[41].mxu1  ;;  %v3998_v10 = vld [vmem:[#allocation27] sm:$0x3] }
 0x9a2   : > { %v3806_v13 = vpop.f32.mrb[42].mxu1 }
 0x9a3   : > { %v3807_v14 = vadd.f32 %v4395_v8, %v3806_v13  ;;  %v4695_v3 = vpop.f32.mrb[43].mxu1  ;;  %v3810_v5 = vmax.f32 %v3804_v11, 0.0  ;;  %v3941_v8 = vrot.slane %v3936_v6, %v6189_v25  ;;  %v3945_v11 = vrot.slane %v3936_v6, %v6194_v27 }
 0x9a5   : > { %v3811_v7 = vmax.f32 %v3807_v14, 0.0  ;;  %v4003_v14 = vrot.slane %v3998_v10, %v6189_v25  ;;  %v4402_v25 = vld [vmem:[#allocation2] ss:$0 sm:$0xff] }
 0x9a7   : > { %v3820_v15 = vpack.c.bf16 %v3811_v7, %v3810_v5  ;;  %v4007_v7 = vrot.slane %v3998_v10, %v6194_v27 }
 0x9a9   : > { %4705 = vmatmul.mubr.msk.bf16.vlgmr.msra.gmra.mrb[40].mxu0 %vm3832_vm8, %v3820_v15 }
 0xa7c   : > { %v3870_v19 = vpop.f32.mrb[40].mxu0 }
 0xa7d   : > { %v3871_v20 = vadd.f32 %v4397_v16, %v3870_v19  ;;  %v4706_v1 = vpop.f32.mrb[41].mxu0 }
 0xa7e   : > { %v3873_v40 = vpop.f32.mrb[42].mxu0 }
 0xa7f   : > { %v3874_v23 = vadd.f32 %v4397_v16, %v3873_v40  ;;  %v4707_v24 = vpop.f32.mrb[43].mxu0  ;;  %v3877_v45 = vadd.f32 %v3871_v20, %v3750_v57 }
 0xa81   : > { %v3881_v47 = vsel %vm792_vm1, %v3877_v45, 0.0  ;;  %v3878_v35 = vadd.f32 %v3874_v23, %v3751_v58 }
 0xa82   : > { %3882 = vadd.xlane.f32.xlu0 %v3881_v47 }
 0xa83   : > { %v3884_v38 = vsel %vm792_vm1, %v3878_v35, 0.0 }
 0xa84   : > { %3885 = vadd.xlane.f32.xlu1 %v3884_v38 }
 0xb0f   : > { %v3883_v39 = vpop.xlane.xlu0 %3882 }
 0xb10   : > { %v3887_v52 = vmul.f32 0.03125, %v3883_v39 }
 0xb11   : > { %v3886_v53 = vpop.xlane.xlu1 %3885 }
 0xb12   : > { %v3889_v55 = vsub.f32 %v3877_v45, %v3887_v52  ;;  %v3888_v51 = vmul.f32 0.03125, %v3886_v53 }
 0xb14   : > { %v3890_v29 = vsub.f32 %v3878_v35, %v3888_v51  ;;  %v3891_v33 = vmul.f32 %v3889_v55, %v3889_v55 }
 0xb16   : > { %v3893_v22 = vsel %vm792_vm1, %v3891_v33, 0.0  ;;  %v3892_v28 = vmul.f32 %v3890_v29, %v3890_v29 }
 0xb17   : > { %3894 = vadd.xlane.f32.xlu0 %v3893_v22 }
 0xb18   : > { %v3896_v56 = vsel %vm792_vm1, %v3892_v28, 0.0 }
 0xb19   : > { %3897 = vadd.xlane.f32.xlu1 %v3896_v56 }
 0xba4   : > { %v3895_v42 = vpop.xlane.xlu0 %3894 }
 0xba5   : > { %v3899_v4 = vmul.f32 0.03125, %v3895_v42 }
 0xba6   : > { %v3898_v9 = vpop.xlane.xlu1 %3897 }
 0xba7   : > { %v3901_v34 = vadd.f32 1e-05, %v3899_v4  ;;  %v3900_v30 = vmul.f32 0.03125, %v3898_v9 }
 0xba9   : > { %5004 = vrsqrt.f32 %v3901_v34  ;;  %v3902_v12 = vadd.f32 1e-05, %v3900_v30 }
 0xbab   : > { %5006 = vrsqrt.f32 %v3902_v12 }
 0xbb3   : > { %v5005_v50 = vpop.eup %5004 }
 0xbb4   : > { %v3905_v32 = vmul.f32 %v5005_v50, %v3889_v55 }
 0xbb5   : > { %v5007_v57 = vpop.eup %5006 }
 0xbb6   : > { %v3913_v58 = vmul.f32 %v4399_v18, %v3905_v32  ;;  %v3906_v17 = vmul.f32 %v5007_v57, %v3890_v29 }
 0xbb8   : > { %v3914_v21 = vmul.f32 %v4399_v18, %v3906_v17  ;;  %v3921_v61 = vadd.f32 %v4400_v60, %v3913_v58 }
 0xbba   : > { %v3922_v62 = vadd.f32 %v4400_v60, %v3914_v21 }
 0xbbc   : > { %v3931_v2 = vpack.c.bf16 %v3922_v62, %v3921_v61 }
 0xbbe   : > { %4401 = vmatmul.mubr.msk.bf16.vlgmr.msra.gmra.mrb[44].mxu1 %vm792_vm1, %v3931_v2 }
 0xc91   : > { %v3985_v36 = vpop.f32.mrb[44].mxu1 }
 0xc92   : > { %v3986_v13 = vadd.f32 %v3985_v36, %v3941_v8  ;;  %v3987_v3 = vpop.f32.mrb[45].mxu1 }
 0xc93   : > { %v3988_v5 = vadd.f32 %v3987_v3, %v3945_v11  ;;  %v3989_v15 = vpop.f32.mrb[46].mxu1 }
 0xc94   : > { %v3994_v16 = vmax.f32 %v3986_v13, 0.0  ;;  %v3990_v19 = vadd.f32 %v3989_v15, %v3941_v8  ;;  %v3991_v20 = vpop.f32.mrb[47].mxu1 }
 0xc95   : > { %v3995_v1 = vmax.f32 %v3988_v5, 0.0  ;;  %v3992_v40 = vadd.f32 %v3991_v20, %v3945_v11 }
 0xc96   : > { %v4010_v23 = vmul.f32 %v4003_v14, %v3994_v16  ;;  %v3996_v24 = vmax.f32 %v3990_v19, 0.0 }
 0xc97   : > { %v4011_v45 = vmul.f32 %v4007_v7, %v3995_v1  ;;  %v3997_v47 = vmax.f32 %v3992_v40, 0.0 }
 0xc98   : > { %v4012_v35 = vmul.f32 %v4003_v14, %v3996_v24 }
 0xc99   : > { %v4013_v38 = vmul.f32 %v4007_v7, %v3997_v47  ;;  %v4014_v39 = vadd.f32 %v4011_v45, %v4010_v23 }
 0xc9b   : > { %4015 = vadd.xlane.f32.xlu0 %v4014_v39  ;;  %v4017_v52 = vadd.f32 %v4013_v38, %v4012_v35 }
 0xc9d   : > { %4018 = vadd.xlane.f32.xlu1 %v4017_v52 }
 0xd28   : > { %v4016_v53 = vpop.xlane.xlu0 %4015 }
 0xd29   : > { %v4027_v55 = vadd.f32 %v4402_v25, %v4016_v53 }
 0xd2a   : > { %v4019_v27 = vpop.xlane.xlu1 %4018 }
 0xd2b   : > { %v4403_v51 = vmul.f32 -1.442695, %v4027_v55  ;;  %v4028_v29 = vadd.f32 %v4402_v25, %v4019_v27 }
 0xd2d   : > { %5008 = vpow2.f32 %v4403_v51  ;;  %v4404_v33 = vmul.f32 -1.442695, %v4028_v29 }
 0xd2f   : > { %5010 = vpow2.f32 %v4404_v33 }
 0xd37   : > { %v5009_v22 = vpop.eup %5008 }
 0xd38   : > { %v4035_v28 = vadd.f32 1.0, %v5009_v22 }
 0xd39   : > { %v5011_v56 = vpop.eup %5010 }
 0xd3a   : > { %5012 = vrcp.f32 %v4035_v28  ;;  %v4036_v63 = vadd.f32 1.0, %v5011_v56 }
 0xd3c   : > { %5014 = vrcp.f32 %v4036_v63 }
 0xd44   : > { %v5013_v59 = vpop.eup %5012 }
 0xd45   : > { %4043 = vperm.xlu0 %4934, %v5013_v59  }
 0xd46   : > { %v5015_v41 = vpop.eup %5014 }
 0xd47   : > { %4048 = vperm.xlu1 %4935, %v5015_v41  }
 0xdc4   : > { %v4044_v31 = vpop.permute.xlu0 %4043 }
 0xdc5   : > { %v4051_v0 = vmul.f32 %v4044_v31, %v3921_v61 }
 0xdc6   : > { %v4049_v43 = vpop.permute.xlu1 %4048 }
 0xdc7   : > { %4053 = vst.msk [vmem:[%s766_s5] sm:$0xff] %vm792_vm1, %v4051_v0  ;;  %v4052_v44 = vmul.f32 %v4049_v43, %v3922_v62 }
 0xdc9   : > { %4054 = vst.msk [vmem:[%s766_s5 + $0x8] sm:$0xff] %vm792_vm1, %v4052_v44 }
 0xdca   : > { %5481 = shalt.err (!%p5478_p1)
}
 0xdcb   : > { %s5482_s5 = scalar_lea.hbm %s6668_s19, 256  ;;  %s5486_s26 = scalar_lea.hbm %s6801_s23, 512 }
 0xdcc   : > { %p5483_p13 = scmp.ne.s32.totalorder %s6668_s19, %s5482_s5  ;;  %p5487_p8 = scmp.lt.u32.totalorder %s6668_s19, %s6801_s23 }
 0xdcd   : > { %p5488_p6 = scmp.lt.u32.totalorder %s5486_s26, %s5482_s5  ;;  %p5490_p11 = scmp.lt.u32.totalorder %s5482_s5, %s6668_s19 }
 0xdce   : > { %p5484_p0 = pnand %p5483_p13, %p6802_p3 }
 0xdcf   : > { %p5489_p10 = por %p5488_p6, %p5487_p8 }
 0xdd0   : > { %p5485_p2 = pneg %p5484_p0 }
 0xdd1   : > { %p5491_p5 = por %p5490_p11, %p5489_p10 }
 0xdd3   : > { %p5492_p9 = pnand %p5491_p5, %p5485_p2 }
 0xdd5   : > { %5495 = shalt.err (!%p5492_p9)
}
 0xdd6   : > { %s5598_s20 = smov 128  }
 0xdd7   : > { %4770 = dma.vmem_to_hbm [thread:$0]  (%p6802_p3), %s6662_s17, 256, %s6668_s19, %s4056_s21, %s5598_s20, %s5598_s20, %s5593_s30  }
 0xdd8 PF: > { %s6803_s0 = sld [smem:[#allocation40_spill]]  ;;  %s6804_s29 = sld [smem:[#allocation43_spill]] }
 0xdd9   : > { %p6805_p7 = scmp.ne.s32.totalorder %s6777_s1, 0 }
 0xdde   : > { %s4084_s7 = sand.u32 1, %s6803_s0   ;;  %p6806_p4 = scmp.ge.s32.totalorder %s6804_s29, 2 }
 0xddf   : > { %s4085_s5 = scalar_lea.sflag [#allocation5], %s4084_s7 }
 0xde0   : > { %p4823_p12 = pnand %p6806_p4, %p6805_p7 }
 0xde2   : > { %5549 = dma.done.wait (!%p4823_p12), %s4085_s5, 256  }
 0xde3   : > { %5551 = vsyncadd (!%p4823_p12), %s4085_s5, 4294967040  ;;  %s6807_s26 = sld [smem:[#allocation41_spill]]  ;;  %s6808_s27 = sld [smem:[#allocation42_spill]] }
 0xde4   : > { %p40_p1 = scmp.ge.s32.totalorder %s6043_s16, 4  }
 0xde6   :  { %42 = sbr.rel (!%p40_p1) target bundleno = 20 (0x14), region = 193 }
 0xded   :  { %4090 = vsyncpa [#allocation4], 1 }
 0xdee   :  { %4092 = vsyncpa [#allocation4 + $0x1], 1 }
 0xdef   :  { %4093 = vsyncpa [#allocation7], 1 }
 0xdf0   :  { %4094 = vsyncpa [#allocation10], 1 }
 0xdf1   :  { %4095 = vsyncpa [#allocation13], 1 }
 0xdf2   :  { %4096 = vsyncpa [#allocation16], 1 }
 0xdf3   :  { %4097 = vsyncpa [#allocation19], 1 }
 0xdf4   :  { %4098 = vsyncpa [#allocation22], 1 }
 0xdf5   :  { %4099 = vsyncpa [#allocation25], 1 }
 0xdf6   :  { %4100 = vsyncpa [#allocation28], 1 }
 0xdf7   :  { %4101 = vsyncpa [#allocation5], 1 }
 0xdf8   :  { %4103 = vsyncpa [#allocation5 + $0x1], 1 }

// kernel: temporal_transformer_forward.2
= control target key start
LH: loop header
LB: loop body
LE: loop exit
PB: predicated region body
PF: predicated region fallthrough
CT: control target
= control target key end

     0   :  { %s6164_s0 = inlined_call_operand.hbm [shape: f32[32,32], index: 0, kind: input, shape index: {}]   ;;  %s6165_s1 = inlined_call_operand.hbm [shape: f32[3,32,32], index: 1, kind: input, shape index: {}]   ;;  %s6166_s2 = inlined_call_operand.hbm [shape: f32[3,32], index: 2, kind: input, shape index: {}]   ;;  %s6167_s3 = inlined_call_operand.hbm [shape: f32[32,32], index: 3, kind: input, shape index: {}]   ;;  %s6168_s4 = inlined_call_operand.hbm [shape: f32[1,32], index: 4, kind: input, shape index: {}]   ;;  %s6169_s5 = inlined_call_operand.hbm [shape: f32[1,32], index: 5, kind: input, shape index: {}]   ;;  %s6170_s6 = inlined_call_operand.hbm [shape: f32[1,32], index: 6, kind: input, shape index: {}]   ;;  %s6171_s7 = inlined_call_operand.hbm [shape: f32[32,64], index: 7, kind: input, shape index: {}]   ;;  %s6172_s8 = inlined_call_operand.hbm [shape: f32[1,64], index: 8, kind: input, shape index: {}]   ;;  %s6173_s9 = inlined_call_operand.hbm [shape: f32[64,32], index: 9, kind: input, shape index: {}]   ;;  %s6174_s10 = inlined_call_operand.hbm [shape: f32[1,32], index: 10, kind: input, shape index: {}]   ;;  %s6175_s11 = inlined_call_operand.hbm [shape: f32[1,32], index: 11, kind: input, shape index: {}]   ;;  %s6176_s12 = inlined_call_operand.hbm [shape: f32[1,32], index: 12, kind: input, shape index: {}]   ;;  %s6177_s13 = inlined_call_operand.hbm [shape: f32[32,32], index: 13, kind: output, shape index: {}]  }
   0x1   :  { %6190 = sst [smem:[#allocation35_spill]] %s6164_s0 }
   0x2   :  { %6191 = sst [smem:[#allocation36_spill]] %s6165_s1 }
   0x3   :  { %6192 = sst [smem:[#allocation37_spill]] %s6166_s2 }
   0x4   :  { %6193 = sst [smem:[#allocation38_spill]] %s6177_s13 }
   0x5   :  { %18 = vsyncpa [#allocation3], 0 }
   0x6   :  { %20 = vsyncpa [#allocation3 + $0x1], 0 }
   0x7   :  { %21 = vsyncpa [#allocation6], 0 }
   0x8   :  { %22 = vsyncpa [#allocation9], 0 }
   0x9   :  { %23 = vsyncpa [#allocation12], 0 }
   0xa   :  { %24 = vsyncpa [#allocation15], 0 }
   0xb   :  { %25 = vsyncpa [#allocation18], 0 }
   0xc   :  { %26 = vsyncpa [#allocation21], 0 }
   0xd   :  { %27 = vsyncpa [#allocation4], 0 }
   0xe   :  { %29 = vsyncpa [#allocation4 + $0x1], 0  ;;  %s5209_s25 = smov 0   ;;  %s5211_s26 = smov 0  }
   0xf   :  { %s5213_s27 = smov 0   ;;  %s5215_s28 = smov 0  }
  0x10 LB: > { %6194 = sst [smem:[#allocation32_spill]] %s5100_s25  ;;  %s5114_s29 = smov [#allocation5]   ;;  %s5112_s28 = sphi %s5215_s28, %s6237_s28   ;;  %s5108_s27 = sphi %s5213_s27, %s6236_s27   ;;  %s5104_s26 = sphi %s5211_s26, %s6235_s26   ;;  %s5100_s25 = sphi %s5209_s25, %s6234_s25  }
  0x11   : > { %s356_s30 = sshll.u32 %s5114_s29, 4  ;;  %s5230_s14 = sadd.s32 4294967295, %s5112_s28   ;;  %s5235_s30 = int_to_ptr.vmem [resolvable:$true] %s356_s30 }
  0x12   : > { %6195 = sst [smem:[#allocation33_spill]] %s5230_s14  ;;  %p3977_p0 = scmp.ge.s32.totalorder %s5112_s28, 1 }
  0x13   : > { %p6186_p1 = scmp.eq.s32.totalorder %s5230_s14, 0  ;;  %p344_p2 = scmp.lt.s32.totalorder %s5112_s28, 3 }
  0x14   : > { %s5115_s16 = smov [#allocation8]   ;;  %s5116_s19 = smov [#allocation11]  }
  0x15   : > { %p5237_p3 = pnand %p3977_p0, %p344_p2  ;;  %s380_s17 = sshll.u32 %s5115_s16, 4  ;;  %s5250_s17 = int_to_ptr.vmem [resolvable:$true] %s380_s17 }
  0x16   : > { %s405_s20 = sshll.u32 %s5116_s19, 4  ;;  %s6199_s1 = sld [smem:[#allocation36_spill]]  ;;  %s5252_s20 = int_to_ptr.vmem [resolvable:$true] %s405_s20 }
  0x17   : > { %s6196_s15 = scalar_select %p5237_p3, 1, 0 }
  0x18   : > { %p4441_p5 = pneg %p5237_p3 }
  0x19   : > { %6197 = sst [smem:[#allocation34_spill]] %s6196_s15 }
  0x1a   : > { %p5246_p6 = pnand %p4441_p5, %p6186_p1 }
  0x1c   : > { %s4656_s23 = scalar_lea.hbm %s6199_s1, 1536  ;;  %p5262_p8 = pneg %p5246_p6 }
  0x1d   : > { %p4657_p7 = scmp.ne.s32.totalorder %s6199_s1, %s4656_s23  ;;  %p4663_p11 = scmp.lt.u32.totalorder %s4656_s23, %s6199_s1 }
  0x1f   : > { %p4659_p9 = pnand %p5262_p8, %p4657_p7 }
  0x21   : > { %p4660_p10 = pneg %p4659_p9 }
  0x23   : > { %p4665_p12 = pnand %p4663_p11, %p4660_p10 }
  0x25   : > { %4668 = shalt.err (!%p4665_p12)
}
  0x26   : > { %s4669_s21 = scalar_lea.vmem %s5235_s30, 1536  ;;  %p4677_p5 = scmp.lt.s32.totalorder %s5235_s30, %s5235_s30 }
  0x27   : > { %p4670_p13 = scmp.ne.s32.totalorder %s5235_s30, %s4669_s21  ;;  %p4678_p4 = scmp.lt.s32.totalorder %s4669_s21, %s4669_s21 }
  0x29   : > { %p4672_p0 = pnand %p4670_p13, %p5262_p8  ;;  %p4679_p7 = por %p4678_p4, %p4677_p5 }
  0x2b   : > { %p4673_p2 = pneg %p4672_p0 }
  0x2d   : > { %p4680_p9 = pnand %p4679_p7, %p4673_p2 }
  0x2f   : > { %4683 = shalt.err (!%p4680_p9)
}
  0x30   : > { %s6184_s22 = smov 128   ;;  %s6188_s13 = smov 8  }
  0x31   : > { %4444 = dma.hbm_to_vmem [thread:$0]  (!%p5246_p6), %s6199_s1, 1536, %s5235_s30, [#allocation6], %s6184_s22, %s6184_s22, %s6188_s13  }
  0x32   : > { %s4684_s21 = scalar_lea.hbm %s6167_s3, 512 }
  0x33   : > { %p4685_p4 = scmp.ne.s32.totalorder %s6167_s3, %s4684_s21  ;;  %p4691_p12 = scmp.lt.u32.totalorder %s4684_s21, %s6167_s3 }
  0x35   : > { %p4687_p10 = pnand %p4685_p4, %p5262_p8 }
  0x37   : > { %p4688_p11 = pneg %p4687_p10 }
  0x39   : > { %p4693_p13 = pnand %p4691_p12, %p4688_p11 }
  0x3b   : > { %4696 = shalt.err (!%p4693_p13)
}
  0x3c   : > { %s4697_s30 = scalar_lea.vmem %s5250_s17, 512  ;;  %p4705_p7 = scmp.lt.s32.totalorder %s5250_s17, %s5250_s17 }
  0x3d   : > { %p4698_p0 = scmp.ne.s32.totalorder %s5250_s17, %s4697_s30  ;;  %p4706_p9 = scmp.lt.s32.totalorder %s4697_s30, %s4697_s30 }
  0x3f   : > { %p4700_p2 = pnand %p4698_p0, %p5262_p8  ;;  %p4707_p4 = por %p4706_p9, %p4705_p7 }
  0x41   : > { %p4701_p5 = pneg %p4700_p2 }
  0x43   : > { %p4708_p10 = pnand %p4707_p4, %p4701_p5 }
  0x45   : > { %4711 = shalt.err (!%p4708_p10)
}
  0x46   : > { %4450 = dma.hbm_to_vmem [thread:$0]  (!%p5246_p6), %s6167_s3, 512, %s5250_s17, [#allocation9], %s6184_s22, %s6184_s22, %s6188_s13  }
  0x47   : > { %s4712_s23 = scalar_lea.hbm %s6169_s5, 16 }
  0x48   : > { %p4713_p11 = scmp.ne.s32.totalorder %s6169_s5, %s4712_s23  ;;  %p4719_p0 = scmp.lt.u32.totalorder %s4712_s23, %s6169_s5 }
  0x4a   : > { %p4715_p12 = pnand %p4713_p11, %p5262_p8 }
  0x4c   : > { %p4716_p13 = pneg %p4715_p12 }
  0x4e   : > { %p4721_p2 = pnand %p4719_p0, %p4716_p13 }
  0x50   : > { %4724 = shalt.err (!%p4721_p2)
}
  0x51   : > { %s4725_s17 = scalar_lea.vmem %s5252_s20, 16  ;;  %s4732_s30 = scalar_lea.vmem %s5252_s20, 32 }
  0x52   : > { %p4726_p5 = scmp.ne.s32.totalorder %s5252_s20, %s4725_s17  ;;  %p4733_p4 = scmp.lt.s32.totalorder %s5252_s20, %s5252_s20 }
  0x53   : > { %p4734_p10 = scmp.lt.s32.totalorder %s4732_s30, %s4725_s17 }
  0x54   : > { %p4728_p7 = pnand %p4726_p5, %p5262_p8 }
  0x55   : > { %p4735_p11 = por %p4734_p10, %p4733_p4 }
  0x56   : > { %p4729_p9 = pneg %p4728_p7 }
  0x58   : > { %p4736_p12 = pnand %p4735_p11, %p4729_p9 }
  0x5a   : > { %4739 = shalt.err (!%p4736_p12)
}
  0x5b   : > { %4456 = dma.hbm_to_vmem [thread:$0]  (!%p5246_p6), %s6169_s5, 16, %s5252_s20, [#allocation12]  }
  0x5c   : > { %s5119_s14 = smov [#allocation14]   ;;  %s5120_s23 = smov [#allocation17]  }
  0x5d   : > { %s426_s15 = sshll.u32 %s5119_s14, 4  ;;  %s450_s24 = sshll.u32 %s5120_s23, 4  ;;  %s427_s15 = int_to_ptr.vmem [resolvable:$true] %s426_s15  ;;  %s451_s24 = int_to_ptr.vmem [resolvable:$true] %s450_s24 }
  0x5e   : > { %s4740_s21 = scalar_lea.hbm %s6171_s7, 512 }
  0x5f   : > { %p4741_p13 = scmp.ne.s32.totalorder %s6171_s7, %s4740_s21  ;;  %p4747_p5 = scmp.lt.u32.totalorder %s4740_s21, %s6171_s7 }
  0x61   : > { %p4743_p0 = pnand %p4741_p13, %p5262_p8 }
  0x63   : > { %p4744_p2 = pneg %p4743_p0 }
  0x65   : > { %p4749_p7 = pnand %p4747_p5, %p4744_p2 }
  0x67   : > { %4752 = shalt.err (!%p4749_p7)
}
  0x68   : > { %s4753_s20 = scalar_lea.vmem %s427_s15, 512  ;;  %p4761_p11 = scmp.lt.s32.totalorder %s427_s15, %s427_s15 }
  0x69   : > { %p4754_p9 = scmp.ne.s32.totalorder %s427_s15, %s4753_s20  ;;  %p4762_p12 = scmp.lt.s32.totalorder %s4753_s20, %s4753_s20 }
  0x6b   : > { %p4756_p4 = pnand %p4754_p9, %p5262_p8  ;;  %p4763_p1 = por %p4762_p12, %p4761_p11 }
  0x6d   : > { %p4757_p10 = pneg %p4756_p4 }
  0x6f   : > { %p4764_p3 = pnand %p4763_p1, %p4757_p10 }
  0x71   : > { %4767 = shalt.err (!%p4764_p3)
}
  0x72   : > { %s6201_s25 = smov 128   ;;  %s4768_s19 = scalar_lea.hbm %s6173_s9, 1024 }
  0x73   : > { %4462 = dma.hbm_to_vmem [thread:$0]  (!%p5246_p6), %s6171_s7, 512, %s427_s15, [#allocation15], %s6201_s25, %s6201_s25, %s6188_s13  }
  0x74   : > { %p4769_p1 = scmp.ne.s32.totalorder %s6173_s9, %s4768_s19  ;;  %p4775_p0 = scmp.lt.u32.totalorder %s4768_s19, %s6173_s9 }
  0x76   : > { %p4771_p3 = pnand %p4769_p1, %p5262_p8 }
  0x78   : > { %p4772_p13 = pneg %p4771_p3 }
  0x7a   : > { %p4777_p2 = pnand %p4775_p0, %p4772_p13 }
  0x7c   : > { %4780 = shalt.err (!%p4777_p2)
}
  0x7d   : > { %s4781_s20 = scalar_lea.vmem %s451_s24, 1024  ;;  %p4789_p4 = scmp.lt.s32.totalorder %s451_s24, %s451_s24 }
  0x7e   : > { %p4782_p5 = scmp.ne.s32.totalorder %s451_s24, %s4781_s20  ;;  %p4790_p10 = scmp.lt.s32.totalorder %s4781_s20, %s4781_s20 }
  0x80   : > { %p4784_p7 = pnand %p4782_p5, %p5262_p8  ;;  %p4791_p11 = por %p4790_p10, %p4789_p4 }
  0x82   : > { %p4785_p9 = pneg %p4784_p7 }
  0x84   : > { %p4792_p12 = pnand %p4791_p11, %p4785_p9 }
  0x86   : > { %4795 = shalt.err (!%p4792_p12)
}
  0x87   : > { %4468 = dma.hbm_to_vmem [thread:$0]  (!%p5246_p6), %s6173_s9, 1024, %s451_s24, [#allocation18], %s6201_s25, %s6201_s25, %s6188_s13  }
  0x88   : > { %s5121_s14 = smov [#allocation20]   ;;  %s5122_s29 = smov [#allocation7]  }
  0x89   : > { %s475_s23 = sshll.u32 %s5121_s14, 4  ;;  %s370_s19 = sshll.u32 %s5122_s29, 4  ;;  %s476_s23 = int_to_ptr.vmem [resolvable:$true] %s475_s23  ;;  %s371_s19 = int_to_ptr.vmem [resolvable:$true] %s370_s19 }
  0x8a   : > { %s4796_s30 = scalar_lea.hbm %s6175_s11, 16 }
  0x8b   : > { %p4797_p1 = scmp.ne.s32.totalorder %s6175_s11, %s4796_s30  ;;  %p4803_p0 = scmp.lt.u32.totalorder %s4796_s30, %s6175_s11 }
  0x8d   : > { %p4799_p3 = pnand %p4797_p1, %p5262_p8 }
  0x8f   : > { %p4800_p13 = pneg %p4799_p3 }
  0x91   : > { %p4805_p2 = pnand %p4803_p0, %p4800_p13 }
  0x93   : > { %4808 = shalt.err (!%p4805_p2)
}
  0x94   : > { %s4809_s24 = scalar_lea.vmem %s476_s23, 16  ;;  %s4816_s22 = scalar_lea.vmem %s476_s23, 32 }
  0x95   : > { %p4810_p5 = scmp.ne.s32.totalorder %s476_s23, %s4809_s24  ;;  %p4817_p4 = scmp.lt.s32.totalorder %s476_s23, %s476_s23 }
  0x96   : > { %p4818_p10 = scmp.lt.s32.totalorder %s4816_s22, %s4809_s24 }
  0x97   : > { %p4812_p7 = pnand %p4810_p5, %p5262_p8 }
  0x98   : > { %p4819_p11 = por %p4818_p10, %p4817_p4 }
  0x99   : > { %p4813_p9 = pneg %p4812_p7 }
  0x9b   : > { %p4820_p12 = pnand %p4819_p11, %p4813_p9 }
  0x9d   : > { %4823 = shalt.err (!%p4820_p12)
}
  0x9e   : > { %4474 = dma.hbm_to_vmem [thread:$0]  (!%p5246_p6), %s6175_s11, 16, %s476_s23, [#allocation21]  }
  0x9f   : > { %s6202_s2 = sld [smem:[#allocation37_spill]] }
  0xa5   : > { %s4824_s17 = scalar_lea.hbm %s6202_s2, 64 }
  0xa6   : > { %p4825_p1 = scmp.ne.s32.totalorder %s6202_s2, %s4824_s17  ;;  %p4831_p0 = scmp.lt.u32.totalorder %s4824_s17, %s6202_s2 }
  0xa8   : > { %p4827_p3 = pnand %p4825_p1, %p5262_p8 }
  0xaa   : > { %p4828_p13 = pneg %p4827_p3 }
  0xac   : > { %p4833_p2 = pnand %p4831_p0, %p4828_p13 }
  0xae   : > { %4836 = shalt.err (!%p4833_p2)
}
  0xaf   : > { %s4837_s24 = scalar_lea.vmem %s371_s19, 64  ;;  %p4845_p4 = scmp.lt.s32.totalorder %s371_s19, %s371_s19 }
  0xb0   : > { %p4838_p5 = scmp.ne.s32.totalorder %s371_s19, %s4837_s24  ;;  %p4846_p10 = scmp.lt.s32.totalorder %s4837_s24, %s4837_s24 }
  0xb2   : > { %p4840_p7 = pnand %p4838_p5, %p5262_p8  ;;  %p4847_p11 = por %p4846_p10, %p4845_p4 }
  0xb4   : > { %p4841_p9 = pneg %p4840_p7 }
  0xb6   : > { %p4848_p12 = pnand %p4847_p11, %p4841_p9 }
  0xb8   : > { %4851 = shalt.err (!%p4848_p12)
}
  0xb9   : > { %4447 = dma.hbm_to_vmem [thread:$0]  (!%p5246_p6), %s6202_s2, 64, %s371_s19, [#allocation6]  }
  0xba   : > { %s5123_s14 = smov [#allocation10]   ;;  %s5124_s1 = smov [#allocation13]  }
  0xbb   : > { %s394_s29 = sshll.u32 %s5123_s14, 4  ;;  %s416_s21 = sshll.u32 %s5124_s1, 4  ;;  %s395_s29 = int_to_ptr.vmem [resolvable:$true] %s394_s29  ;;  %s417_s21 = int_to_ptr.vmem [resolvable:$true] %s416_s21 }
  0xbc   : > { %s4852_s0 = scalar_lea.hbm %s6168_s4, 16 }
  0xbd   : > { %p4853_p1 = scmp.ne.s32.totalorder %s6168_s4, %s4852_s0  ;;  %p4859_p0 = scmp.lt.u32.totalorder %s4852_s0, %s6168_s4 }
  0xbf   : > { %p4855_p3 = pnand %p4853_p1, %p5262_p8 }
  0xc1   : > { %p4856_p13 = pneg %p4855_p3 }
  0xc3   : > { %p4861_p2 = pnand %p4859_p0, %p4856_p13 }
  0xc5   : > { %4864 = shalt.err (!%p4861_p2)
}
  0xc6   : > { %s4865_s19 = scalar_lea.vmem %s395_s29, 16  ;;  %s4872_s22 = scalar_lea.vmem %s395_s29, 32 }
  0xc7   : > { %p4866_p5 = scmp.ne.s32.totalorder %s395_s29, %s4865_s19  ;;  %p4873_p4 = scmp.lt.s32.totalorder %s395_s29, %s395_s29 }
  0xc8   : > { %p4874_p10 = scmp.lt.s32.totalorder %s4872_s22, %s4865_s19 }
  0xc9   : > { %p4868_p7 = pnand %p4866_p5, %p5262_p8 }
  0xca   : > { %p4875_p11 = por %p4874_p10, %p4873_p4 }
  0xcb   : > { %p4869_p9 = pneg %p4868_p7 }
  0xcd   : > { %p4876_p12 = pnand %p4875_p11, %p4869_p9 }
  0xcf   : > { %4879 = shalt.err (!%p4876_p12)
}
  0xd0   : > { %4453 = dma.hbm_to_vmem [thread:$0]  (!%p5246_p6), %s6168_s4, 16, %s395_s29, [#allocation9]  }
  0xd1   : > { %s4880_s0 = scalar_lea.hbm %s6170_s6, 16 }
  0xd2   : > { %p4881_p1 = scmp.ne.s32.totalorder %s6170_s6, %s4880_s0  ;;  %p4887_p0 = scmp.lt.u32.totalorder %s4880_s0, %s6170_s6 }
  0xd4   : > { %p4883_p3 = pnand %p4881_p1, %p5262_p8 }
  0xd6   : > { %p4884_p13 = pneg %p4883_p3 }
  0xd8   : > { %p4889_p2 = pnand %p4887_p0, %p4884_p13 }
  0xda   : > { %4892 = shalt.err (!%p4889_p2)
}
  0xdb   : > { %s4893_s19 = scalar_lea.vmem %s417_s21, 16  ;;  %s4900_s29 = scalar_lea.vmem %s417_s21, 32 }
  0xdc   : > { %p4894_p5 = scmp.ne.s32.totalorder %s417_s21, %s4893_s19  ;;  %p4901_p4 = scmp.lt.s32.totalorder %s417_s21, %s417_s21 }
  0xdd   : > { %p4902_p10 = scmp.lt.s32.totalorder %s4900_s29, %s4893_s19 }
  0xde   : > { %p4896_p7 = pnand %p4894_p5, %p5262_p8 }
  0xdf   : > { %p4903_p11 = por %p4902_p10, %p4901_p4 }
  0xe0   : > { %p4897_p9 = pneg %p4896_p7 }
  0xe2   : > { %p4904_p12 = pnand %p4903_p11, %p4897_p9 }
  0xe4   : > { %4907 = shalt.err (!%p4904_p12)
}
  0xe5   : > { %4459 = dma.hbm_to_vmem [thread:$0]  (!%p5246_p6), %s6170_s6, 16, %s417_s21, [#allocation12]  }
  0xe6   : > { %s5125_s1 = smov [#allocation16]   ;;  %s5126_s30 = smov [#allocation19]  }
  0xe7   : > { %s440_s17 = sshll.u32 %s5125_s1, 4  ;;  %s464_s0 = sshll.u32 %s5126_s30, 4  ;;  %s441_s17 = int_to_ptr.vmem [resolvable:$true] %s440_s17  ;;  %s465_s0 = int_to_ptr.vmem [resolvable:$true] %s464_s0 }
  0xe8   : > { %s4908_s24 = scalar_lea.hbm %s6172_s8, 16 }
  0xe9   : > { %p4909_p1 = scmp.ne.s32.totalorder %s6172_s8, %s4908_s24  ;;  %p4915_p0 = scmp.lt.u32.totalorder %s4908_s24, %s6172_s8 }
  0xeb   : > { %p4911_p3 = pnand %p4909_p1, %p5262_p8 }
  0xed   : > { %p4912_p13 = pneg %p4911_p3 }
  0xef   : > { %p4917_p2 = pnand %p4915_p0, %p4912_p13 }
  0xf1   : > { %4920 = shalt.err (!%p4917_p2)
}
  0xf2   : > { %s4921_s21 = scalar_lea.vmem %s441_s17, 16  ;;  %s4928_s14 = scalar_lea.vmem %s441_s17, 32 }
  0xf3   : > { %p4922_p5 = scmp.ne.s32.totalorder %s441_s17, %s4921_s21  ;;  %p4929_p4 = scmp.lt.s32.totalorder %s441_s17, %s441_s17 }
  0xf4   : > { %p4930_p10 = scmp.lt.s32.totalorder %s4928_s14, %s4921_s21 }
  0xf5   : > { %p4924_p7 = pnand %p4922_p5, %p5262_p8 }
  0xf6   : > { %p4931_p11 = por %p4930_p10, %p4929_p4 }
  0xf7   : > { %p4925_p9 = pneg %p4924_p7 }
  0xf9   : > { %p4932_p12 = pnand %p4931_p11, %p4925_p9 }
  0xfb   : > { %4935 = shalt.err (!%p4932_p12)
}
  0xfc   : > { %4465 = dma.hbm_to_vmem [thread:$0]  (!%p5246_p6), %s6172_s8, 16, %s441_s17, [#allocation15]  }
  0xfd   : > { %s4936_s24 = scalar_lea.hbm %s6174_s10, 16 }
  0xfe   : > { %p4937_p1 = scmp.ne.s32.totalorder %s6174_s10, %s4936_s24  ;;  %p4943_p0 = scmp.lt.u32.totalorder %s4936_s24, %s6174_s10 }
 0x100   : > { %p4939_p3 = pnand %p4937_p1, %p5262_p8 }
 0x102   : > { %p4940_p13 = pneg %p4939_p3 }
 0x104   : > { %p4945_p2 = pnand %p4943_p0, %p4940_p13 }
 0x106   : > { %4948 = shalt.err (!%p4945_p2)
}
 0x107   : > { %s4949_s21 = scalar_lea.vmem %s465_s0, 16  ;;  %s4956_s17 = scalar_lea.vmem %s465_s0, 32 }
 0x108   : > { %p4950_p5 = scmp.ne.s32.totalorder %s465_s0, %s4949_s21  ;;  %p4957_p4 = scmp.lt.s32.totalorder %s465_s0, %s465_s0 }
 0x109   : > { %p4958_p10 = scmp.lt.s32.totalorder %s4956_s17, %s4949_s21 }
 0x10a   : > { %p4952_p7 = pnand %p4950_p5, %p5262_p8 }
 0x10b   : > { %p4959_p11 = por %p4958_p10, %p4957_p4 }
 0x10c   : > { %p4953_p9 = pneg %p4952_p7 }
 0x10e   : > { %p4960_p12 = pnand %p4959_p11, %p4953_p9 }
 0x110   : > { %4963 = shalt.err (!%p4960_p12)
}
 0x111   : > { %4471 = dma.hbm_to_vmem [thread:$0]  (!%p5246_p6), %s6174_s10, 16, %s465_s0, [#allocation18]  }
 0x112   : > { %s5127_s30 = smov [#allocation22]   ;;  %s4964_s23 = scalar_lea.hbm %s6176_s12, 16 }
 0x113   : > { %s486_s20 = sshll.u32 %s5127_s30, 4  ;;  %p4965_p1 = scmp.ne.s32.totalorder %s6176_s12, %s4964_s23  ;;  %s487_s20 = int_to_ptr.vmem [resolvable:$true] %s486_s20 }
 0x114   : > { %p4971_p0 = scmp.lt.u32.totalorder %s4964_s23, %s6176_s12 }
 0x115   : > { %p4967_p3 = pnand %p4965_p1, %p5262_p8 }
 0x117   : > { %p4968_p13 = pneg %p4967_p3 }
 0x119   : > { %p4973_p2 = pnand %p4971_p0, %p4968_p13 }
 0x11b   : > { %4976 = shalt.err (!%p4973_p2)
}
 0x11c   : > { %s4977_s0 = scalar_lea.vmem %s487_s20, 16  ;;  %s4984_s17 = scalar_lea.vmem %s487_s20, 32 }
 0x11d   : > { %p4978_p5 = scmp.ne.s32.totalorder %s487_s20, %s4977_s0  ;;  %p4985_p4 = scmp.lt.s32.totalorder %s487_s20, %s487_s20 }
 0x11e   : > { %p4986_p10 = scmp.lt.s32.totalorder %s4984_s17, %s4977_s0 }
 0x11f   : > { %p4980_p7 = pnand %p4978_p5, %p5262_p8 }
 0x120   : > { %p4987_p11 = por %p4986_p10, %p4985_p4 }
 0x121   : > { %p4981_p9 = pneg %p4980_p7 }
 0x123   : > { %p4988_p12 = pnand %p4987_p11, %p4981_p9 }
 0x125   : > { %4991 = shalt.err (!%p4988_p12)
}
 0x126   : > { %s6203_s16 = sld [smem:[#allocation32_spill]]  ;;  %s6204_s30 = sld [smem:[#allocation33_spill]] }
 0x127   : > { %4477 = dma.hbm_to_vmem [thread:$0]  (!%p5246_p6), %s6176_s12, 16, %s487_s20, [#allocation21]  }
 0x128   : > { %s3976_s15 = sadd.s32 4294967294, %s5112_s28   ;;  %s5506_s18 = sadd.s32 1, %s5112_s28  }
 0x129   : > { %s39_s24 = ssub.s32 %s5112_s28, %s5506_s18  ;;  %s42_s23 = sadd.s32 1, %s5108_s27 }
 0x12a   : > { %p40_p8 = scmp.eq.s32.totalorder %s39_s24, 0  ;;  %p49_p1 = scmp.ne.s32.totalorder %s5108_s27, %s5104_s26 }
 0x12b   : > { %p50_p3 = scmp.eq.s32.totalorder %s5112_s28, 0  ;;  %p337_p7 = scmp.eq.s32.totalorder %s3976_s15, 1 }
 0x12c   : > { %p55_p13 = scmp.ne.s32.totalorder %s5104_s26, %s6203_s16  ;;  %p6206_p2 = scmp.eq.s32.totalorder %s6204_s30, 0 }
 0x12d   : > { %s5517_s19 = scalar_select %p40_p8, %s5108_s27, %s42_s23  }
 0x12e   : > { %p5519_p0 = por %p50_p3, %p49_p1  ;;  %p5525_p6 = por %p6206_p2, %p55_p13 }
 0x12f   : > { %p331_p5 = scmp.eq.s32.totalorder %s6204_s30, 1  ;;  %p4498_p9 = scmp.lt.s32.totalorder %s5112_s28, 2 }
 0x130   : > { %s497_s22 = sand.u32 1, %s5108_s27   ;;  %p5536_p10 = por %p337_p7, %p55_p13 }
 0x131   : > { %p5532_p4 = por %p331_p5, %p49_p1  ;;  %s3991_s17 = sshll.u32 %s497_s22, 4 }
 0x132   : > { %s6209_s0 = scalar_select %p5536_p10, 1, 0 }
 0x133   : > { %s6208_s21 = scalar_select %p5532_p4, 1, 0 }
 0x134   : > { %s4091_s14 = sshll.u32 %s5112_s28, 8  ;;  %s6210_s24 = sld [smem:[#allocation35_spill]] }
 0x135   : > { %s501_s30 = scalar_lea.vmem [#allocation2], %s3991_s17  ;;  %p5550_p11 = pnand %p4498_p9, %p5519_p0 }
 0x136   : > { %s508_s15 = sshll.u32 %s501_s30, 4  ;;  %s5554_s2 = scalar_lea.sflag [#allocation3], %s497_s22  ;;  %s5546_s15 = int_to_ptr.vmem [resolvable:$true] %s508_s15 }
 0x137   : > { %p4994_p8 = pneg %p5550_p11 }
 0x13a   : > { %s5544_s23 = scalar_lea.hbm %s6210_s24, %s4091_s14  ;;  %s4997_s29 = scalar_lea.hbm %s6210_s24, 512 }
 0x13b   : > { %s4992_s1 = scalar_lea.hbm %s5544_s23, 256  ;;  %p4998_p13 = scmp.lt.u32.totalorder %s5544_s23, %s6210_s24 }
 0x13c   : > { %p4993_p12 = scmp.ne.s32.totalorder %s5544_s23, %s4992_s1  ;;  %p4999_p0 = scmp.lt.u32.totalorder %s4997_s29, %s4992_s1 }
 0x13d   : > { %p5001_p5 = scmp.lt.u32.totalorder %s4992_s1, %s5544_s23 }
 0x13e   : > { %p4995_p1 = pnand %p4994_p8, %p4993_p12  ;;  %p5000_p2 = por %p4999_p0, %p4998_p13 }
 0x140   : > { %p4996_p3 = pneg %p4995_p1  ;;  %p5002_p7 = por %p5001_p5, %p5000_p2 }
 0x142   : > { %p5003_p9 = pnand %p5002_p7, %p4996_p3 }
 0x144   : > { %5006 = shalt.err (!%p5003_p9)
}
 0x145   : > { %s5007_s22 = scalar_lea.vmem %s5546_s15, 256  ;;  %s5128_s17 = smov [#allocation2]  }
 0x146   : > { %p5008_p12 = scmp.ne.s32.totalorder %s5546_s15, %s5007_s22  ;;  %s5012_s14 = sshll.u32 %s5128_s17, 4  ;;  %s5013_s14 = int_to_ptr.vmem [resolvable:$false] %s5012_s14 }
 0x147   : > { %s5014_s16 = scalar_lea.vmem %s5013_s14, 512  ;;  %p5015_p4 = scmp.lt.s32.totalorder %s5546_s15, %s5013_s14 }
 0x148   : > { %p5010_p1 = pnand %p5008_p12, %p4994_p8  ;;  %p5016_p13 = scmp.lt.s32.totalorder %s5014_s16, %s5007_s22 }
 0x14a   : > { %p5011_p10 = pneg %p5010_p1  ;;  %p5017_p0 = por %p5016_p13, %p5015_p4 }
 0x14c   : > { %p5018_p2 = pnand %p5017_p0, %p5011_p10 }
 0x14e   : > { %5021 = shalt.err (!%p5018_p2)
}
 0x14f   : > { %s6212_s1 = smov 8   ;;  %s6213_s29 = sld [smem:[#allocation34_spill]] }
 0x150   : > { %4481 = dma.hbm_to_vmem [thread:$0]  (!%p5550_p11), %s5544_s23, 256, %s5546_s15, %s5554_s2, %s6201_s25, %s6201_s25, %s6212_s1  }
 0x155   : > { %p6214_p8 = scmp.ne.s32.totalorder %s6213_s29, 0 }
 0x156   : > { %s5588_s30 = sand.u32 (!%p6214_p8), 1, %s5104_s26  }
 0x157   : > { %520 = sbr.rel (%p6214_p8) target bundleno = 2924 (0xb6c), region = 72  ;;  %s3995_s22 = sshll.u32 (!%p6214_p8), %s5588_s30, 4 }
 0x158   : > { %s523_s17 = scalar_lea.sflag (!%p6214_p8), [#allocation3], %s5588_s30  ;;  %s5594_s13 = scalar_lea.vmem (!%p6214_p8), [#allocation2], %s3995_s22 }
 0x15e   : > { %5067 = dma.done.wait (%p5525_p6), %s523_s17, 256  }
 0x15f   : > { %5069 = vsyncadd (%p5525_p6), %s523_s17, 4294967040  ;;  %s6215_s2 = sld [smem:[#allocation33_spill]] }
 0x165   : > { %p6216_p4 = scmp.eq.s32.totalorder %s6215_s2, 0 }
 0x167   : > { %5071 = dma.done.wait (%p6216_p4), [#allocation6], 1600   ;;  %p6217_p10 = pmov %p6216_p4 }
 0x168   : > { %p6218_p11 = pmov %p6216_p4 }
 0x169   : > { %5073 = vsyncadd (%p6217_p10), [#allocation6], 4294965696 }
 0x16a   : > { %5075 = dma.done.wait (%p6218_p11), [#allocation9], 528   ;;  %p6219_p3 = pmov %p6216_p4 }
 0x16c   : > { %5077 = vsyncadd (%p6219_p3), [#allocation9], 4294966768  ;;  %p6220_p5 = pmov %p6219_p3 }
 0x16d   : > { %p6221_p7 = pmov %p6219_p3 }
 0x16e   : > { %5079 = dma.done.wait (%p6220_p5), [#allocation12], 32  }
 0x16f   : > { %5081 = vsyncadd (%p6221_p7), [#allocation12], 4294967264  ;;  %p6222_p6 = pmov %p6219_p3 }
 0x170   : > { %p6223_p9 = pmov %p6219_p3 }
 0x171   : > { %5083 = dma.done.wait (%p6222_p6), [#allocation15], 528  }
 0x172   : > { %5085 = vsyncadd (%p6223_p9), [#allocation15], 4294966768  ;;  %p6224_p12 = pmov %p6219_p3 }
 0x173   : > { %p6225_p1 = pmov %p6219_p3 }
 0x174   : > { %5087 = dma.done.wait (%p6224_p12), [#allocation18], 1040  }
 0x175   : > { %5089 = vsyncadd (%p6225_p1), [#allocation18], 4294966256  ;;  %p6226_p13 = pmov %p6225_p1 }
 0x176   : > { %p6227_p0 = pmov %p6225_p1 }
 0x177   : > { %5091 = dma.done.wait (%p6226_p13), [#allocation21], 32  }
 0x178   : > { %5093 = vsyncadd (%p6227_p0), [#allocation21], 4294967264  ;;  %v5129_v0 = vmov 0.0   ;;  %vm5130_vm0 = vmmov 0   ;;  %v622_v1 = vld [vmem:[#allocation5] sm:$0xff]  ;;  %v623_v2 = vld [vmem:[#allocation5 + $0x8] sm:$0xff]  ;;  %v638_v22 = vlaneseq }
 0x179   : > { %4177 = vmatprep.subr.bf16.mxu1 %v5129_v0  ;;  %4181 = vmatprep.mubr.msk.bf16.mxu1 %vm5130_vm0, %v5129_v0  ;;  %v624_v3 = vld [vmem:[#allocation5 + $0x10] sm:$0xff]  ;;  %v636_v4 = vpack.c.bf16 %v623_v2, %v622_v1  ;;  %v625_v5 = vld [vmem:[#allocation5 + $0x18] sm:$0xff]  ;;  %v626_v9 = vld [vmem:[#allocation5 + $0x20] sm:$0xff]  ;;  %vm642_vm1 = vcmask 261120   ;;  %s5131_s25 = smov 112   ;;  %s5132_s20 = smov 120  }
 0x17a   : > { %4193 = vmatprep.subr.bf16.mxu0 %v5129_v0  ;;  %4197 = vmatprep.mubr.msk.bf16.mxu0 %vm5130_vm0, %v5129_v0  ;;  %v620_v6 = vld [vmem:[%s5594_s13] sm:$0xff]  ;;  %v621_v7 = vld [vmem:[%s5594_s13 + $0x8] sm:$0xff]  ;;  %v637_v8 = vpack.c.bf16 %v625_v5, %v624_v3  ;;  %v5647_v23 = vshrl.u32 %v638_v22, 7  ;;  %vm865_vm2 = vcmask 64512   ;;  %s5133_s23 = smov 104   ;;  %vm2247_vm3 = vcmask 1043456  }
 0x17b   : > { %4178 = vmatpush3.bf16.msra.mxu1 %v636_v4  ;;  %v630_v10 = vld [vmem:[#allocation5 + $0x40] sm:$0xff]  ;;  %v631_v11 = vld [vmem:[#allocation5 + $0x48] sm:$0xff]  ;;  %v632_v14 = vld [vmem:[#allocation5 + $0x50] sm:$0xff]  ;;  %v635_v16 = vpack.c.bf16 %v621_v7, %v620_v6  ;;  %vm2066_vm4 = vcmask 27648   ;;  %vm2243_vm5 = vcmask 31744   ;;  %s5134_s15 = smov 8  }
 0x17c   : > { %4179 = vmatprep.subr.bf16.mxu1 %v5129_v0  ;;  %v627_v12 = vld [vmem:[#allocation5 + $0x28] sm:$0xff]  ;;  %v734_v13 = vpack.c.bf16 %v631_v11, %v630_v10  ;;  %v633_v15 = vld [vmem:[#allocation5 + $0x58] sm:$0xff]  ;;  %v628_v19 = vld [vmem:[#allocation5 + $0x30] sm:$0xff]  ;;  %v640_v24 = vsub.s32 0, %v5647_v23  ;;  %v691_v30 = vsub.s32 1, %v5647_v23  ;;  %v738_v48 = vsub.s32 2, %v5647_v23 }
 0x17d   : > { %v735_v17 = vpack.c.bf16 %v633_v15, %v632_v14  ;;  %v687_v18 = vpack.c.bf16 %v627_v12, %v626_v9  ;;  %v629_v20 = vld [vmem:[#allocation5 + $0x38] sm:$0xff]  ;;  %v5650_v25 = vld [vmem:[#allocation7] sm:$0x7]  ;;  %s5135_s14 = smov 16   ;;  %s5136_s16 = smov 24   ;;  %vm3491_vm6 = vcmask 130048  }
 0x17e   : > { %4194 = vmatpush3.bf16.msra.mxu0 %v734_v13  ;;  %v688_v21 = vpack.c.bf16 %v629_v20, %v628_v19  ;;  %v641_v26 = vrot.slane %v5650_v25, %v640_v24  ;;  %v692_v35 = vrot.slane %v5650_v25, %v691_v30  ;;  %v739_v50 = vrot.slane %v5650_v25, %v738_v48  ;;  %s4092_s1 = sshll.u32 %s6215_s2, 8  ;;  %s616_s29 = scalar_lea.vmem [#allocation23], %s3995_s22 }
 0x17f   : > { %4180 = vmatpush3.bf16.msra.mxu1 %v637_v8  ;;  %4195 = vmatprep.subr.bf16.mxu0 %v5129_v0  ;;  %vm3494_vm7 = vcmask 195584   ;;  %vm3682_vm8 = vcmask 523264   ;;  %s3789_s17 = sshll.u32 %s616_s29, 4  ;;  %p6229_p8 = scmp.ne.s32.totalorder %s6208_s21, 0  ;;  %s6118_s17 = int_to_ptr.vmem [resolvable:$true] %s3789_s17 }
 0x180   : > { %4185 = vmatprep.subr.bf16.mxu1 %v5129_v0  ;;  %s5022_s22 = scalar_lea.vmem %s6118_s17, 256 }
 0x181   : > { %p5023_p2 = scmp.ne.s32.totalorder %s6118_s17, %s5022_s22 }
 0x182   : > { %4182 = vmatmul.mubr.msk.bf16.vlgmr.msra.gmra.mrb[0].mxu1 %vm642_vm1, %v635_v16  ;;  %4196 = vmatpush3.bf16.msra.mxu0 %v735_v17 }
 0x183   : > { %4186 = vmatpush3.bf16.msra.mxu1 %v687_v18  ;;  %4189 = vmatprep.mubr.msk.bf16.mxu1 %vm5130_vm0, %v5129_v0  ;;  %p5024_p4 = pnand %p5023_p2, %p6229_p8 }
 0x184   : > { %4187 = vmatprep.subr.bf16.mxu1 %v5129_v0  ;;  %4211 = vmatprep.subr.mxu0 %v5129_v0 }
 0x185   : > { %4198 = vmatmul.mubr.msk.bf16.vlgmr.msra.gmra.mrb[0].mxu0 %vm642_vm1, %v635_v16  ;;  %p5025_p10 = pneg %p5024_p4 }
 0x186   : > { %4213 = vmatprep.mubr.msk.f32.mxu0 %vm5130_vm0, %v5129_v0 }
 0x187   : > { %4188 = vmatpush3.bf16.msra.mxu1 %v688_v21 }
 0x188   : > { %4201 = vmatprep.subr.mxu1 %v5129_v0 }
 0x18a   : > { %4190 = vmatmul.mubr.msk.bf16.vlgmr.msra.gmra.mrb[4].mxu1 %vm642_vm1, %v635_v16 }
 0x18b   : > { %4203 = vmatprep.mubr.msk.f32.mxu1 %vm5130_vm0, %v5129_v0 }
 0x255   : > { %v680_v27 = vpop.f32.mrb[0].mxu1 }
 0x256   : > { %v681_v28 = vadd.f32 %v680_v27, %v641_v26  ;;  %v4183_v29 = vpop.f32.mrb[1].mxu1 }
 0x257   : > { %v683_v31 = vpop.f32.mrb[2].mxu1 }
 0x258   : > { %793 = vrot.lane.b32.xlu0 %v681_v28, %s5131_s25  ;;  %785 = vrot.lane.b32.xlu1 %v681_v28, %s5132_s20  ;;  %v4184_v32 = vpop.f32.mrb[3].mxu1  ;;  %v684_v33 = vadd.f32 %v683_v31, %v641_v26  ;;  %v783_v34 = vcombine.high %v681_v28, %v681_v28  ;;  %v774_v45 = vpop.f32.mrb[0].mxu0 }
 0x259   : > { %v4199_v46 = vpop.f32.mrb[1].mxu0  ;;  %v5699_v51 = vadd.f32 %v774_v45, %v739_v50 }
 0x25a   : > { %v784_v43 = vcombine.high %v684_v33, %v684_v33  ;;  %v777_v47 = vpop.f32.mrb[2].mxu0 }
 0x25b   : > { %v4200_v49 = vpop.f32.mrb[3].mxu0  ;;  %v5705_v52 = vcombine.high %v5699_v51, %v5699_v51  ;;  %v5709_v53 = vadd.f32 %v777_v47, %v739_v50 }
 0x25c   : > { %787 = vrot.lane.b32.xlu1 %v783_v34, %s5132_s20  ;;  %789 = vrot.lane.b32.xlu0 %v684_v33, %s5132_s20 }
 0x25d   : > { %v727_v36 = vpop.f32.mrb[4].mxu1  ;;  %v5717_v54 = vcombine.high %v5709_v53, %v5709_v53 }
 0x25e   : > { %v728_v37 = vadd.f32 %v727_v36, %v692_v35  ;;  %v4191_v38 = vpop.f32.mrb[5].mxu1 }
 0x25f   : > { %v730_v39 = vpop.f32.mrb[6].mxu1 }
 0x260   : > { %v731_v40 = vadd.f32 %v730_v39, %v692_v35  ;;  %795 = vrot.lane.b32.xlu1 %v783_v34, %s5131_s25  ;;  %797 = vrot.lane.b32.xlu0 %v684_v33, %s5131_s25  ;;  %v4192_v41 = vpop.f32.mrb[7].mxu1  ;;  %v811_v42 = vcombine.high %v728_v37, %v728_v37 }
 0x261   : > { %4202 = vmatpush3.xpose.msk.msra.mxu1 %vm865_vm2, %v728_v37 }
 0x262   : > { %4212 = vmatpush3.xpose.msk.msra.mxu0 %vm865_vm2, %v731_v40  ;;  %4206 = vmatprep.subr.mxu1 %v5129_v0  ;;  %v812_v44 = vcombine.high %v731_v40, %v731_v40 }
 0x263   : > { %4221 = vmatprep.subr.mxu0 %v5129_v0 }
 0x264   : > { %4204 = vmatmul.mubr.msk.f32.vlgmr.msra.gmra.mrb[8].mxu1 %vm865_vm2, %v681_v28  ;;  %791 = vrot.lane.b32.xlu1 %v784_v43, %s5132_s20 }
 0x265   : > { %813 = vrot.lane.b32.xlu0 %v728_v37, %s5132_s20  ;;  %4207 = vmatpush3.xpose.msk.msra.mxu1 %vm865_vm2, %v811_v42 }
 0x266   : > { %4214 = vmatmul.mubr.msk.f32.vlgmr.msra.gmra.mrb[4].mxu0 %vm865_vm2, %v684_v33  ;;  %4208 = vmatprep.mubr.msk.f32.mxu1 %vm5130_vm0, %v5129_v0 }
 0x267   : > { %4216 = vmatprep.subr.mxu1 %v5129_v0  ;;  %4223 = vmatprep.mubr.msk.f32.mxu0 %vm5130_vm0, %v5129_v0 }
 0x268   : > { %4209 = vmatmul.mubr.msk.f32.vlgmr.msra.gmra.mrb[10].mxu1 %vm865_vm2, %v783_v34  ;;  %799 = vrot.lane.b32.xlu1 %v784_v43, %s5131_s25 }
 0x269   : > { %821 = vrot.lane.b32.xlu0 %v728_v37, %s5131_s25  ;;  %4217 = vmatpush3.xpose.msk.msra.mxu1 %vm865_vm2, %v812_v44 }
 0x26a   : > { %4218 = vmatprep.mubr.msk.f32.mxu1 %vm5130_vm0, %v5129_v0  ;;  %4226 = vmatprep.subr.mxu1 %v5129_v0 }
 0x26c   : > { %4219 = vmatmul.mubr.msk.f32.vlgmr.msra.gmra.mrb[12].mxu1 %vm865_vm2, %v784_v43  ;;  %823 = vrot.lane.b32.xlu1 %v811_v42, %s5131_s25 }
 0x26d   : > { %815 = vrot.lane.b32.xlu0 %v811_v42, %s5132_s20  ;;  %4228 = vmatprep.mubr.msk.f32.mxu1 %vm5130_vm0, %v5129_v0 }
 0x270   : > { %819 = vrot.lane.b32.xlu1 %v812_v44, %s5132_s20 }
 0x271   : > { %817 = vrot.lane.b32.xlu0 %v731_v40, %s5132_s20 }
 0x274   : > { %831 = vrot.lane.b32.xlu1 %v811_v42, %s5133_s23 }
 0x275   : > { %829 = vrot.lane.b32.xlu0 %v728_v37, %s5133_s23 }
 0x278   : > { %827 = vrot.lane.b32.xlu1 %v812_v44, %s5131_s25 }
 0x279   : > { %825 = vrot.lane.b32.xlu0 %v731_v40, %s5131_s25 }
 0x27c   : > { %803 = vrot.lane.b32.xlu1 %v783_v34, %s5133_s23 }
 0x27d   : > { %801 = vrot.lane.b32.xlu0 %v681_v28, %s5133_s23 }
 0x280   : > { %835 = vrot.lane.b32.xlu1 %v812_v44, %s5133_s23 }
 0x281   : > { %833 = vrot.lane.b32.xlu0 %v731_v40, %s5133_s23 }
 0x284   : > { %807 = vrot.lane.b32.xlu1 %v784_v43, %s5133_s23 }
 0x285   : > { %805 = vrot.lane.b32.xlu0 %v684_v33, %s5133_s23 }
 0x288   : > { %841 = vrot.lane.b32.xlu1 %v5699_v51, %s5132_s20 }
 0x289   : > { %843 = vrot.lane.b32.xlu0 %v5705_v52, %s5132_s20 }
 0x28c   : > { %845 = vrot.lane.b32.xlu1 %v5709_v53, %s5132_s20 }
 0x28d   : > { %849 = vrot.lane.b32.xlu0 %v5699_v51, %s5131_s25 }
 0x290   : > { %847 = vrot.lane.b32.xlu1 %v5717_v54, %s5132_s20  ;;  %s6228_s20 = sld [smem:[#allocation38_spill]] }
 0x294   : > { %851 = vrot.lane.b32.xlu1 %v5705_v52, %s5131_s25 }
 0x2ca   : > { %v794_v55 = vpop.permute.xlu0 %793  ;;  %v786_v56 = vpop.permute.xlu1 %785 }
 0x2ce   : > { %v788_v57 = vpop.permute.xlu1 %787  ;;  %v790_v58 = vpop.permute.xlu0 %789 }
 0x2d2   : > { %v796_v59 = vpop.permute.xlu1 %795  ;;  %v798_v60 = vpop.permute.xlu0 %797 }
 0x2d6   : > { %v792_v61 = vpop.permute.xlu1 %791 }
 0x2d7   : > { %v814_v62 = vpop.permute.xlu0 %813 }
 0x2d8   : > { %4222 = vmatpush3.xpose.msk.msra.mxu0 %vm865_vm2, %v814_v62 }
 0x2d9   : > { %4231 = vmatprep.subr.mxu0 %v5129_v0 }
 0x2da   : > { %v800_v63 = vpop.permute.xlu1 %799 }
 0x2db   : > { %v822_v1 = vpop.permute.xlu0 %821  ;;  %4224 = vmatmul.mubr.msk.f32.vlgmr.msra.gmra.mrb[6].mxu0 %vm865_vm2, %v786_v56 }
 0x2dc   : > { %4233 = vmatprep.mubr.msk.f32.mxu0 %vm5130_vm0, %v5129_v0 }
 0x2de   : > { %v824_v2 = vpop.permute.xlu1 %823 }
 0x2df   : > { %v816_v3 = vpop.permute.xlu0 %815 }
 0x2e0   : > { %4227 = vmatpush3.xpose.msk.msra.mxu1 %vm865_vm2, %v816_v3 }
 0x2e1   : > { %4236 = vmatprep.subr.mxu1 %v5129_v0 }
 0x2e2   : > { %v820_v4 = vpop.permute.xlu1 %819 }
 0x2e3   : > { %v818_v5 = vpop.permute.xlu0 %817  ;;  %4229 = vmatmul.mubr.msk.f32.vlgmr.msra.gmra.mrb[14].mxu1 %vm865_vm2, %v788_v57 }
 0x2e4   : > { %4232 = vmatpush3.xpose.msk.msra.mxu0 %vm865_vm2, %v818_v5  ;;  %4237 = vmatpush3.xpose.msk.msra.mxu1 %vm865_vm2, %v820_v4 }
 0x2e5   : > { %4238 = vmatprep.mubr.msk.f32.mxu1 %vm5130_vm0, %v5129_v0  ;;  %4241 = vmatprep.subr.mxu0 %v5129_v0 }
 0x2e6   : > { %v832_v6 = vpop.permute.xlu1 %831  ;;  %4246 = vmatprep.subr.mxu1 %v5129_v0 }
 0x2e7   : > { %v830_v7 = vpop.permute.xlu0 %829  ;;  %4234 = vmatmul.mubr.msk.f32.vlgmr.msra.gmra.mrb[8].mxu0 %vm865_vm2, %v790_v58  ;;  %4239 = vmatmul.mubr.msk.f32.vlgmr.msra.gmra.mrb[16].mxu1 %vm865_vm2, %v792_v61 }
 0x2e8   : > { %4242 = vmatpush3.xpose.msk.msra.mxu0 %vm865_vm2, %v822_v1  ;;  %4247 = vmatpush3.xpose.msk.msra.mxu1 %vm865_vm2, %v824_v2 }
 0x2e9   : > { %4243 = vmatprep.mubr.msk.f32.mxu0 %vm5130_vm0, %v5129_v0  ;;  %4248 = vmatprep.mubr.msk.f32.mxu1 %vm5130_vm0, %v5129_v0 }
 0x2ea   : > { %4251 = vmatprep.subr.mxu0 %v5129_v0  ;;  %v828_v8 = vpop.permute.xlu1 %827  ;;  %4256 = vmatprep.subr.mxu1 %v5129_v0 }
 0x2eb   : > { %v826_v9 = vpop.permute.xlu0 %825  ;;  %4244 = vmatmul.mubr.msk.f32.vlgmr.msra.gmra.mrb[10].mxu0 %vm865_vm2, %v794_v55  ;;  %4249 = vmatmul.mubr.msk.f32.vlgmr.msra.gmra.mrb[18].mxu1 %vm865_vm2, %v796_v59 }
 0x2ec   : > { %4252 = vmatpush3.xpose.msk.msra.mxu0 %vm865_vm2, %v826_v9  ;;  %4257 = vmatpush3.xpose.msk.msra.mxu1 %vm865_vm2, %v828_v8 }
 0x2ed   : > { %4253 = vmatprep.mubr.msk.f32.mxu0 %vm5130_vm0, %v5129_v0  ;;  %4258 = vmatprep.mubr.msk.f32.mxu1 %vm5130_vm0, %v5129_v0 }
 0x2ee   : > { %4261 = vmatprep.subr.mxu0 %v5129_v0  ;;  %v804_v10 = vpop.permute.xlu1 %803  ;;  %4266 = vmatprep.subr.mxu1 %v5129_v0 }
 0x2ef   : > { %v802_v11 = vpop.permute.xlu0 %801  ;;  %4254 = vmatmul.mubr.msk.f32.vlgmr.msra.gmra.mrb[12].mxu0 %vm865_vm2, %v798_v60  ;;  %4259 = vmatmul.mubr.msk.f32.vlgmr.msra.gmra.mrb[20].mxu1 %vm865_vm2, %v800_v63 }
 0x2f0   : > { %4262 = vmatpush3.xpose.msk.msra.mxu0 %vm865_vm2, %v830_v7  ;;  %4267 = vmatpush3.xpose.msk.msra.mxu1 %vm865_vm2, %v832_v6 }
 0x2f1   : > { %4263 = vmatprep.mubr.msk.f32.mxu0 %vm5130_vm0, %v5129_v0  ;;  %4268 = vmatprep.mubr.msk.f32.mxu1 %vm5130_vm0, %v5129_v0 }
 0x2f2   : > { %4271 = vmatprep.subr.mxu0 %v5129_v0  ;;  %v836_v12 = vpop.permute.xlu1 %835  ;;  %4276 = vmatprep.subr.mxu1 %v5129_v0 }
 0x2f3   : > { %v834_v13 = vpop.permute.xlu0 %833  ;;  %4264 = vmatmul.mubr.msk.f32.vlgmr.msra.gmra.mrb[14].mxu0 %vm865_vm2, %v802_v11  ;;  %4269 = vmatmul.mubr.msk.f32.vlgmr.msra.gmra.mrb[22].mxu1 %vm865_vm2, %v804_v10 }
 0x2f4   : > { %4272 = vmatpush3.xpose.msk.msra.mxu0 %vm865_vm2, %v834_v13  ;;  %4277 = vmatpush3.xpose.msk.msra.mxu1 %vm865_vm2, %v836_v12 }
 0x2f5   : > { %4273 = vmatprep.mubr.msk.f32.mxu0 %vm5130_vm0, %v5129_v0  ;;  %4278 = vmatprep.mubr.msk.f32.mxu1 %vm5130_vm0, %v5129_v0 }
 0x2f6   : > { %v808_v14 = vpop.permute.xlu1 %807  ;;  %4281 = vmatprep.subr.mxu0 %v5129_v0  ;;  %4286 = vmatprep.subr.mxu1 %v5129_v0 }
 0x2f7   : > { %v806_v15 = vpop.permute.xlu0 %805  ;;  %4279 = vmatmul.mubr.msk.f32.vlgmr.msra.gmra.mrb[24].mxu1 %vm865_vm2, %v808_v14 }
 0x2f8   : > { %4274 = vmatmul.mubr.msk.f32.vlgmr.msra.gmra.mrb[16].mxu0 %vm865_vm2, %v806_v15  ;;  %4287 = vmatpush3.msk.msra.mxu1 %vm2247_vm3, %v5705_v52 }
 0x2f9   : > { %4282 = vmatpush3.msk.msra.mxu0 %vm2247_vm3, %v5699_v51  ;;  %4283 = vmatprep.mubr.msk.f32.mxu0 %vm5130_vm0, %v5129_v0 }
 0x2fa   : > { %4288 = vmatprep.mubr.msk.f32.mxu1 %vm5130_vm0, %v5129_v0  ;;  %4291 = vmatprep.subr.mxu0 %v5129_v0 }
 0x2fb   : > { %4296 = vmatprep.subr.mxu1 %v5129_v0 }
 0x337   : > { %v936_v16 = vpop.f32.mrb[8].mxu1 }
 0x338   : > { %v5791_v17 = vmul.f32 0.35355338, %v936_v16  ;;  %v4205_v18 = vpop.f32.mrb[9].mxu1 }
 0x339   : > { %v1084_v19 = vpop.f32.mrb[4].mxu0 }
 0x33a   : > { %v5793_v20 = vmul.f32 0.35355338, %v1084_v19  ;;  %v4215_v21 = vpop.f32.mrb[5].mxu0  ;;  %v2067_v22 = vsel %vm2066_vm4, %v5791_v17, -inf }
 0x33b   : > { %2068 = vmax.xlane.f32.xlu0 %v2067_v22  ;;  %v1010_v23 = vpop.f32.mrb[10].mxu1 }
 0x33c   : > { %v5797_v24 = vmul.f32 0.35355338, %v1010_v23  ;;  %v4210_v25 = vpop.f32.mrb[11].mxu1  ;;  %v2073_v26 = vsel %vm2066_vm4, %v5793_v20, -inf  ;;  %v5855_v23 = vpop.permute.xlu1 %841 }
 0x33d   : > { %v5857_v25 = vpop.permute.xlu0 %843 }
 0x33e   : > { %v2070_v27 = vsel %vm2066_vm4, %v5797_v24, -inf }
 0x33f   : > { %2074 = vmax.xlane.f32.xlu0 %v2073_v26  ;;  %2071 = vmax.xlane.f32.xlu1 %v2070_v27  ;;  %v1158_v28 = vpop.f32.mrb[12].mxu1 }
 0x340   : > { %v5803_v29 = vmul.f32 0.35355338, %v1158_v28  ;;  %v4220_v30 = vpop.f32.mrb[13].mxu1  ;;  %v5859_v26 = vpop.permute.xlu1 %845 }
 0x341   : > { %v5861_v27 = vpop.permute.xlu0 %849 }
 0x342   : > { %v2076_v31 = vsel %vm2066_vm4, %v5803_v29, -inf }
 0x343   : > { %2077 = vmax.xlane.f32.xlu0 %v2076_v31 }
 0x344   : > { %v5865_v28 = vpop.permute.xlu1 %847 }
 0x348   : > { %v5871_v31 = vpop.permute.xlu1 %851 }
 0x3ae   : > { %v1232_v32 = vpop.f32.mrb[6].mxu0 }
 0x3af   : > { %v5807_v33 = vmul.f32 0.35355338, %v1232_v32  ;;  %v4225_v34 = vpop.f32.mrb[7].mxu0 }
 0x3b1   : > { %v2079_v35 = vsel %vm2066_vm4, %v5807_v33, -inf }
 0x3b2   : > { %2080 = vmax.xlane.f32.xlu1 %v2079_v35 }
 0x3b6   : > { %v1306_v36 = vpop.f32.mrb[14].mxu1 }
 0x3b7   : > { %v5811_v37 = vmul.f32 0.35355338, %v1306_v36  ;;  %v4230_v38 = vpop.f32.mrb[15].mxu1 }
 0x3b9   : > { %v2082_v39 = vsel %vm2066_vm4, %v5811_v37, -inf }
 0x3ba   : > { %v1380_v40 = vpop.f32.mrb[8].mxu0  ;;  %2083 = vmax.xlane.f32.xlu0 %v2082_v39  ;;  %v1454_v41 = vpop.f32.mrb[16].mxu1 }
 0x3bb   : > { %v5815_v42 = vmul.f32 0.35355338, %v1380_v40  ;;  %v5817_v43 = vmul.f32 0.35355338, %v1454_v41  ;;  %v4235_v44 = vpop.f32.mrb[9].mxu0  ;;  %v4240_v45 = vpop.f32.mrb[17].mxu1 }
 0x3bd   : > { %v2085_v46 = vsel %vm2066_vm4, %v5815_v42, -inf  ;;  %v2088_v47 = vsel %vm2066_vm4, %v5817_v43, -inf }
 0x3be   : > { %v1528_v48 = vpop.f32.mrb[10].mxu0  ;;  %2086 = vmax.xlane.f32.xlu1 %v2085_v46  ;;  %2089 = vmax.xlane.f32.xlu0 %v2088_v47  ;;  %v1602_v49 = vpop.f32.mrb[18].mxu1 }
 0x3bf   : > { %v5823_v50 = vmul.f32 0.35355338, %v1528_v48  ;;  %v5825_v55 = vmul.f32 0.35355338, %v1602_v49  ;;  %v4245_v56 = vpop.f32.mrb[11].mxu0  ;;  %v4250_v57 = vpop.f32.mrb[19].mxu1 }
 0x3c1   : > { %v2091_v58 = vsel %vm2066_vm4, %v5823_v50, -inf  ;;  %v2094_v59 = vsel %vm2066_vm4, %v5825_v55, -inf }
 0x3c2   : > { %v1676_v60 = vpop.f32.mrb[12].mxu0  ;;  %2092 = vmax.xlane.f32.xlu1 %v2091_v58  ;;  %2095 = vmax.xlane.f32.xlu0 %v2094_v59  ;;  %v1750_v61 = vpop.f32.mrb[20].mxu1 }
 0x3c3   : > { %v5831_v62 = vmul.f32 0.35355338, %v1676_v60  ;;  %v5833_v63 = vmul.f32 0.35355338, %v1750_v61  ;;  %v4255_v1 = vpop.f32.mrb[13].mxu0  ;;  %v4260_v2 = vpop.f32.mrb[21].mxu1 }
 0x3c5   : > { %v2097_v3 = vsel %vm2066_vm4, %v5831_v62, -inf  ;;  %v2100_v4 = vsel %vm2066_vm4, %v5833_v63, -inf }
 0x3c6   : > { %v1824_v5 = vpop.f32.mrb[14].mxu0  ;;  %2098 = vmax.xlane.f32.xlu1 %v2097_v3  ;;  %2101 = vmax.xlane.f32.xlu0 %v2100_v4  ;;  %v1898_v6 = vpop.f32.mrb[22].mxu1 }
 0x3c7   : > { %v5839_v7 = vmul.f32 0.35355338, %v1824_v5  ;;  %v5841_v8 = vmul.f32 0.35355338, %v1898_v6  ;;  %v4265_v9 = vpop.f32.mrb[15].mxu0  ;;  %v4270_v10 = vpop.f32.mrb[23].mxu1 }
 0x3c8   : > { %v2069_v30 = vpop.xlane.xlu0 %2068 }
 0x3c9   : > { %v2103_v11 = vsel %vm2066_vm4, %v5839_v7, -inf  ;;  %v2106_v12 = vsel %vm2066_vm4, %v5841_v8, -inf  ;;  %v2115_v36 = vsub.f32 %v5791_v17, %v2069_v30 }
 0x3ca   : > { %2104 = vmax.xlane.f32.xlu1 %v2103_v11  ;;  %2107 = vmax.xlane.f32.xlu0 %v2106_v12  ;;  %v2046_v13 = vpop.f32.mrb[24].mxu1 }
 0x3cb   : > { %v1972_v14 = vpop.f32.mrb[16].mxu0  ;;  %v5847_v15 = vmul.f32 0.35355338, %v2046_v13  ;;  %v4280_v16 = vpop.f32.mrb[25].mxu1 }
 0x3cc   : > { %v5849_v18 = vmul.f32 0.35355338, %v1972_v14  ;;  %v4275_v19 = vpop.f32.mrb[17].mxu0  ;;  %v2075_v32 = vpop.xlane.xlu0 %2074 }
 0x3cd   : > { %v2112_v21 = vsel %vm2066_vm4, %v5847_v15, -inf  ;;  %v2072_v34 = vpop.xlane.xlu1 %2071  ;;  %v2117_v41 = vsub.f32 %v5793_v20, %v2075_v32 }
 0x3ce   : > { %v2109_v22 = vsel %vm2066_vm4, %v5849_v18, -inf  ;;  %2113 = vmax.xlane.f32.xlu0 %v2112_v21  ;;  %v2116_v35 = vsub.f32 %v5797_v24, %v2072_v34 }
 0x3cf   : > { %2110 = vmax.xlane.f32.xlu1 %v2109_v22  ;;  %v2135_v45 = vmul.f32 1.442695, %v2117_v41 }
 0x3d0   : > { %v2078_v38 = vpop.xlane.xlu0 %2077  ;;  %v2133_v39 = vmul.f32 1.442695, %v2116_v35 }
 0x3d1   : > { %v2118_v40 = vsub.f32 %v5803_v29, %v2078_v38 }
 0x3d2   : > { %4582 = vpow2.f32 %v2133_v39 }
 0x3d3   : > { %v2137_v44 = vmul.f32 1.442695, %v2118_v40 }
 0x3e0   : > { %855 = vrot.lane.b32.xlu1 %v5717_v54, %s5131_s25 }
 0x3e4   : > { %859 = vrot.lane.b32.xlu1 %v5705_v52, %s5133_s23  ;;  %853 = vrot.lane.b32.xlu0 %v5709_v53, %s5131_s25  ;;  %v2131_v52 = vmul.f32 1.442695, %v2115_v36 }
 0x3e6   : > { %4584 = vpow2.f32 %v2131_v52 }
 0x3e7   : > { %4586 = vpow2.f32 %v2137_v44 }
 0x3e8   : > { %857 = vrot.lane.b32.xlu0 %v5699_v51, %s5133_s23  ;;  %4588 = vpow2.f32 %v2135_v45  ;;  %v5879_v51 = vpop.eup %4582 }
 0x3e9   : > { %v2166_v17 = vsel %vm2066_vm4, %v5879_v51, 0.0 }
 0x3f0   : > { %v5881_v46 = vpop.eup %4584 }
 0x3f1   : > { %v5885_v24 = vpop.eup %4586  ;;  %v2163_v29 = vsel %vm2066_vm4, %v5881_v46, 0.0 }
 0x3f2   : > { %v5889_v20 = vpop.eup %4588  ;;  %v2172_v47 = vsel %vm2066_vm4, %v5885_v24, 0.0 }
 0x3f3   : > { %v2169_v48 = vsel %vm2066_vm4, %v5889_v20, 0.0 }
 0x407   : > { %2167 = vadd.xlane.f32.xlu0 %v2166_v17 }
 0x408   : > { %2164 = vadd.xlane.f32.xlu1 %v2163_v29 }
 0x40b   : > { %2173 = vadd.xlane.f32.xlu0 %v2172_v47 }
 0x40c   : > { %2170 = vadd.xlane.f32.xlu1 %v2169_v48 }
 0x43f   : > { %v2081_v49 = vpop.xlane.xlu1 %2080 }
 0x440   : > { %v2119_v56 = vsub.f32 %v5807_v33, %v2081_v49 }
 0x442   : > { %v2139_v57 = vmul.f32 1.442695, %v2119_v56 }
 0x444   : > { %4590 = vpow2.f32 %v2139_v57 }
 0x447   : > { %v2084_v58 = vpop.xlane.xlu0 %2083 }
 0x448   : > { %v2120_v59 = vsub.f32 %v5811_v37, %v2084_v58 }
 0x44a   : > { %v2141_v60 = vmul.f32 1.442695, %v2120_v59 }
 0x44b   : > { %v2087_v61 = vpop.xlane.xlu1 %2086  ;;  %v2090_v1 = vpop.xlane.xlu0 %2089 }
 0x44c   : > { %4592 = vpow2.f32 %v2141_v60  ;;  %v2121_v2 = vsub.f32 %v5815_v42, %v2087_v61  ;;  %v2122_v3 = vsub.f32 %v5817_v43, %v2090_v1 }
 0x44e   : > { %v5899_v4 = vpop.eup %4590  ;;  %v2143_v5 = vmul.f32 1.442695, %v2121_v2  ;;  %v2145_v6 = vmul.f32 1.442695, %v2122_v3 }
 0x44f   : > { %v2093_v9 = vpop.xlane.xlu1 %2092  ;;  %v2096_v10 = vpop.xlane.xlu0 %2095  ;;  %v2175_v33 = vsel %vm2066_vm4, %v5899_v4, 0.0 }
 0x450   : > { %4594 = vpow2.f32 %v2143_v5  ;;  %v2123_v37 = vsub.f32 %v5823_v50, %v2093_v9  ;;  %v2124_v11 = vsub.f32 %v5825_v55, %v2096_v10  ;;  %2176 = vadd.xlane.f32.xlu1 %v2175_v33 }
 0x451   : > { %4596 = vpow2.f32 %v2145_v6 }
 0x452   : > { %v2147_v12 = vmul.f32 1.442695, %v2123_v37  ;;  %v2149_v42 = vmul.f32 1.442695, %v2124_v11 }
 0x453   : > { %v2099_v13 = vpop.xlane.xlu1 %2098  ;;  %v2102_v43 = vpop.xlane.xlu0 %2101 }
 0x454   : > { %4598 = vpow2.f32 %v2147_v12  ;;  %v2125_v14 = vsub.f32 %v5831_v62, %v2099_v13  ;;  %v2126_v16 = vsub.f32 %v5833_v63, %v2102_v43 }
 0x455   : > { %4600 = vpow2.f32 %v2149_v42 }
 0x456   : > { %v5907_v19 = vpop.eup %4592  ;;  %v2151_v21 = vmul.f32 1.442695, %v2125_v14  ;;  %v2153_v22 = vmul.f32 1.442695, %v2126_v16 }
 0x457   : > { %v2105_v30 = vpop.xlane.xlu1 %2104  ;;  %v2108_v50 = vpop.xlane.xlu0 %2107  ;;  %v2178_v55 = vsel %vm2066_vm4, %v5907_v19, 0.0 }
 0x458   : > { %4602 = vpow2.f32 %v2151_v21  ;;  %v2127_v32 = vsub.f32 %v5839_v7, %v2105_v30  ;;  %v2128_v34 = vsub.f32 %v5841_v8, %v2108_v50  ;;  %2179 = vadd.xlane.f32.xlu0 %v2178_v55 }
 0x459   : > { %4604 = vpow2.f32 %v2153_v22 }
 0x45a   : > { %v5913_v62 = vpop.eup %4594  ;;  %v2155_v63 = vmul.f32 1.442695, %v2127_v32  ;;  %v2157_v35 = vmul.f32 1.442695, %v2128_v34 }
 0x45b   : > { %v5915_v36 = vpop.eup %4596  ;;  %v2181_v38 = vsel %vm2066_vm4, %v5913_v62, 0.0  ;;  %v2114_v39 = vpop.xlane.xlu0 %2113 }
 0x45c   : > { %4606 = vpow2.f32 %v2155_v63  ;;  %2182 = vadd.xlane.f32.xlu1 %v2181_v38  ;;  %v2111_v40 = vpop.xlane.xlu1 %2110  ;;  %v2184_v7 = vsel %vm2066_vm4, %v5915_v36, 0.0  ;;  %v2130_v8 = vsub.f32 %v5847_v15, %v2114_v39 }
 0x45d   : > { %4608 = vpow2.f32 %v2157_v35  ;;  %v2129_v52 = vsub.f32 %v5849_v18, %v2111_v40  ;;  %2185 = vadd.xlane.f32.xlu0 %v2184_v7 }
 0x45e   : > { %v5923_v41 = vpop.eup %4598  ;;  %v2161_v44 = vmul.f32 1.442695, %v2130_v8 }
 0x45f   : > { %v5925_v45 = vpop.eup %4600  ;;  %v2159_v17 = vmul.f32 1.442695, %v2129_v52  ;;  %v2187_v29 = vsel %vm2066_vm4, %v5923_v41, 0.0  ;;  %v5959_v3 = vpop.permute.xlu0 %853 }
 0x460   : > { %4610 = vpow2.f32 %v2161_v44  ;;  %2188 = vadd.xlane.f32.xlu1 %v2187_v29  ;;  %v2190_v47 = vsel %vm2066_vm4, %v5925_v45, 0.0  ;;  %v5961_v5 = vpop.permute.xlu1 %855 }
 0x461   : > { %4612 = vpow2.f32 %v2159_v17  ;;  %2191 = vadd.xlane.f32.xlu0 %v2190_v47 }
 0x462   : > { %v5931_v15 = vpop.eup %4602 }
 0x463   : > { %v5933_v18 = vpop.eup %4604  ;;  %v2193_v48 = vsel %vm2066_vm4, %v5931_v15, 0.0  ;;  %v5963_v6 = vpop.permute.xlu0 %857 }
 0x464   : > { %2194 = vadd.xlane.f32.xlu1 %v2193_v48  ;;  %v2196_v49 = vsel %vm2066_vm4, %v5933_v18, 0.0  ;;  %v5965_v9 = vpop.permute.xlu1 %859 }
 0x465   : > { %2197 = vadd.xlane.f32.xlu0 %v2196_v49 }
 0x466   : > { %v5939_v56 = vpop.eup %4606 }
 0x467   : > { %v5941_v57 = vpop.eup %4608  ;;  %v2199_v58 = vsel %vm2066_vm4, %v5939_v56, 0.0 }
 0x468   : > { %2200 = vadd.xlane.f32.xlu1 %v2199_v58  ;;  %v2202_v59 = vsel %vm2066_vm4, %v5941_v57, 0.0 }
 0x469   : > { %2203 = vadd.xlane.f32.xlu0 %v2202_v59 }
 0x46a   : > { %v5947_v60 = vpop.eup %4610 }
 0x46b   : > { %v5949_v61 = vpop.eup %4612  ;;  %v2208_v1 = vsel %vm2066_vm4, %v5947_v60, 0.0 }
 0x46c   : > { %v2205_v2 = vsel %vm2066_vm4, %v5949_v61, 0.0 }
 0x46d   : > { %2206 = vadd.xlane.f32.xlu1 %v2205_v2  ;;  %2209 = vadd.xlane.f32.xlu0 %v2208_v1 }
 0x47e   : > { %863 = vrot.lane.b32.xlu1 %v5717_v54, %s5133_s23 }
 0x483   : > { %861 = vrot.lane.b32.xlu0 %v5709_v53, %s5133_s23  ;;  %s6115_s23 = scalar_lea.hbm %s6228_s20, %s4092_s1 }
 0x494   : > { %v2168_v10 = vpop.xlane.xlu0 %2167 }
 0x495   : > { %v2165_v33 = vpop.xlane.xlu1 %2164  ;;  %4614 = vrcp.f32 %v2168_v10 }
 0x496   : > { %4616 = vrcp.f32 %v2165_v33 }
 0x498   : > { %v2174_v37 = vpop.xlane.xlu0 %2173 }
 0x499   : > { %v2171_v11 = vpop.xlane.xlu1 %2170  ;;  %4618 = vrcp.f32 %v2174_v37 }
 0x49a   : > { %4620 = vrcp.f32 %v2171_v11 }
 0x49f   : > { %v4615_v12 = vpop.eup %4614 }
 0x4a0   : > { %v4617_v42 = vpop.eup %4616  ;;  %v2228_v13 = vmul.f32 %v4615_v12, %v5879_v51 }
 0x4a1   : > { %v2227_v43 = vmul.f32 %v4617_v42, %v5881_v46 }
 0x4a2   : > { %4289 = vmatmul.mubr.msk.f32.vlgmr.msra.gmra.mrb[26].mxu1 %vm2243_vm5, %v2228_v13 }
 0x4a3   : > { %v4619_v14 = vpop.eup %4618  ;;  %4284 = vmatmul.mubr.msk.f32.vlgmr.msra.gmra.mrb[18].mxu0 %vm2243_vm5, %v2227_v43  ;;  %4297 = vmatpush3.msk.msra.mxu1 %vm2247_vm3, %v5717_v54  ;;  %v3497_v43 = vld [vmem:[#allocation8] sm:$0xff] }
 0x4a4   : > { %v4621_v16 = vpop.eup %4620  ;;  %v2230_v21 = vmul.f32 %v4619_v14, %v5885_v24  ;;  %4292 = vmatpush3.msk.msra.mxu0 %vm2247_vm3, %v5709_v53  ;;  %4293 = vmatprep.mubr.msk.f32.mxu0 %vm5130_vm0, %v5129_v0  ;;  %v3498_v14 = vld [vmem:[#allocation8 + $0x8] sm:$0xff] }
 0x4a5   : > { %v2229_v51 = vmul.f32 %v4621_v16, %v5889_v20  ;;  %4298 = vmatprep.mubr.msk.f32.mxu1 %vm5130_vm0, %v5129_v0  ;;  %4301 = vmatprep.subr.mxu0 %v5129_v0 }
 0x4a6   : > { %4306 = vmatprep.subr.mxu1 %v5129_v0  ;;  %4299 = vmatmul.mubr.msk.f32.vlgmr.msra.gmra.mrb[28].mxu1 %vm2243_vm5, %v2230_v21 }
 0x4a7   : > { %4294 = vmatmul.mubr.msk.f32.vlgmr.msra.gmra.mrb[20].mxu0 %vm2243_vm5, %v2229_v51  ;;  %4307 = vmatpush3.msk.msra.mxu1 %vm2247_vm3, %v5857_v25  ;;  %v3502_v51 = vpack.c.bf16 %v3498_v14, %v3497_v43 }
 0x4a8   : > { %4302 = vmatpush3.msk.msra.mxu0 %vm2247_vm3, %v5855_v23  ;;  %4303 = vmatprep.mubr.msk.f32.mxu0 %vm5130_vm0, %v5129_v0 }
 0x4a9   : > { %4311 = vmatprep.subr.mxu0 %v5129_v0  ;;  %4308 = vmatprep.mubr.msk.f32.mxu1 %vm5130_vm0, %v5129_v0 }
 0x4aa   : > { %4316 = vmatprep.subr.mxu1 %v5129_v0 }
 0x4dd   : > { %v2177_v53 = vpop.xlane.xlu1 %2176 }
 0x4de   : > { %4622 = vrcp.f32 %v2177_v53 }
 0x4e5   : > { %v2180_v54 = vpop.xlane.xlu0 %2179 }
 0x4e6   : > { %4624 = vrcp.f32 %v2180_v54 }
 0x4e8   : > { %v4623_v46 = vpop.eup %4622 }
 0x4e9   : > { %v2231_v25 = vmul.f32 %v4623_v46, %v5899_v4  ;;  %v2183_v24 = vpop.xlane.xlu1 %2182 }
 0x4ea   : > { %4626 = vrcp.f32 %v2183_v24  ;;  %v2186_v23 = vpop.xlane.xlu0 %2185 }
 0x4eb   : > { %4628 = vrcp.f32 %v2186_v23  ;;  %4304 = vmatmul.mubr.msk.f32.vlgmr.msra.gmra.mrb[22].mxu0 %vm2243_vm5, %v2231_v25 }
 0x4ec   : > { %4312 = vmatpush3.msk.msra.mxu0 %vm2247_vm3, %v5859_v26  ;;  %4313 = vmatprep.mubr.msk.f32.mxu0 %vm5130_vm0, %v5129_v0 }
 0x4ed   : > { %v2189_v20 = vpop.xlane.xlu1 %2188  ;;  %4321 = vmatprep.subr.mxu0 %v5129_v0 }
 0x4ee   : > { %4630 = vrcp.f32 %v2189_v20  ;;  %v2192_v22 = vpop.xlane.xlu0 %2191 }
 0x4ef   : > { %4632 = vrcp.f32 %v2192_v22 }
 0x4f0   : > { %v4625_v30 = vpop.eup %4624 }
 0x4f1   : > { %v2232_v4 = vmul.f32 %v4625_v30, %v5907_v19  ;;  %v2195_v50 = vpop.xlane.xlu1 %2194 }
 0x4f2   : > { %4634 = vrcp.f32 %v2195_v50  ;;  %v2198_v55 = vpop.xlane.xlu0 %2197  ;;  %v3500_v50 = vld [vmem:[#allocation8 + $0x18] sm:$0xff] }
 0x4f3   : > { %4636 = vrcp.f32 %v2198_v55  ;;  %4309 = vmatmul.mubr.msk.f32.vlgmr.msra.gmra.mrb[30].mxu1 %vm2243_vm5, %v2232_v4  ;;  %v3499_v4 = vld [vmem:[#allocation8 + $0x10] sm:$0xff] }
 0x4f4   : > { %v4627_v32 = vpop.eup %4626  ;;  %4317 = vmatpush3.msk.msra.mxu1 %vm2247_vm3, %v5865_v28  ;;  %4318 = vmatprep.mubr.msk.f32.mxu1 %vm5130_vm0, %v5129_v0  ;;  %v3503_v55 = vpack.c.bf16 %v3500_v50, %v3499_v4  ;;  %v3665_v50 = vld [vmem:[#allocation17 + $0x18] sm:$0xff] }
 0x4f5   : > { %v4629_v26 = vpop.eup %4628  ;;  %v2233_v34 = vmul.f32 %v4627_v32, %v5913_v62  ;;  %v2201_v63 = vpop.xlane.xlu1 %2200  ;;  %4326 = vmatprep.subr.mxu1 %v5129_v0 }
 0x4f6   : > { %v2234_v19 = vmul.f32 %v4629_v26, %v5915_v36  ;;  %4638 = vrcp.f32 %v2201_v63  ;;  %v2204_v35 = vpop.xlane.xlu0 %2203 }
 0x4f7   : > { %4640 = vrcp.f32 %v2204_v35  ;;  %4314 = vmatmul.mubr.msk.f32.vlgmr.msra.gmra.mrb[24].mxu0 %vm2243_vm5, %v2233_v34 }
 0x4f8   : > { %v4631_v38 = vpop.eup %4630  ;;  %4319 = vmatmul.mubr.msk.f32.vlgmr.msra.gmra.mrb[32].mxu1 %vm2243_vm5, %v2234_v19  ;;  %4322 = vmatpush3.msk.msra.mxu0 %vm2247_vm3, %v5861_v27 }
 0x4f9   : > { %v4633_v28 = vpop.eup %4632  ;;  %v2235_v39 = vmul.f32 %v4631_v38, %v5923_v41  ;;  %4327 = vmatpush3.msk.msra.mxu1 %vm2247_vm3, %v5871_v31  ;;  %4323 = vmatprep.mubr.msk.f32.mxu0 %vm5130_vm0, %v5129_v0 }
 0x4fa   : > { %v2236_v62 = vmul.f32 %v4633_v28, %v5925_v45  ;;  %4331 = vmatprep.subr.mxu0 %v5129_v0  ;;  %v2207_v36 = vpop.xlane.xlu1 %2206  ;;  %4328 = vmatprep.mubr.msk.f32.mxu1 %vm5130_vm0, %v5129_v0  ;;  %v2210_v40 = vpop.xlane.xlu0 %2209 }
 0x4fb   : > { %4642 = vrcp.f32 %v2207_v36  ;;  %4336 = vmatprep.subr.mxu1 %v5129_v0  ;;  %4324 = vmatmul.mubr.msk.f32.vlgmr.msra.gmra.mrb[26].mxu0 %vm2243_vm5, %v2235_v39 }
 0x4fc   : > { %v4635_v27 = vpop.eup %4634  ;;  %4644 = vrcp.f32 %v2210_v40  ;;  %4329 = vmatmul.mubr.msk.f32.vlgmr.msra.gmra.mrb[34].mxu1 %vm2243_vm5, %v2236_v62  ;;  %4332 = vmatpush3.msk.msra.mxu0 %vm2247_vm3, %v5959_v3 }
 0x4fd   : > { %v4637_v31 = vpop.eup %4636  ;;  %v2237_v7 = vmul.f32 %v4635_v27, %v5931_v15  ;;  %4337 = vmatpush3.msk.msra.mxu1 %vm2247_vm3, %v5961_v5  ;;  %4333 = vmatprep.mubr.msk.f32.mxu0 %vm5130_vm0, %v5129_v0 }
 0x4fe   : > { %v2238_v8 = vmul.f32 %v4637_v31, %v5933_v18  ;;  %4338 = vmatprep.mubr.msk.f32.mxu1 %vm5130_vm0, %v5129_v0  ;;  %4341 = vmatprep.subr.mxu0 %v5129_v0  ;;  %v862_v17 = vpop.permute.xlu0 %861  ;;  %v864_v29 = vpop.permute.xlu1 %863 }
 0x4ff   : > { %4346 = vmatprep.subr.mxu1 %v5129_v0  ;;  %4334 = vmatmul.mubr.msk.f32.vlgmr.msra.gmra.mrb[28].mxu0 %vm2243_vm5, %v2237_v7 }
 0x500   : > { %v4639_v52 = vpop.eup %4638  ;;  %4339 = vmatmul.mubr.msk.f32.vlgmr.msra.gmra.mrb[36].mxu1 %vm2243_vm5, %v2238_v8  ;;  %4342 = vmatpush3.msk.msra.mxu0 %vm2247_vm3, %v5963_v6 }
 0x501   : > { %v4641_v41 = vpop.eup %4640  ;;  %v2239_v44 = vmul.f32 %v4639_v52, %v5939_v56  ;;  %4347 = vmatpush3.msk.msra.mxu1 %vm2247_vm3, %v5965_v9  ;;  %4343 = vmatprep.mubr.msk.f32.mxu0 %vm5130_vm0, %v5129_v0 }
 0x502   : > { %v2240_v45 = vmul.f32 %v4641_v41, %v5941_v57  ;;  %4348 = vmatprep.mubr.msk.f32.mxu1 %vm5130_vm0, %v5129_v0  ;;  %4351 = vmatprep.subr.mxu0 %v5129_v0 }
 0x503   : > { %4356 = vmatprep.subr.mxu1 %v5129_v0  ;;  %4344 = vmatmul.mubr.msk.f32.vlgmr.msra.gmra.mrb[30].mxu0 %vm2243_vm5, %v2239_v44 }
 0x504   : > { %4349 = vmatmul.mubr.msk.f32.vlgmr.msra.gmra.mrb[38].mxu1 %vm2243_vm5, %v2240_v45  ;;  %4352 = vmatpush3.msk.msra.mxu0 %vm2247_vm3, %v862_v17 }
 0x505   : > { %v4643_v47 = vpop.eup %4642  ;;  %4357 = vmatpush3.msk.msra.mxu1 %vm2247_vm3, %v864_v29  ;;  %4353 = vmatprep.mubr.msk.f32.mxu0 %vm5130_vm0, %v5129_v0 }
 0x506   : > { %v4645_v15 = vpop.eup %4644  ;;  %v2241_v18 = vmul.f32 %v4643_v47, %v5949_v61  ;;  %4358 = vmatprep.mubr.msk.f32.mxu1 %vm5130_vm0, %v5129_v0  ;;  %4361 = vmatprep.subr.bf16.mxu0 %v5129_v0 }
 0x507   : > { %v2242_v48 = vmul.f32 %v4645_v15, %v5947_v60  ;;  %4369 = vmatprep.subr.bf16.mxu1 %v5129_v0 }
 0x508   : > { %4354 = vmatmul.mubr.msk.f32.vlgmr.msra.gmra.mrb[32].mxu0 %vm2243_vm5, %v2241_v18 }
 0x509   : > { %4359 = vmatmul.mubr.msk.f32.vlgmr.msra.gmra.mrb[40].mxu1 %vm2243_vm5, %v2242_v48  ;;  %4365 = vmatprep.mubr.msk.bf16.mxu0 %vm5130_vm0, %v5129_v0 }
 0x50a   : > { %4373 = vmatprep.mubr.msk.bf16.mxu1 %vm5130_vm0, %v5129_v0  ;;  %4362 = vmatpush3.bf16.msra.mxu0 %v3502_v51 }
 0x50b   : > { %4363 = vmatprep.subr.bf16.mxu0 %v5129_v0 }
 0x50e   : > { %4364 = vmatpush3.bf16.msra.mxu0 %v3503_v55 }
 0x50f   : > { %4377 = vmatprep.subr.bf16.mxu0 %v5129_v0 }
 0x575   : > { %v6071_v49 = vpop.f32.mrb[26].mxu1 }
 0x576   : > { %v6073_v56 = vpop.f32.mrb[18].mxu0  ;;  %v4290_v57 = vpop.f32.mrb[27].mxu1 }
 0x577   : > { %v3449_v58 = vcombine.low %v6073_v56, %v6071_v49  ;;  %v4285_v59 = vpop.f32.mrb[19].mxu0 }
 0x579   : > { %v6077_v60 = vpop.f32.mrb[28].mxu1 }
 0x57a   : > { %v6079_v61 = vpop.f32.mrb[20].mxu0  ;;  %v4300_v1 = vpop.f32.mrb[29].mxu1 }
 0x57b   : > { %v3450_v2 = vcombine.low %v6079_v61, %v6077_v60  ;;  %v4295_v3 = vpop.f32.mrb[21].mxu0  ;;  %v4076_v60 = vld [vmem:[#allocation10] ss:$0 sm:$0xff] }
 0x57c   : > { %v4654_v3 = vld [vmem:[%s5594_s13] sm:$0xff] }
 0x5be   : > { %v2616_v5 = vpop.f32.mrb[22].mxu0 }
 0x5bf   : > { %v4305_v6 = vpop.f32.mrb[23].mxu0 }
 0x5c6   : > { %v2691_v9 = vpop.f32.mrb[30].mxu1 }
 0x5c7   : > { %v3457_v10 = vcombine.low %v2616_v5, %v2691_v9  ;;  %v4310_v33 = vpop.f32.mrb[31].mxu1  ;;  %v4655_v9 = vld [vmem:[%s5594_s13 + $0x8] sm:$0xff] }
 0x5ca   : > { %v2766_v37 = vpop.f32.mrb[24].mxu0 }
 0x5cb   : > { %v2841_v11 = vpop.f32.mrb[32].mxu1  ;;  %v4315_v12 = vpop.f32.mrb[25].mxu0 }
 0x5cc   : > { %v3458_v42 = vcombine.low %v2766_v37, %v2841_v11  ;;  %v4320_v13 = vpop.f32.mrb[33].mxu1 }
 0x5ce   : > { %v4567_v16 = vpack.i.bf16 %v3458_v42, %v3457_v10  ;;  %v2916_v21 = vpop.f32.mrb[26].mxu0 }
 0x5cf   : > { %v2991_v53 = vpop.f32.mrb[34].mxu1  ;;  %v4325_v54 = vpop.f32.mrb[27].mxu0 }
 0x5d0   : > { %v3469_v46 = vcombine.low %v2916_v21, %v2991_v53  ;;  %4568 = vrot.lane.b32.xlu0 %v4567_v16, %s5134_s15  ;;  %v4330_v25 = vpop.f32.mrb[35].mxu1  ;;  %v3602_v53 = vld [vmem:[#allocation14] sm:$0xff]  ;;  %v3603_v54 = vld [vmem:[#allocation14 + $0x8] sm:$0xff] }
 0x5d1   : > { %v3604_v25 = vld [vmem:[#allocation14 + $0x10] sm:$0xff] }
 0x5d2   : > { %v3066_v24 = vpop.f32.mrb[28].mxu0 }
 0x5d3   : > { %v3141_v23 = vpop.f32.mrb[36].mxu1  ;;  %v4335_v20 = vpop.f32.mrb[29].mxu0 }
 0x5d4   : > { %v3470_v22 = vcombine.low %v3066_v24, %v3141_v23  ;;  %v4340_v30 = vpop.f32.mrb[37].mxu1  ;;  %v3605_v24 = vld [vmem:[#allocation14 + $0x18] sm:$0xff]  ;;  %v3662_v20 = vld [vmem:[#allocation17] sm:$0xff] }
 0x5d5   : > { %v3608_v23 = vpack.c.bf16 %v3605_v24, %v3604_v25  ;;  %v3664_v30 = vld [vmem:[#allocation17 + $0x10] sm:$0xff] }
 0x5d6   : > { %v4572_v32 = vpack.i.bf16 %v3470_v22, %v3469_v46  ;;  %v3216_v26 = vpop.f32.mrb[30].mxu0  ;;  %v3607_v46 = vpack.c.bf16 %v3603_v54, %v3602_v53  ;;  %v3663_v22 = vld [vmem:[#allocation17 + $0x8] sm:$0xff]  ;;  %v3672_v55 = vpack.c.bf16 %v3665_v50, %v3664_v30 }
 0x5d7   : > { %v3291_v34 = vpop.f32.mrb[38].mxu1  ;;  %v4345_v63 = vpop.f32.mrb[31].mxu0  ;;  %v3671_v4 = vpack.c.bf16 %v3663_v22, %v3662_v20 }
 0x5d8   : > { %v3481_v19 = vcombine.low %v3216_v26, %v3291_v34  ;;  %4573 = vrot.lane.b32.xlu1 %v4572_v32, %s5135_s14  ;;  %v4350_v35 = vpop.f32.mrb[39].mxu1  ;;  %4370 = vmatpush3.bf16.msra.mxu1 %v3607_v46  ;;  %s5137_s14 = smov [#allocation23]  }
 0x5d9   : > { %4371 = vmatprep.subr.bf16.mxu1 %v5129_v0 }
 0x5db   : > { %v3366_v38 = vpop.f32.mrb[32].mxu0 }
 0x5dc   : > { %v3441_v28 = vpop.f32.mrb[40].mxu1  ;;  %v4355_v39 = vpop.f32.mrb[33].mxu0  ;;  %4372 = vmatpush3.bf16.msra.mxu1 %v3608_v23 }
 0x5dd   : > { %v3482_v62 = vcombine.low %v3366_v38, %v3441_v28  ;;  %v4360_v36 = vpop.f32.mrb[41].mxu1  ;;  %v4078_v28 = vld [vmem:[#allocation11] ss:$0 sm:$0xff] }
 0x5df   : > { %v4577_v40 = vpack.i.bf16 %v3482_v62, %v3481_v19 }
 0x5e1   : > { %4578 = vrot.lane.b32.xlu0 %v4577_v40, %s5136_s16  ;;  %s5026_s16 = sshll.u32 %s5137_s14, 4  ;;  %s5027_s16 = int_to_ptr.vmem [resolvable:$false] %s5026_s16 }
 0x5e2   : > { %s5028_s1 = scalar_lea.vmem %s5027_s16, 512  ;;  %p5029_p11 = scmp.lt.s32.totalorder %s6118_s17, %s5027_s16 }
 0x5e3   : > { %p5030_p3 = scmp.lt.s32.totalorder %s5028_s1, %s5022_s22 }
 0x5e5   : > { %p5031_p5 = por %p5030_p3, %p5029_p11 }
 0x5e7   : > { %p5032_p7 = pnand %p5031_p5, %p5025_p10 }
 0x642   : > { %v4569_v27 = vpop.permute.xlu0 %4568 }
 0x643   : > { %v4571_v7 = vunpack.i.h.bf16 %v4569_v27  ;;  %v4570_v8 = vunpack.i.l.bf16 %v4569_v27  ;;  %v4079_v27 = vld [vmem:[#allocation13] ss:$0 sm:$0xff] }
 0x645   : > { %v3490_v45 = vsel %vm865_vm2, %v3450_v2, %v4571_v7  ;;  %v3489_v17 = vsel %vm865_vm2, %v3449_v58, %v4570_v8 }
 0x64a   : > { %v4574_v31 = vpop.permute.xlu1 %4573 }
 0x64b   : > { %v4576_v52 = vunpack.i.h.bf16 %v4574_v31  ;;  %v4575_v41 = vunpack.i.l.bf16 %v4574_v31 }
 0x64d   : > { %v3493_v15 = vsel %vm3491_vm6, %v3490_v45, %v4576_v52  ;;  %v3492_v18 = vsel %vm3491_vm6, %v3489_v17, %v4575_v41  ;;  %v3666_v41 = vld [vmem:[#allocation17 + $0x20] sm:$0xff]  ;;  %v3668_v17 = vld [vmem:[#allocation17 + $0x30] sm:$0xff] }
 0x653   : > { %v4579_v44 = vpop.permute.xlu0 %4578 }
 0x654   : > { %v4581_v29 = vunpack.i.h.bf16 %v4579_v44  ;;  %v4580_v47 = vunpack.i.l.bf16 %v4579_v44  ;;  %v3667_v44 = vld [vmem:[#allocation17 + $0x28] sm:$0xff] }
 0x655   : > { %v3673_v45 = vpack.c.bf16 %v3667_v44, %v3666_v41 }
 0x656   : > { %v3496_v48 = vsel %vm3494_vm7, %v3493_v15, %v4581_v29  ;;  %v3495_v57 = vsel %vm3494_vm7, %v3492_v18, %v4580_v47  ;;  %v3669_v29 = vld [vmem:[#allocation17 + $0x38] sm:$0xff] }
 0x657   : > { %v3501_v59 = vpack.c.bf16 %v3496_v48, %v3495_v57  ;;  %v3674_v47 = vpack.c.bf16 %v3669_v29, %v3668_v17  ;;  %v4080_v15 = vld [vmem:[#allocation16] ss:$0 sm:$0xff] }
 0x659   : > { %4366 = vmatmul.mubr.msk.bf16.vlgmr.msra.gmra.mrb[36].mxu0 %vm642_vm1, %v3501_v59 }
 0x65a   : > { %4385 = vmatprep.mubr.msk.bf16.mxu0 %vm5130_vm0, %v5129_v0  ;;  %4378 = vmatpush3.bf16.msra.mxu0 %v3671_v4  ;;  %v4084_v4 = vld [vmem:[#allocation20] ss:$0 sm:$0xff] }
 0x65b   : > { %4379 = vmatprep.subr.bf16.mxu0 %v5129_v0 }
 0x65e   : > { %4380 = vmatpush3.bf16.msra.mxu0 %v3672_v55 }
 0x65f   : > { %4381 = vmatprep.subr.bf16.mxu0 %v5129_v0 }
 0x662   : > { %4382 = vmatpush3.bf16.msra.mxu0 %v3673_v45 }
 0x663   : > { %4383 = vmatprep.subr.bf16.mxu0 %v5129_v0 }
 0x666   : > { %4384 = vmatpush3.bf16.msra.mxu0 %v3674_v47 }
 0x72c   : > { %v3548_v61 = vpop.f32.mrb[36].mxu0 }
 0x72d   : > { %v3549_v1 = vadd.f32 %v4076_v60, %v3548_v61  ;;  %v4367_v49 = vpop.f32.mrb[37].mxu0 }
 0x72e   : > { %v3551_v56 = vpop.f32.mrb[38].mxu0 }
 0x72f   : > { %v3552_v58 = vadd.f32 %v4076_v60, %v3551_v56  ;;  %v4368_v2 = vpop.f32.mrb[39].mxu0  ;;  %v3555_v5 = vadd.f32 %v4654_v3, %v3549_v1 }
 0x731   : > { %v3559_v6 = vsel %vm642_vm1, %v3555_v5, 0.0  ;;  %v3556_v10 = vadd.f32 %v4655_v9, %v3552_v58  ;;  %v4082_v58 = vld [vmem:[#allocation19] ss:$0 sm:$0xff] }
 0x732   : > { %3560 = vadd.xlane.f32.xlu1 %v3559_v6 }
 0x733   : > { %v3562_v33 = vsel %vm642_vm1, %v3556_v10, 0.0 }
 0x734   : > { %3563 = vadd.xlane.f32.xlu0 %v3562_v33 }
 0x7bf   : > { %v3561_v37 = vpop.xlane.xlu1 %3560 }
 0x7c0   : > { %v3566_v11 = vmul.f32 0.03125, %v3561_v37 }
 0x7c1   : > { %v3564_v12 = vpop.xlane.xlu0 %3563 }
 0x7c2   : > { %v3568_v42 = vsub.f32 %v3555_v5, %v3566_v11  ;;  %v3567_v13 = vmul.f32 0.03125, %v3564_v12 }
 0x7c4   : > { %v3569_v43 = vsub.f32 %v3556_v10, %v3567_v13  ;;  %v3570_v14 = vmul.f32 %v3568_v42, %v3568_v42 }
 0x7c6   : > { %v3572_v16 = vsel %vm642_vm1, %v3570_v14, 0.0  ;;  %v3571_v21 = vmul.f32 %v3569_v43, %v3569_v43 }
 0x7c7   : > { %3573 = vadd.xlane.f32.xlu0 %v3572_v16 }
 0x7c8   : > { %v3575_v51 = vsel %vm642_vm1, %v3571_v21, 0.0 }
 0x7c9   : > { %3576 = vadd.xlane.f32.xlu1 %v3575_v51 }
 0x854   : > { %v3574_v32 = vpop.xlane.xlu0 %3573 }
 0x855   : > { %v3578_v26 = vmul.f32 0.03125, %v3574_v32  ;;  %v4085_v32 = vld [vmem:[#allocation22] ss:$0 sm:$0xff] }
 0x856   : > { %v3577_v34 = vpop.xlane.xlu1 %3576 }
 0x857   : > { %v3580_v63 = vadd.f32 1e-05, %v3578_v26  ;;  %v3579_v19 = vmul.f32 0.03125, %v3577_v34 }
 0x859   : > { %4646 = vrsqrt.f32 %v3580_v63  ;;  %v3581_v35 = vadd.f32 1e-05, %v3579_v19 }
 0x85b   : > { %4648 = vrsqrt.f32 %v3581_v35 }
 0x863   : > { %v4647_v38 = vpop.eup %4646 }
 0x864   : > { %v3584_v39 = vmul.f32 %v4647_v38, %v3568_v42 }
 0x865   : > { %v4649_v62 = vpop.eup %4648 }
 0x866   : > { %v3592_v36 = vmul.f32 %v4078_v28, %v3584_v39  ;;  %v3585_v40 = vmul.f32 %v4649_v62, %v3569_v43 }
 0x868   : > { %v3593_v31 = vmul.f32 %v4078_v28, %v3585_v40  ;;  %v3600_v7 = vadd.f32 %v4079_v27, %v3592_v36 }
 0x86a   : > { %v3601_v8 = vadd.f32 %v4079_v27, %v3593_v31 }
 0x86c   : > { %v3606_v52 = vpack.c.bf16 %v3601_v8, %v3600_v7 }
 0x86e   : > { %4374 = vmatmul.mubr.msk.bf16.vlgmr.msra.gmra.mrb[44].mxu1 %vm642_vm1, %v3606_v52 }
 0x941   : > { %v3653_v18 = vpop.f32.mrb[44].mxu1 }
 0x942   : > { %v3654_v48 = vadd.f32 %v4080_v15, %v3653_v18  ;;  %v4375_v57 = vpop.f32.mrb[45].mxu1 }
 0x943   : > { %v3656_v59 = vpop.f32.mrb[46].mxu1 }
 0x944   : > { %v3657_v60 = vadd.f32 %v4080_v15, %v3656_v59  ;;  %v4376_v61 = vpop.f32.mrb[47].mxu1  ;;  %v3660_v1 = vmax.f32 %v3654_v48, 0.0 }
 0x946   : > { %v3661_v49 = vmax.f32 %v3657_v60, 0.0 }
 0x948   : > { %v3670_v56 = vpack.c.bf16 %v3661_v49, %v3660_v1 }
 0x94a   : > { %4386 = vmatmul.mubr.msk.bf16.vlgmr.msra.gmra.mrb[40].mxu0 %vm3682_vm8, %v3670_v56 }
 0xa1d   : > { %v3720_v2 = vpop.f32.mrb[40].mxu0 }
 0xa1e   : > { %v3721_v3 = vadd.f32 %v4082_v58, %v3720_v2  ;;  %v4387_v0 = vpop.f32.mrb[41].mxu0 }
 0xa1f   : > { %v3723_v5 = vpop.f32.mrb[42].mxu0 }
 0xa20   : > { %v3724_v6 = vadd.f32 %v4082_v58, %v3723_v5  ;;  %v4388_v9 = vpop.f32.mrb[43].mxu0  ;;  %v3727_v10 = vadd.f32 %v3721_v3, %v3600_v7 }
 0xa22   : > { %v3731_v33 = vsel %vm642_vm1, %v3727_v10, 0.0  ;;  %v3728_v37 = vadd.f32 %v3724_v6, %v3601_v8 }
 0xa23   : > { %3732 = vadd.xlane.f32.xlu0 %v3731_v33 }
 0xa24   : > { %v3734_v11 = vsel %vm642_vm1, %v3728_v37, 0.0 }
 0xa25   : > { %3735 = vadd.xlane.f32.xlu1 %v3734_v11 }
 0xab0   : > { %v3733_v12 = vpop.xlane.xlu0 %3732 }
 0xab1   : > { %v3737_v42 = vmul.f32 0.03125, %v3733_v12 }
 0xab2   : > { %v3736_v13 = vpop.xlane.xlu1 %3735 }
 0xab3   : > { %v3739_v43 = vsub.f32 %v3727_v10, %v3737_v42  ;;  %v3738_v14 = vmul.f32 0.03125, %v3736_v13 }
 0xab5   : > { %v3740_v16 = vsub.f32 %v3728_v37, %v3738_v14  ;;  %v3741_v21 = vmul.f32 %v3739_v43, %v3739_v43 }
 0xab7   : > { %v3743_v51 = vsel %vm642_vm1, %v3741_v21, 0.0  ;;  %v3742_v53 = vmul.f32 %v3740_v16, %v3740_v16 }
 0xab8   : > { %3744 = vadd.xlane.f32.xlu0 %v3743_v51 }
 0xab9   : > { %v3746_v54 = vsel %vm642_vm1, %v3742_v53, 0.0 }
 0xaba   : > { %3747 = vadd.xlane.f32.xlu1 %v3746_v54 }
 0xb45   : > { %v3745_v46 = vpop.xlane.xlu0 %3744 }
 0xb46   : > { %v3749_v25 = vmul.f32 0.03125, %v3745_v46 }
 0xb47   : > { %v3748_v24 = vpop.xlane.xlu1 %3747 }
 0xb48   : > { %v3751_v23 = vadd.f32 1e-05, %v3749_v25  ;;  %v3750_v20 = vmul.f32 0.03125, %v3748_v24 }
 0xb4a   : > { %4650 = vrsqrt.f32 %v3751_v23  ;;  %v3752_v22 = vadd.f32 1e-05, %v3750_v20 }
 0xb4c   : > { %4652 = vrsqrt.f32 %v3752_v22 }
 0xb54   : > { %v4651_v30 = vpop.eup %4650 }
 0xb55   : > { %v3755_v50 = vmul.f32 %v4651_v30, %v3739_v43 }
 0xb56   : > { %v4653_v55 = vpop.eup %4652 }
 0xb57   : > { %v3763_v26 = vmul.f32 %v4084_v4, %v3755_v50  ;;  %v3756_v34 = vmul.f32 %v4653_v55, %v3740_v16 }
 0xb59   : > { %v3771_v63 = vadd.f32 %v4085_v32, %v3763_v26  ;;  %v3764_v19 = vmul.f32 %v4084_v4, %v3756_v34 }
 0xb5b   : > { %v3772_v35 = vadd.f32 %v4085_v32, %v3764_v19  ;;  %3773 = vst.msk [vmem:[%s616_s29] sm:$0xff] %vm642_vm1, %v3771_v63 }
 0xb5d   : > { %3774 = vst.msk [vmem:[%s616_s29 + $0x8] sm:$0xff] %vm642_vm1, %v3772_v35 }
 0xb5e   : > { %5035 = shalt.err (!%p5032_p7)
}
 0xb5f   : > { %s5036_s29 = scalar_lea.hbm %s6115_s23, 256  ;;  %s5040_s14 = scalar_lea.hbm %s6228_s20, 512 }
 0xb60   : > { %p5037_p6 = scmp.ne.s32.totalorder %s6115_s23, %s5036_s29  ;;  %p5041_p1 = scmp.lt.u32.totalorder %s6115_s23, %s6228_s20 }
 0xb61   : > { %p5042_p13 = scmp.lt.u32.totalorder %s5040_s14, %s5036_s29  ;;  %p5044_p2 = scmp.lt.u32.totalorder %s5036_s29, %s6115_s23 }
 0xb62   : > { %p5038_p9 = pnand %p5037_p6, %p6229_p8 }
 0xb63   : > { %p5043_p0 = por %p5042_p13, %p5041_p1 }
 0xb64   : > { %p5039_p12 = pneg %p5038_p9 }
 0xb65   : > { %p5045_p4 = por %p5044_p2, %p5043_p0 }
 0xb67   : > { %p5046_p10 = pnand %p5045_p4, %p5039_p12 }
 0xb69   : > { %5049 = shalt.err (!%p5046_p10)
}
 0xb6a   : > { %s5138_s22 = smov 128   ;;  %s6230_s1 = scalar_lea.sflag [#allocation4], %s5588_s30 }
 0xb6b   : > { %4439 = dma.vmem_to_hbm [thread:$0]  (%p6229_p8), %s6118_s17, 256, %s6115_s23, %s6230_s1, %s5138_s22, %s5138_s22, %s5134_s15  }
 0xb6c PF: > { %s6231_s13 = sld [smem:[#allocation32_spill]]  ;;  %p6232_p11 = scmp.ne.s32.totalorder %s6209_s0, 0 }
 0xb6d   : > { %p6233_p3 = scmp.ge.s32.totalorder %s5112_s28, 2 }
 0xb6f   : > { %p4483_p5 = pnand %p6233_p3, %p6232_p11 }
 0xb72   : > { %s3804_s2 = sand.u32 1, %s6231_s13  }
 0xb73   : > { %s3805_s29 = scalar_lea.sflag [#allocation4], %s3804_s2 }
 0xb74   : > { %5095 = dma.done.wait (!%p4483_p5), %s3805_s29, 256  }
 0xb75   : > { %5097 = vsyncadd (!%p4483_p5), %s3805_s29, 4294967040  ;;  %p32_p7 = scmp.ge.s32.totalorder %s5506_s18, 4   ;;  %s6234_s25 = smov %s5104_s26 }
 0xb76   : > { %s6235_s26 = smov %s5108_s27  ;;  %s6236_s27 = smov %s5517_s19 }
 0xb77   : > { %s6237_s28 = smov %s5506_s18  ;;  %34 = sbr.rel (!%p32_p7) target bundleno = 16 (0x10), region = 165 }
 0xb7e   :  { %3810 = vsyncpa [#allocation3], 1 }
 0xb7f   :  { %3812 = vsyncpa [#allocation3 + $0x1], 1 }
 0xb80   :  { %3813 = vsyncpa [#allocation6], 1 }
 0xb81   :  { %3814 = vsyncpa [#allocation9], 1 }
 0xb82   :  { %3815 = vsyncpa [#allocation12], 1 }
 0xb83   :  { %3816 = vsyncpa [#allocation15], 1 }
 0xb84   :  { %3817 = vsyncpa [#allocation18], 1 }
 0xb85   :  { %3818 = vsyncpa [#allocation21], 1 }
 0xb86   :  { %3819 = vsyncpa [#allocation4], 1 }
 0xb87   :  { %3821 = vsyncpa [#allocation4 + $0x1], 1 }

</bundles_post_ra>
